<compile_context>
chip_gen: v7x
topology: tpu7x:2x2x1
jax: 0.10.0
libtpu: 0.0.40
codegen_flags: <defaults>
</compile_context>

<pallas_src>
import jax
import jax.numpy as jnp
from jax.experimental import pallas as pl
from jax.experimental.pallas import tpu as pltpu

EPS = 1e-5


# --------------------------------------------------------------------------
# Fused kernel: one grid step == one channel c.
#   x_ref   : (B, K)         latent vectors
#   w_ref   : (K, D*H*W)     this channel's slice of W^T
#   b_ref   : (1, D*H*W)     this channel's slice of the bias
#   ehw_ref : (H*W, H2*W2)   constant 0/1 nearest-upsample expansion matrix
#   bn_ref  : (4, C) in SMEM rows = [gamma1, beta1, gamma2, beta2]
#   out_ref : (B, D2*H2*W2)  tanh output slab for this channel (NCDHW order)
#   pre_ref : (B, D2*H2*W2)  pre-tanh output slab for this channel
# --------------------------------------------------------------------------
def _generator_kernel(x_ref, w_ref, b_ref, ehw_ref, bn_ref, out_ref, pre_ref):
    c = pl.program_id(0)
    g1 = bn_ref[0, c]
    be1 = bn_ref[1, c]
    g2 = bn_ref[2, c]
    be2 = bn_ref[3, c]

    # ---- Linear (this channel's 1024 output features only) ----------------
    h = jnp.dot(x_ref[...], w_ref[...], preferred_element_type=jnp.float32)
    h = h + b_ref[...]                                   # (B, D*H*W)
    n = float(h.shape[0] * h.shape[1])                   # per-channel element count

    # ---- BatchNorm3d #1 (training-mode batch stats, single pass) ----------
    s1 = jnp.sum(h)
    s2 = jnp.sum(h * h)
    m1 = s1 / n
    v1 = s2 / n - m1 * m1
    y1 = (h - m1) * (jax.lax.rsqrt(v1 + EPS) * g1) + be1

    # ---- BatchNorm3d #2 ----------------------------------------------------
    # Stats computed at pre-upsample resolution: nearest 2x replication keeps
    # per-channel mean/var exactly unchanged, so this equals BN2 on the
    # upsampled tensor.
    t1 = jnp.sum(y1)
    t2 = jnp.sum(y1 * y1)
    m2 = t1 / n
    v2 = t2 / n - m2 * m2
    y2 = (y1 - m2) * (jax.lax.rsqrt(v2 + EPS) * g2) + be2   # pre-tanh (low-res)
    th = jnp.tanh(y2)                                       # tanh     (low-res)

    # ---- Nearest 2x upsample + write in NCDHW order ------------------------
    ehw = ehw_ref[...]                 # (HW, H2W2) 0/1 expansion matrix
    hw = ehw.shape[0]
    h2w2 = ehw.shape[1]
    d_lo = h.shape[1] // hw            # D (static)

    for d in range(d_lo):
        lo_pre = y2[:, d * hw:(d + 1) * hw]               # (B, HW)
        lo_out = th[:, d * hw:(d + 1) * hw]
        up_pre = jnp.dot(lo_pre, ehw, preferred_element_type=jnp.float32)  # (B, H2W2)
        up_out = jnp.dot(lo_out, ehw, preferred_element_type=jnp.float32)
        # D-axis duplication: same expanded tile to d2 = 2d and 2d+1.
        for r in range(2):
            col = (2 * d + r) * h2w2
            pre_ref[:, col:col + h2w2] = up_pre
            out_ref[:, col:col + h2w2] = up_out


# --------------------------------------------------------------------------
# Wrapper: full SimpleGenerator forward
# --------------------------------------------------------------------------
def simple_generator_forward(x, params, *, start_channels=3, start_tdim=4,
                             start_xydim=16):
    C, D, H, W = start_channels, start_tdim, start_xydim, start_xydim
    D2, H2, W2 = 2 * D, 2 * H, 2 * W
    HW, H2W2, DHW = H * W, H2 * W2, D * H * W
    B, K = x.shape
    F = C * DHW

    # Constant 0/1 expansion matrix for nearest 2x upsample over (H, W):
    # e_hw[h*W + w, h2*W2 + w2] = 1  iff  h2//2 == h and w2//2 == w.
    src = (jnp.arange(H2)[:, None] // 2) * W + (jnp.arange(W2)[None, :] // 2)  # (H2, W2)
    e_hw = (jnp.arange(HW)[:, None, None] == src[None]).astype(jnp.float32)
    e_hw = e_hw.reshape(HW, H2W2)

    bias2d = params["b"].reshape(1, F)
    bn = jnp.stack([params["bn1_gamma"], params["bn1_beta"],
                    params["bn2_gamma"], params["bn2_beta"]], axis=0)  # (4, C)

    out2d, pre2d = pl.pallas_call(
        _generator_kernel,
        grid=(C,),
        in_specs=[
            pl.BlockSpec((B, K), lambda c: (0, 0)),               # x (full, tiny)
            pl.BlockSpec((K, DHW), lambda c: (0, c)),             # W^T column slab per channel
            pl.BlockSpec((1, DHW), lambda c: (0, c)),             # bias slab per channel
            pl.BlockSpec((HW, H2W2), lambda c: (0, 0)),           # expansion matrix (constant)
            pl.BlockSpec(memory_space=pltpu.MemorySpace.SMEM),    # BN affine params (4, C)
        ],
        out_specs=(
            pl.BlockSpec((B, D2 * H2W2), lambda c: (0, c)),       # tanh output slab
            pl.BlockSpec((B, D2 * H2W2), lambda c: (0, c)),       # pre-tanh output slab
        ),
        out_shape=(
            jax.ShapeDtypeStruct((B, C * D2 * H2W2), jnp.float32),
            jax.ShapeDtypeStruct((B, C * D2 * H2W2), jnp.float32),
        ),
        compiler_params=pltpu.CompilerParams(
            dimension_semantics=("parallel",)),
    )(x, params["w_t"], bias2d, e_hw, bn)

    # Memory-order-preserving reshapes (free): (B, C*D2*H2*W2) -> NCDHW.
    out = out2d.reshape(B, C, D2, H2, W2)
    pre = pre2d.reshape(B, C, D2, H2, W2)
    return out, pre


def init_params(key, latent_vector_dim=10, start_xydim=16, start_tdim=4,
                out_channels=3):
    C = out_channels
    feat = C * start_tdim * start_xydim * start_xydim
    k_w, k_b = jax.random.split(key)
    bound = 1.0 / (latent_vector_dim ** 0.5)
    # PyTorch Linear weight is (feat, latent); we store its transpose (latent, feat).
    w_t = jax.random.uniform(k_w, (latent_vector_dim, feat), jnp.float32,
                             minval=-bound, maxval=bound)
    b = jax.random.uniform(k_b, (feat,), jnp.float32, minval=-bound, maxval=bound)
    return {
        "w_t": w_t,
        "b": b,
        # PyTorch BatchNorm3d default affine init: gamma=1, beta=0
        "bn1_gamma": jnp.ones((C,), jnp.float32),
        "bn1_beta": jnp.zeros((C,), jnp.float32),
        "bn2_gamma": jnp.ones((C,), jnp.float32),
        "bn2_beta": jnp.zeros((C,), jnp.float32),
    }


# --------------------------------------------------------------------------
# Pure-JAX reference (for correctness sanity check only)
# --------------------------------------------------------------------------
def _reference_forward(x, params, C, D, XY):
    h = x @ params["w_t"] + params["b"]
    h = h.reshape(x.shape[0], C, D, XY, XY)

    def bn(v, g, b):
        m = v.mean(axis=(0, 2, 3, 4), keepdims=True)
        var = v.var(axis=(0, 2, 3, 4), keepdims=True)     # biased, like PyTorch BN norm
        gg = g.reshape(1, -1, 1, 1, 1)
        bb = b.reshape(1, -1, 1, 1, 1)
        return (v - m) * jax.lax.rsqrt(var + EPS) * gg + bb

    h = bn(h, params["bn1_gamma"], params["bn1_beta"])
    h = jnp.repeat(jnp.repeat(jnp.repeat(h, 2, axis=2), 2, axis=3), 2, axis=4)
    pre = bn(h, params["bn2_gamma"], params["bn2_beta"])
    return jnp.tanh(pre), pre


if __name__ == "__main__":
    key = jax.random.PRNGKey(0)
    k_param, k_x = jax.random.split(key)

    latent_dim, C, D, XY = 10, 3, 4, 16
    batch = 2

    params = init_params(k_param, latent_vector_dim=latent_dim,
                         start_xydim=XY, start_tdim=D, out_channels=C)
    x = jax.random.normal(k_x, (batch, latent_dim), jnp.float32)

    fwd = jax.jit(lambda x, p: simple_generator_forward(
        x, p, start_channels=C, start_tdim=D, start_xydim=XY))
    out, pre = fwd(x, params)
    jax.block_until_ready((out, pre))

    D2 = 2 * D
    XY2 = 2 * XY
    assert out.shape == (batch, C, D2, XY2, XY2)
    assert pre.shape == (batch, C, D2, XY2, XY2)
    assert bool(jnp.all(jnp.isfinite(out))) and bool(jnp.all(jnp.isfinite(pre)))

    # tanh consistency between the two outputs
    assert jnp.allclose(out, jnp.tanh(pre), atol=1e-6)

    # nearest-upsample structure: every 2x2x2 block is constant
    r = pre.reshape(batch, C, D, 2, XY, 2, XY, 2)
    assert jnp.allclose(r, jnp.broadcast_to(r[:, :, :, :1, :, :1, :, :1], r.shape),
                        atol=1e-6)

    # full numerical check against a pure-JAX reference of the PyTorch module
    out_ref, pre_ref = _reference_forward(x, params, C, D, XY)
    assert jnp.allclose(pre, pre_ref, rtol=5e-3, atol=5e-3)
    assert jnp.allclose(out, out_ref, rtol=5e-3, atol=5e-3)

    print("KERNEL_OK")
</pallas_src>

<mosaic_0001>
module attributes {stable_mosaic.version = 11 : i64} {
  func.func @_generator_kernel(%arg0: i32, %arg1: memref<2x10xf32, #tpu.memory_space<vmem>>, %arg2: memref<10x1024xf32, #tpu.memory_space<vmem>>, %arg3: memref<1x1024xf32, #tpu.memory_space<vmem>>, %arg4: memref<256x1024xf32, #tpu.memory_space<vmem>>, %arg5: memref<4x3xf32, #tpu.memory_space<smem>>, %arg6: memref<2x8192xf32, #tpu.memory_space<vmem>>, %arg7: memref<2x8192xf32, #tpu.memory_space<vmem>>) attributes {dimension_semantics = [#tpu.dimension_semantics<parallel>], iteration_bounds = array<i64: 3>, scalar_prefetch = 0 : i64, scratch_operands = 0 : i64, tpu.core_type = #tpu.core_type<tc>, window_params = [{pipeline_mode = #tpu.pipeline_mode<synchronous>, transform_indices = @transform_0, window_bounds = array<i64: 2, 10>}, {transform_indices = @transform_1, window_bounds = array<i64: 10, 1024>}, {transform_indices = @transform_2, window_bounds = array<i64: 1, 1024>}, {pipeline_mode = #tpu.pipeline_mode<synchronous>, transform_indices = @transform_3, window_bounds = array<i64: 256, 1024>}, {transform_indices = @transform_4, window_bounds = array<i64: 4, 3>}, {transform_indices = @transform_5, window_bounds = array<i64: 2, 8192>}, {transform_indices = @transform_6, window_bounds = array<i64: 2, 8192>}]} {
    %c0 = arith.constant 0 : index
    %0 = arith.index_cast %arg0 : i32 to index
    %1 = memref.load %arg5[%c0, %0] : memref<4x3xf32, #tpu.memory_space<smem>>
    %c1 = arith.constant 1 : index
    %2 = arith.index_cast %arg0 : i32 to index
    %3 = memref.load %arg5[%c1, %2] : memref<4x3xf32, #tpu.memory_space<smem>>
    %c2 = arith.constant 2 : index
    %4 = arith.index_cast %arg0 : i32 to index
    %5 = memref.load %arg5[%c2, %4] : memref<4x3xf32, #tpu.memory_space<smem>>
    %c3 = arith.constant 3 : index
    %6 = arith.index_cast %arg0 : i32 to index
    %7 = memref.load %arg5[%c3, %6] : memref<4x3xf32, #tpu.memory_space<smem>>
    %c0_0 = arith.constant 0 : index
    %c0_1 = arith.constant 0 : index
    %8 = vector.load %arg1[%c0_0, %c0_1] : memref<2x10xf32, #tpu.memory_space<vmem>>, vector<2x10xf32>
    %c0_2 = arith.constant 0 : index
    %c0_3 = arith.constant 0 : index
    %9 = vector.load %arg2[%c0_2, %c0_3] : memref<10x1024xf32, #tpu.memory_space<vmem>>, vector<10x1024xf32>
    %cst = arith.constant dense<0.000000e+00> : vector<2x1024xf32>
    %10 = tpu.matmul %8, %9, %cst {dimension_numbers = #tpu.dot_dimension_numbers<[1], [0], [0], [1], [0, 0, 1, 1], [], []>} : vector<2x10xf32>, vector<10x1024xf32>, vector<2x1024xf32> -> vector<2x1024xf32>
    %c0_4 = arith.constant 0 : index
    %c0_5 = arith.constant 0 : index
    %11 = vector.load %arg3[%c0_4, %c0_5] : memref<1x1024xf32, #tpu.memory_space<vmem>>, vector<1x1024xf32>
    %12 = vector.broadcast %11 : vector<1x1024xf32> to vector<2x1024xf32>
    %13 = arith.addf %10, %12 : vector<2x1024xf32>
    %14 = vector.shape_cast %13 : vector<2x1024xf32> to vector<1x2x1024xf32>
    %cst_6 = arith.constant dense<0.000000e+00> : vector<1xf32>
    %15 = vector.multi_reduction <add>, %14, %cst_6 [1, 2] : vector<1x2x1024xf32> to vector<1xf32>
    %16 = vector.shape_cast %15 : vector<1xf32> to vector<1x1x1xf32>
    %17 = vector.extract %16[0, 0, 0] : f32 from vector<1x1x1xf32>
    %18 = arith.mulf %13, %13 : vector<2x1024xf32>
    %19 = vector.shape_cast %18 : vector<2x1024xf32> to vector<1x2x1024xf32>
    %cst_7 = arith.constant dense<0.000000e+00> : vector<1xf32>
    %20 = vector.multi_reduction <add>, %19, %cst_7 [1, 2] : vector<1x2x1024xf32> to vector<1xf32>
    %21 = vector.shape_cast %20 : vector<1xf32> to vector<1x1x1xf32>
    %22 = vector.extract %21[0, 0, 0] : f32 from vector<1x1x1xf32>
    %cst_8 = arith.constant 2.048000e+03 : f32
    %23 = arith.divf %17, %cst_8 : f32
    %cst_9 = arith.constant 2.048000e+03 : f32
    %24 = arith.divf %22, %cst_9 : f32
    %25 = arith.mulf %23, %23 : f32
    %26 = arith.subf %24, %25 : f32
    %27 = vector.broadcast %23 : f32 to vector<2x1024xf32>
    %28 = arith.subf %13, %27 : vector<2x1024xf32>
    %cst_10 = arith.constant 9.99999974E-6 : f32
    %29 = arith.addf %26, %cst_10 : f32
    %30 = math.rsqrt %29 : f32
    %31 = arith.mulf %30, %1 : f32
    %32 = vector.broadcast %31 : f32 to vector<2x1024xf32>
    %33 = arith.mulf %28, %32 : vector<2x1024xf32>
    %34 = vector.broadcast %3 : f32 to vector<2x1024xf32>
    %35 = arith.addf %33, %34 : vector<2x1024xf32>
    %36 = vector.shape_cast %35 : vector<2x1024xf32> to vector<1x2x1024xf32>
    %cst_11 = arith.constant dense<0.000000e+00> : vector<1xf32>
    %37 = vector.multi_reduction <add>, %36, %cst_11 [1, 2] : vector<1x2x1024xf32> to vector<1xf32>
    %38 = vector.shape_cast %37 : vector<1xf32> to vector<1x1x1xf32>
    %39 = vector.extract %38[0, 0, 0] : f32 from vector<1x1x1xf32>
    %40 = arith.mulf %35, %35 : vector<2x1024xf32>
    %41 = vector.shape_cast %40 : vector<2x1024xf32> to vector<1x2x1024xf32>
    %cst_12 = arith.constant dense<0.000000e+00> : vector<1xf32>
    %42 = vector.multi_reduction <add>, %41, %cst_12 [1, 2] : vector<1x2x1024xf32> to vector<1xf32>
    %43 = vector.shape_cast %42 : vector<1xf32> to vector<1x1x1xf32>
    %44 = vector.extract %43[0, 0, 0] : f32 from vector<1x1x1xf32>
    %cst_13 = arith.constant 2.048000e+03 : f32
    %45 = arith.divf %39, %cst_13 : f32
    %cst_14 = arith.constant 2.048000e+03 : f32
    %46 = arith.divf %44, %cst_14 : f32
    %47 = arith.mulf %45, %45 : f32
    %48 = arith.subf %46, %47 : f32
    %49 = vector.broadcast %45 : f32 to vector<2x1024xf32>
    %50 = arith.subf %35, %49 : vector<2x1024xf32>
    %cst_15 = arith.constant 9.99999974E-6 : f32
    %51 = arith.addf %48, %cst_15 : f32
    %52 = math.rsqrt %51 : f32
    %53 = arith.mulf %52, %5 : f32
    %54 = vector.broadcast %53 : f32 to vector<2x1024xf32>
    %55 = arith.mulf %50, %54 : vector<2x1024xf32>
    %56 = vector.broadcast %7 : f32 to vector<2x1024xf32>
    %57 = arith.addf %55, %56 : vector<2x1024xf32>
    %58 = math.tanh %57 : vector<2x1024xf32>
    %c0_16 = arith.constant 0 : index
    %c0_17 = arith.constant 0 : index
    %59 = vector.load %arg4[%c0_16, %c0_17] : memref<256x1024xf32, #tpu.memory_space<vmem>>, vector<256x1024xf32>
    %60 = vector.extract_strided_slice %57 {offsets = [0, 0], sizes = [2, 256], strides = [1, 1]} : vector<2x1024xf32> to vector<2x256xf32>
    %61 = vector.extract_strided_slice %58 {offsets = [0, 0], sizes = [2, 256], strides = [1, 1]} : vector<2x1024xf32> to vector<2x256xf32>
    %cst_18 = arith.constant dense<0.000000e+00> : vector<2x1024xf32>
    %62 = tpu.matmul %60, %59, %cst_18 {dimension_numbers = #tpu.dot_dimension_numbers<[1], [0], [0], [1], [0, 0, 1, 1], [], []>} : vector<2x256xf32>, vector<256x1024xf32>, vector<2x1024xf32> -> vector<2x1024xf32>
    %cst_19 = arith.constant dense<0.000000e+00> : vector<2x1024xf32>
    %63 = tpu.matmul %61, %59, %cst_19 {dimension_numbers = #tpu.dot_dimension_numbers<[1], [0], [0], [1], [0, 0, 1, 1], [], []>} : vector<2x256xf32>, vector<256x1024xf32>, vector<2x1024xf32> -> vector<2x1024xf32>
    %c0_20 = arith.constant 0 : index
    %c0_21 = arith.constant 0 : index
    %64 = vector.load %arg7[%c0_20, %c0_21] : memref<2x8192xf32, #tpu.memory_space<vmem>>, vector<2x1024xf32>
    tpu.vector_store %arg7[%c0_20, %c0_21], %62 {strides = array<i32>} : memref<2x8192xf32, #tpu.memory_space<vmem>>, vector<2x1024xf32>,
    %c0_22 = arith.constant 0 : index
    %c0_23 = arith.constant 0 : index
    %65 = vector.load %arg6[%c0_22, %c0_23] : memref<2x8192xf32, #tpu.memory_space<vmem>>, vector<2x1024xf32>
    tpu.vector_store %arg6[%c0_22, %c0_23], %63 {strides = array<i32>} : memref<2x8192xf32, #tpu.memory_space<vmem>>, vector<2x1024xf32>,
    %c0_24 = arith.constant 0 : index
    %c1024 = arith.constant 1024 : index
    %66 = vector.load %arg7[%c0_24, %c1024] : memref<2x8192xf32, #tpu.memory_space<vmem>>, vector<2x1024xf32>
    tpu.vector_store %arg7[%c0_24, %c1024], %62 {strides = array<i32>} : memref<2x8192xf32, #tpu.memory_space<vmem>>, vector<2x1024xf32>,
    %c0_25 = arith.constant 0 : index
    %c1024_26 = arith.constant 1024 : index
    %67 = vector.load %arg6[%c0_25, %c1024_26] : memref<2x8192xf32, #tpu.memory_space<vmem>>, vector<2x1024xf32>
    tpu.vector_store %arg6[%c0_25, %c1024_26], %63 {strides = array<i32>} : memref<2x8192xf32, #tpu.memory_space<vmem>>, vector<2x1024xf32>,
    %68 = vector.extract_strided_slice %57 {offsets = [0, 256], sizes = [2, 256], strides = [1, 1]} : vector<2x1024xf32> to vector<2x256xf32>
    %69 = vector.extract_strided_slice %58 {offsets = [0, 256], sizes = [2, 256], strides = [1, 1]} : vector<2x1024xf32> to vector<2x256xf32>
    %cst_27 = arith.constant dense<0.000000e+00> : vector<2x1024xf32>
    %70 = tpu.matmul %68, %59, %cst_27 {dimension_numbers = #tpu.dot_dimension_numbers<[1], [0], [0], [1], [0, 0, 1, 1], [], []>} : vector<2x256xf32>, vector<256x1024xf32>, vector<2x1024xf32> -> vector<2x1024xf32>
    %cst_28 = arith.constant dense<0.000000e+00> : vector<2x1024xf32>
    %71 = tpu.matmul %69, %59, %cst_28 {dimension_numbers = #tpu.dot_dimension_numbers<[1], [0], [0], [1], [0, 0, 1, 1], [], []>} : vector<2x256xf32>, vector<256x1024xf32>, vector<2x1024xf32> -> vector<2x1024xf32>
    %c0_29 = arith.constant 0 : index
    %c2048 = arith.constant 2048 : index
    %72 = vector.load %arg7[%c0_29, %c2048] : memref<2x8192xf32, #tpu.memory_space<vmem>>, vector<2x1024xf32>
    tpu.vector_store %arg7[%c0_29, %c2048], %70 {strides = array<i32>} : memref<2x8192xf32, #tpu.memory_space<vmem>>, vector<2x1024xf32>,
    %c0_30 = arith.constant 0 : index
    %c2048_31 = arith.constant 2048 : index
    %73 = vector.load %arg6[%c0_30, %c2048_31] : memref<2x8192xf32, #tpu.memory_space<vmem>>, vector<2x1024xf32>
    tpu.vector_store %arg6[%c0_30, %c2048_31], %71 {strides = array<i32>} : memref<2x8192xf32, #tpu.memory_space<vmem>>, vector<2x1024xf32>,
    %c0_32 = arith.constant 0 : index
    %c3072 = arith.constant 3072 : index
    %74 = vector.load %arg7[%c0_32, %c3072] : memref<2x8192xf32, #tpu.memory_space<vmem>>, vector<2x1024xf32>
    tpu.vector_store %arg7[%c0_32, %c3072], %70 {strides = array<i32>} : memref<2x8192xf32, #tpu.memory_space<vmem>>, vector<2x1024xf32>,
    %c0_33 = arith.constant 0 : index
    %c3072_34 = arith.constant 3072 : index
    %75 = vector.load %arg6[%c0_33, %c3072_34] : memref<2x8192xf32, #tpu.memory_space<vmem>>, vector<2x1024xf32>
    tpu.vector_store %arg6[%c0_33, %c3072_34], %71 {strides = array<i32>} : memref<2x8192xf32, #tpu.memory_space<vmem>>, vector<2x1024xf32>,
    %76 = vector.extract_strided_slice %57 {offsets = [0, 512], sizes = [2, 256], strides = [1, 1]} : vector<2x1024xf32> to vector<2x256xf32>
    %77 = vector.extract_strided_slice %58 {offsets = [0, 512], sizes = [2, 256], strides = [1, 1]} : vector<2x1024xf32> to vector<2x256xf32>
    %cst_35 = arith.constant dense<0.000000e+00> : vector<2x1024xf32>
    %78 = tpu.matmul %76, %59, %cst_35 {dimension_numbers = #tpu.dot_dimension_numbers<[1], [0], [0], [1], [0, 0, 1, 1], [], []>} : vector<2x256xf32>, vector<256x1024xf32>, vector<2x1024xf32> -> vector<2x1024xf32>
    %cst_36 = arith.constant dense<0.000000e+00> : vector<2x1024xf32>
    %79 = tpu.matmul %77, %59, %cst_36 {dimension_numbers = #tpu.dot_dimension_numbers<[1], [0], [0], [1], [0, 0, 1, 1], [], []>} : vector<2x256xf32>, vector<256x1024xf32>, vector<2x1024xf32> -> vector<2x1024xf32>
    %c0_37 = arith.constant 0 : index
    %c4096 = arith.constant 4096 : index
    %80 = vector.load %arg7[%c0_37, %c4096] : memref<2x8192xf32, #tpu.memory_space<vmem>>, vector<2x1024xf32>
    tpu.vector_store %arg7[%c0_37, %c4096], %78 {strides = array<i32>} : memref<2x8192xf32, #tpu.memory_space<vmem>>, vector<2x1024xf32>,
    %c0_38 = arith.constant 0 : index
    %c4096_39 = arith.constant 4096 : index
    %81 = vector.load %arg6[%c0_38, %c4096_39] : memref<2x8192xf32, #tpu.memory_space<vmem>>, vector<2x1024xf32>
    tpu.vector_store %arg6[%c0_38, %c4096_39], %79 {strides = array<i32>} : memref<2x8192xf32, #tpu.memory_space<vmem>>, vector<2x1024xf32>,
    %c0_40 = arith.constant 0 : index
    %c5120 = arith.constant 5120 : index
    %82 = vector.load %arg7[%c0_40, %c5120] : memref<2x8192xf32, #tpu.memory_space<vmem>>, vector<2x1024xf32>
    tpu.vector_store %arg7[%c0_40, %c5120], %78 {strides = array<i32>} : memref<2x8192xf32, #tpu.memory_space<vmem>>, vector<2x1024xf32>,
    %c0_41 = arith.constant 0 : index
    %c5120_42 = arith.constant 5120 : index
    %83 = vector.load %arg6[%c0_41, %c5120_42] : memref<2x8192xf32, #tpu.memory_space<vmem>>, vector<2x1024xf32>
    tpu.vector_store %arg6[%c0_41, %c5120_42], %79 {strides = array<i32>} : memref<2x8192xf32, #tpu.memory_space<vmem>>, vector<2x1024xf32>,
    %84 = vector.extract_strided_slice %57 {offsets = [0, 768], sizes = [2, 256], strides = [1, 1]} : vector<2x1024xf32> to vector<2x256xf32>
    %85 = vector.extract_strided_slice %58 {offsets = [0, 768], sizes = [2, 256], strides = [1, 1]} : vector<2x1024xf32> to vector<2x256xf32>
    %cst_43 = arith.constant dense<0.000000e+00> : vector<2x1024xf32>
    %86 = tpu.matmul %84, %59, %cst_43 {dimension_numbers = #tpu.dot_dimension_numbers<[1], [0], [0], [1], [0, 0, 1, 1], [], []>} : vector<2x256xf32>, vector<256x1024xf32>, vector<2x1024xf32> -> vector<2x1024xf32>
    %cst_44 = arith.constant dense<0.000000e+00> : vector<2x1024xf32>
    %87 = tpu.matmul %85, %59, %cst_44 {dimension_numbers = #tpu.dot_dimension_numbers<[1], [0], [0], [1], [0, 0, 1, 1], [], []>} : vector<2x256xf32>, vector<256x1024xf32>, vector<2x1024xf32> -> vector<2x1024xf32>
    %c0_45 = arith.constant 0 : index
    %c6144 = arith.constant 6144 : index
    %88 = vector.load %arg7[%c0_45, %c6144] : memref<2x8192xf32, #tpu.memory_space<vmem>>, vector<2x1024xf32>
    tpu.vector_store %arg7[%c0_45, %c6144], %86 {strides = array<i32>} : memref<2x8192xf32, #tpu.memory_space<vmem>>, vector<2x1024xf32>,
    %c0_46 = arith.constant 0 : index
    %c6144_47 = arith.constant 6144 : index
    %89 = vector.load %arg6[%c0_46, %c6144_47] : memref<2x8192xf32, #tpu.memory_space<vmem>>, vector<2x1024xf32>
    tpu.vector_store %arg6[%c0_46, %c6144_47], %87 {strides = array<i32>} : memref<2x8192xf32, #tpu.memory_space<vmem>>, vector<2x1024xf32>,
    %c0_48 = arith.constant 0 : index
    %c7168 = arith.constant 7168 : index
    %90 = vector.load %arg7[%c0_48, %c7168] : memref<2x8192xf32, #tpu.memory_space<vmem>>, vector<2x1024xf32>
    tpu.vector_store %arg7[%c0_48, %c7168], %86 {strides = array<i32>} : memref<2x8192xf32, #tpu.memory_space<vmem>>, vector<2x1024xf32>,
    %c0_49 = arith.constant 0 : index
    %c7168_50 = arith.constant 7168 : index
    %91 = vector.load %arg6[%c0_49, %c7168_50] : memref<2x8192xf32, #tpu.memory_space<vmem>>, vector<2x1024xf32>
    tpu.vector_store %arg6[%c0_49, %c7168_50], %87 {strides = array<i32>} : memref<2x8192xf32, #tpu.memory_space<vmem>>, vector<2x1024xf32>,
    return
  }
  func.func @transform_0(%arg0: i32) -> (i32, i32) {
    %c0_i32 = arith.constant 0 : i32
    %c0_i32_0 = arith.constant 0 : i32
    %c0_i32_1 = arith.constant 0 : i32
    return %c0_i32, %c0_i32_0 : i32, i32
  }
  func.func @transform_1(%arg0: i32) -> (i32, i32) {
    %c0_i32 = arith.constant 0 : i32
    %c0_i32_0 = arith.constant 0 : i32
    return %c0_i32, %arg0 : i32, i32
  }
  func.func @transform_2(%arg0: i32) -> (i32, i32) {
    %c0_i32 = arith.constant 0 : i32
    %c0_i32_0 = arith.constant 0 : i32
    return %c0_i32, %arg0 : i32, i32
  }
  func.func @transform_3(%arg0: i32) -> (i32, i32) {
    %c0_i32 = arith.constant 0 : i32
    %c0_i32_0 = arith.constant 0 : i32
    %c0_i32_1 = arith.constant 0 : i32
    return %c0_i32, %c0_i32_0 : i32, i32
  }
  func.func @transform_4(%arg0: i32) -> (i32, i32) {
    %c0_i32 = arith.constant 0 : i32
    %c0_i32_0 = arith.constant 0 : i32
    %c0_i32_1 = arith.constant 0 : i32
    return %c0_i32, %c0_i32_0 : i32, i32
  }
  func.func @transform_5(%arg0: i32) -> (i32, i32) {
    %c0_i32 = arith.constant 0 : i32
    %c0_i32_0 = arith.constant 0 : i32
    return %c0_i32, %arg0 : i32, i32
  }
  func.func @transform_6(%arg0: i32) -> (i32, i32) {
    %c0_i32 = arith.constant 0 : i32
    %c0_i32_0 = arith.constant 0 : i32
    return %c0_i32, %arg0 : i32, i32
  }
}

</mosaic_0001>

<bundles_post_ra>
// kernel: _lambda_.1
= control target key start
LH: loop header
LB: loop body
LE: loop exit
PB: predicated region body
PF: predicated region fallthrough
CT: control target
= control target key end

     0   :  { %12 = vsyncpa [#allocation4], 0  ;;  %s6233_s21 = smov 0   ;;  %s6235_s22 = smov 0   ;;  %s8762_s0 = inlined_call_operand.vmem [shape: f32[2,10], index: 0, kind: input, shape index: {}]   ;;  %s8763_s1 = inlined_call_operand.vmem [shape: f32[10,3072], index: 1, kind: input, shape index: {}]   ;;  %s8764_s2 = inlined_call_operand.vmem [shape: f32[1,3072], index: 2, kind: input, shape index: {}]   ;;  %s8765_s3 = inlined_call_operand.vmem [shape: f32[256,1024], index: 3, kind: input, shape index: {}]   ;;  %s8766_s4 = inlined_call_operand.vmem [shape: f32[4,3], index: 4, kind: input, shape index: {}]   ;;  %s8767_s5 = inlined_call_operand.vmem [shape: f32[2,24576], index: 5, kind: output, shape index: {0}]   ;;  %s8768_s6 = inlined_call_operand.vmem [shape: f32[2,24576], index: 6, kind: output, shape index: {1}]  }
   0x1   :  { %s6237_s23 = smov 0  }
   0x2 LB: > { %s6249_s24 = sadd.s32 4294967295, %s6192_s23   ;;  %s6252_s25 = sadd.s32 1, %s6192_s23   ;;  %s6192_s23 = sphi %s6237_s23, %s9685_s23   ;;  %s6188_s22 = sphi %s6235_s22, %s9684_s22   ;;  %s6184_s21 = sphi %s6233_s21, %s9683_s21  }
   0x3   : > { %s43_s26 = ssub.s32 %s6192_s23, %s6252_s25  ;;  %s46_s27 = sadd.s32 1, %s6188_s22 }
   0x4   : > { %p44_p0 = scmp.eq.s32.totalorder %s43_s26, 0  ;;  %p53_p1 = scmp.ne.s32.totalorder %s6188_s22, %s6184_s21 }
   0x5   : > { %p54_p2 = scmp.eq.s32.totalorder %s6192_s23, 0  ;;  %p3971_p3 = scmp.ge.s32.totalorder %s6192_s23, 1 }
   0x6   : > { %s6262_s28 = scalar_select %p44_p0, %s6188_s22, %s46_s27  }
   0x7   : > { %p6264_p4 = por %p54_p2, %p53_p1  ;;  %p190_p5 = scmp.lt.s32.totalorder %s6192_s23, 4 }
   0x8   : > { %p6101_p6 = scmp.eq.s32.totalorder %s6249_s24, 0  ;;  %s209_s9 = sshll.u32 %s8766_s4, 4  ;;  %s210_s9 = int_to_ptr.vmem [resolvable:$true] %s209_s9 }
   0x9   : > { %p6270_p7 = pnand %p3971_p3, %p190_p5  ;;  %s6151_s10 = scalar_lea.vmem %s210_s9, 64 }
   0xa   : > { %p6152_p10 = scmp.ne.s32.totalorder %s210_s9, %s6151_s10  ;;  %p6159_p0 = scmp.lt.s32.totalorder %s210_s9, %s210_s9 }
   0xb   : > { %p6097_p8 = pneg %p6270_p7  ;;  %p6160_p1 = scmp.lt.s32.totalorder %s6151_s10, %s6151_s10 }
   0xd   : > { %p6098_p9 = pnand %p6101_p6, %p6097_p8  ;;  %p6161_p2 = por %p6160_p1, %p6159_p0 }
   0xf   : > { %p6153_p11 = pneg %p6098_p9 }
  0x11   : > { %p6154_p12 = pnand %p6153_p11, %p6152_p10 }
  0x13   : > { %p6155_p13 = pneg %p6154_p12 }
  0x15   : > { %p6162_p3 = pnand %p6161_p2, %p6155_p13 }
  0x17   : > { %6165 = shalt.err (!%p6162_p3)
}
  0x18   : > { %s6194_s11 = smov [#allocation3]   ;;  %p3973_p5 = scmp.ge.s32.totalorder %s6192_s23, 3 }
  0x19   : > { %6100 = dma.vmem_to_smem (!%p6098_p9), %s210_s9, 64, %s6194_s11, [#allocation4]  }
  0x1a   : > { %216 = sbr.rel (%p3973_p5) target bundleno = 45 (0x2d), region = 28 }
  0x21   : > { %219 = sbr.rel (!%p6264_p4) target bundleno = 45 (0x2d), region = 32  ;;  %s221_s12 = sand.u32 (%p6264_p4), 1, %s6188_s22  }
  0x22   : > { %s4002_s13 = sshll.u32 (%p6264_p4), %s6192_s23, 6  ;;  %s3974_s14 = sshll.u32 (%p6264_p4), %s221_s12, 7 }
  0x23   : > { %s6289_s17 = scalar_lea.vmem (%p6264_p4), %s8763_s1, %s4002_s13  ;;  %s223_s18 = scalar_lea.vmem (%p6264_p4), [#allocation2], %s3974_s14 }
  0x24   : > { %v239_v0 = vld [vmem:[%s6289_s17] sm:$0xff] (%p6264_p4)  ;;  %v241_v1 = vld [vmem:[%s6289_s17 + $0x8] sm:$0xff] (%p6264_p4)  ;;  %v243_v2 = vld [vmem:[%s6289_s17 + $0x10] sm:$0xff] (%p6264_p4) }
  0x25   : > { %240 = vst [vmem:[%s223_s18] sm:$0xff] (%p6264_p4), %v239_v0  ;;  %242 = vst [vmem:[%s223_s18 + $0x8] sm:$0xff] (%p6264_p4), %v241_v1  ;;  %v245_v3 = vld [vmem:[%s6289_s17 + $0x18] sm:$0xff] (%p6264_p4)  ;;  %v247_v4 = vld [vmem:[%s6289_s17 + $0x20] sm:$0xff] (%p6264_p4) }
  0x26   : > { %244 = vst [vmem:[%s223_s18 + $0x10] sm:$0xff] (%p6264_p4), %v243_v2  ;;  %v249_v5 = vld [vmem:[%s6289_s17 + $0x28] sm:$0xff] (%p6264_p4)  ;;  %246 = vst [vmem:[%s223_s18 + $0x18] sm:$0xff] (%p6264_p4), %v245_v3  ;;  %v251_v6 = vld [vmem:[%s6289_s17 + $0x30] sm:$0xff] (%p6264_p4) }
  0x27   : > { %248 = vst [vmem:[%s223_s18 + $0x20] sm:$0xff] (%p6264_p4), %v247_v4  ;;  %250 = vst [vmem:[%s223_s18 + $0x28] sm:$0xff] (%p6264_p4), %v249_v5  ;;  %v253_v7 = vld [vmem:[%s6289_s17 + $0x38] sm:$0xff] (%p6264_p4)  ;;  %v255_v8 = vld [vmem:[%s6289_s17 + $0xc0] sm:$0xff] (%p6264_p4) }
  0x28   : > { %252 = vst [vmem:[%s223_s18 + $0x30] sm:$0xff] %v251_v6  ;;  %254 = vst [vmem:[%s223_s18 + $0x38] sm:$0xff] %v253_v7  ;;  %v257_v9 = vld [vmem:[%s6289_s17 + $0xc8] sm:$0xff]  ;;  %v259_v10 = vld [vmem:[%s6289_s17 + $0xd0] sm:$0xff] }
  0x29   : > { %256 = vst [vmem:[%s223_s18 + $0x40] sm:$0xff] %v255_v8  ;;  %v261_v11 = vld [vmem:[%s6289_s17 + $0xd8] sm:$0xff]  ;;  %258 = vst [vmem:[%s223_s18 + $0x48] sm:$0xff] %v257_v9  ;;  %v263_v12 = vld [vmem:[%s6289_s17 + $0xe0] sm:$0xff] }
  0x2a   : > { %260 = vst [vmem:[%s223_s18 + $0x50] sm:$0xff] %v259_v10  ;;  %262 = vst [vmem:[%s223_s18 + $0x58] sm:$0xff] %v261_v11  ;;  %v265_v13 = vld [vmem:[%s6289_s17 + $0xe8] sm:$0xff]  ;;  %v267_v14 = vld [vmem:[%s6289_s17 + $0xf0] sm:$0xff] }
  0x2b   : > { %264 = vst [vmem:[%s223_s18 + $0x60] sm:$0xff] %v263_v12  ;;  %266 = vst [vmem:[%s223_s18 + $0x68] sm:$0xff] %v265_v13  ;;  %v269_v15 = vld [vmem:[%s6289_s17 + $0xf8] sm:$0xff] }
  0x2c   : > { %268 = vst [vmem:[%s223_s18 + $0x70] sm:$0xff] %v267_v14  ;;  %270 = vst [vmem:[%s223_s18 + $0x78] sm:$0xff] %v269_v15 }
  0x2d PF: > { %287 = sbr.rel (%p6270_p7) target bundleno = 2059 (0x80b), region = 59 }
  0x34   : > { %s290_s19 = sand.u32 1, %s6184_s21  }
  0x35   : > { %s3978_s20 = sshll.u32 %s290_s19, 7 }
  0x36   : > { %s6310_s23 = scalar_lea.vmem [#allocation2], %s3978_s20 }
  0x37   : > { %6179 = dma.done.wait (%p6101_p6), [#allocation4], 64  }
  0x38   : > { %6181 = vsyncadd (%p6101_p6), [#allocation4], 4294967232 }
  0x39   : > { %300 = sfence }
  0x3a   : > { %v370_v16 = vld [vmem:[%s6310_s23 + $0x8] sm:$0xff]  ;;  %vm431_vm0 = vcmask 1041408   ;;  %v369_v18 = vld [vmem:[%s6310_s23] sm:$0xff]  ;;  %vm6195_vm1 = vmmov 1   ;;  %v372_v22 = vld [vmem:[%s6310_s23 + $0x18] sm:$0xff]  ;;  %v6196_v25 = vmov 0.0   ;;  %v387_v43 = vlaneseq }
  0x3b   : > { %v378_v17 = vld [vmem:[%s6310_s23 + $0x48] sm:$0x3]  ;;  %vm6320_vm2 = vmpackc.low %vm431_vm0, %vm6195_vm1  ;;  %v377_v21 = vld [vmem:[%s6310_s23 + $0x40] sm:$0x3]  ;;  %520 = vmatprep.mubr.f32.mxu0 %v6196_v25  ;;  %591 = vmatprep.mubr.f32.mxu1 %v6196_v25  ;;  %vm427_vm3 = vcmask 80896   ;;  %s3980_s27 = sshll.u32 %s6249_s24, 3 }
  0x3c   : > { %v4009_v19 = vpack.c.bf16 %v378_v17, %v370_v16  ;;  %v4012_v23 = vpack.c.bf16 %v377_v21, %v369_v18  ;;  %v380_v24 = vld [vmem:[%s6310_s23 + $0x58] sm:$0x3]  ;;  %v371_v26 = vld [vmem:[%s6310_s23 + $0x10] sm:$0xff]  ;;  %v368_v30 = vld [vmem:[%s8762_s0] sm:$0x3]  ;;  %p335_p4 = scmp.lt.s32.totalorder %s3980_s27, 23 }
  0x3d   : > { %v379_v27 = vld [vmem:[%s6310_s23 + $0x50] sm:$0x3]  ;;  %v4015_v28 = vpack.c.bf16 %v380_v24, %v372_v22  ;;  %v374_v31 = vld [vmem:[%s6310_s23 + $0x28] sm:$0xff]  ;;  %v373_v34 = vld [vmem:[%s6310_s23 + $0x20] sm:$0xff]  ;;  %v6361_v44 = vshrl.u32 %v387_v43, 7  ;;  %s352_s15 = sshra.s32 %s6249_s24, 7 }
  0x3e   : > { %4011 = vmatprep.subr.msk.bf16.mxu0 %vm6320_vm2, %v4009_v19  ;;  %v4018_v29 = vpack.c.bf16 %v379_v27, %v371_v26  ;;  %v382_v32 = vld [vmem:[%s6310_s23 + $0x68] sm:$0x3]  ;;  %v381_v35 = vld [vmem:[%s6310_s23 + $0x60] sm:$0x3]  ;;  %v376_v36 = vld [vmem:[%s6310_s23 + $0x38] sm:$0xff]  ;;  %s9687_s27 = smov (!%p335_p4, %s3980_s27), 23 }
  0x3f   : > { %4014 = vmatpush1.bf16.msk.msra.mxu0 %vm6320_vm2, %v4012_v23  ;;  %v4021_v33 = vpack.c.bf16 %v382_v32, %v374_v31  ;;  %4017 = vmatprep.subr.msk.bf16.mxu1 %vm6320_vm2, %v4015_v28  ;;  %v4024_v37 = vpack.c.bf16 %v381_v35, %v373_v34  ;;  %v384_v38 = vld [vmem:[%s6310_s23 + $0x78] sm:$0x3]  ;;  %v375_v39 = vld [vmem:[%s6310_s23 + $0x30] sm:$0xff]  ;;  %9039 = vst [vmem:[#allocation6_spill] sm:$0xff] %v6361_v44  ;;  %s337_s7 = scalar_lea.vmem %s8764_s2, %s9687_s27  ;;  %v389_v45 = vsub.s32 0, %v6361_v44  ;;  %v393_v47 = vsub.s32 1, %v6361_v44 }
  0x40   : > { %v383_v40 = vld [vmem:[%s6310_s23 + $0x70] sm:$0x3]  ;;  %4020 = vmatpush1.bf16.msk.msra.mxu1 %vm6320_vm2, %v4018_v29  ;;  %v4027_v41 = vpack.c.bf16 %v384_v38, %v376_v36  ;;  %v385_v46 = vld [vmem:[%s337_s7] sm:$0xff]  ;;  %v397_v48 = vsub.s32 2, %v6361_v44  ;;  %v401_v49 = vsub.s32 3, %v6361_v44  ;;  %v405_v52 = vsub.s32 4, %v6361_v44 }
  0x41   : > { %4023 = vmatprep.subr.msk.bf16.mxu0 %vm6320_vm2, %v4021_v33  ;;  %v4030_v42 = vpack.c.bf16 %v383_v40, %v375_v39  ;;  %v390_v50 = vrot.slane %v385_v46, %v389_v45  ;;  %v394_v51 = vrot.slane %v385_v46, %v393_v47  ;;  %v409_v54 = vsub.s32 5, %v6361_v44  ;;  %s6431_s16 = sshll.u32 %s352_s15, 7  ;;  %s6435_s18 = sand.u32 127, %s6249_s24 }
  0x42   : > { %3990 = vmatmul.mubr.msk.f32.vlgmr.msra.gmra.mrb[0].mxu0 %vm427_vm3, %v368_v30  ;;  %4029 = vmatprep.subr.msk.bf16.mxu1 %vm6320_vm2, %v4027_v41  ;;  %v398_v53 = vrot.slane %v385_v46, %v397_v48  ;;  %v402_v56 = vrot.slane %v385_v46, %v401_v49  ;;  %v413_v57 = vsub.s32 6, %v6361_v44  ;;  %v406_v62 = vrot.slane %v385_v46, %v405_v52  ;;  %s4004_s17 = sadd.s32 128, %s6431_s16  ;;  %s351_s20 = sld [smem:[#allocation3 + %s6249_s24]] }
  0x43   : > { %4026 = vmatpush1.bf16.msk.msra.mxu0 %vm6320_vm2, %v4024_v37  ;;  %662 = vmatprep.mubr.f32.mxu0 %v6196_v25  ;;  %v417_v63 = vsub.s32 7, %v6361_v44  ;;  %v410_v4 = vrot.slane %v385_v46, %v409_v54  ;;  %s358_s19 = sadd.s32 %s4004_s17, %s6435_s18  ;;  %s4008_s29 = sadd.s32 384, %s6431_s16 }
  0x44   : > { %3993 = vmatmul.mubr.msk.f32.vlgmr.msra.gmra.mrb[0].mxu1 %vm427_vm3, %v368_v30  ;;  %v414_v9 = vrot.slane %v385_v46, %v413_v57  ;;  %s359_s23 = sld [smem:[#allocation3 + %s358_s19]]  ;;  %s4006_s30 = sadd.s32 256, %s6431_s16 }
  0x45   : > { %4032 = vmatpush1.bf16.msk.msra.mxu1 %vm6320_vm2, %v4030_v42  ;;  %733 = vmatprep.mubr.f32.mxu1 %v6196_v25  ;;  %v418_v19 = vrot.slane %v385_v46, %v417_v63  ;;  %s366_s7 = sadd.s32 %s4008_s29, %s6435_s18 }
  0x46   : > { %3996 = vmatmul.mubr.msk.f32.vlgmr.msra.gmra.mrb[2].mxu0 %vm427_vm3, %v368_v30 }
  0x48   : > { %3999 = vmatmul.mubr.msk.f32.vlgmr.msra.gmra.mrb[2].mxu1 %vm427_vm3, %v368_v30 }
 0x115   : > { %v522_v55 = vpop.f32.mrb[0].mxu0 }
 0x116   : > { %v6373_v58 = vadd.f32 %v522_v55, %v390_v50  ;;  %v524_v59 = vpop.f32.mrb[1].mxu0 }
 0x117   : > { %v6375_v60 = vadd.f32 %v524_v59, %v394_v51  ;;  %v593_v61 = vpop.f32.mrb[0].mxu1 }
 0x118   : > { %v740_v0 = vsel %vm431_vm0, %v6373_v58, 0.0  ;;  %v764_v1 = vmul.f32 %v6373_v58, %v6373_v58  ;;  %v6382_v2 = vadd.f32 %v593_v61, %v398_v53  ;;  %v595_v3 = vpop.f32.mrb[1].mxu1 }
 0x119   : > { %v741_v5 = vsel %vm431_vm0, %v6375_v60, 0.0  ;;  %v765_v6 = vmul.f32 %v6375_v60, %v6375_v60  ;;  %v6388_v7 = vadd.f32 %v595_v3, %v402_v56  ;;  %v664_v8 = vpop.f32.mrb[2].mxu0 }
 0x11a   : > { %v772_v10 = vsel %vm431_vm0, %v764_v1, 0.0  ;;  %v742_v11 = vadd.f32 %v741_v5, %v740_v0  ;;  %v743_v12 = vsel %vm431_vm0, %v6382_v2, 0.0  ;;  %v766_v13 = vmul.f32 %v6382_v2, %v6382_v2  ;;  %v666_v14 = vpop.f32.mrb[3].mxu0 }
 0x11b   : > { %v773_v15 = vsel %vm431_vm0, %v765_v6, 0.0  ;;  %v767_v16 = vmul.f32 %v6388_v7, %v6388_v7  ;;  %v6398_v17 = vadd.f32 %v664_v8, %v406_v62  ;;  %v735_v18 = vpop.f32.mrb[2].mxu1  ;;  %v6401_v23 = vadd.f32 %v666_v14, %v410_v4 }
 0x11c   : > { %v774_v20 = vadd.f32 %v773_v15, %v772_v10  ;;  %v744_v21 = vadd.f32 %v743_v12, %v742_v11  ;;  %v775_v22 = vsel %vm431_vm0, %v766_v13, 0.0  ;;  %v737_v24 = vpop.f32.mrb[3].mxu1  ;;  %v745_v25 = vsel %vm431_vm0, %v6388_v7, 0.0 }
 0x11d   : > { %v747_v26 = vsel %vm431_vm0, %v6398_v17, 0.0  ;;  %v768_v27 = vmul.f32 %v6398_v17, %v6398_v17  ;;  %v6409_v28 = vadd.f32 %v735_v18, %v414_v9  ;;  %v777_v31 = vsel %vm431_vm0, %v767_v16, 0.0 }
 0x11e   : > { %v776_v29 = vadd.f32 %v775_v22, %v774_v20  ;;  %v746_v30 = vadd.f32 %v745_v25, %v744_v21  ;;  %v769_v33 = vmul.f32 %v6401_v23, %v6401_v23  ;;  %v6417_v37 = vadd.f32 %v737_v24, %v418_v19 }
 0x11f   : > { %v779_v32 = vsel %vm431_vm0, %v768_v27, 0.0  ;;  %v770_v34 = vmul.f32 %v6409_v28, %v6409_v28  ;;  %v749_v38 = vsel %vm431_vm0, %v6401_v23, 0.0  ;;  %v751_v39 = vsel %vm431_vm0, %v6409_v28, 0.0 }
 0x120   : > { %v778_v35 = vadd.f32 %v777_v31, %v776_v29  ;;  %v748_v36 = vadd.f32 %v747_v26, %v746_v30  ;;  %v781_v42 = vsel %vm431_vm0, %v769_v33, 0.0  ;;  %v753_v47 = vsel %vm431_vm0, %v6417_v37, 0.0 }
 0x121   : > { %v783_v43 = vsel %vm431_vm0, %v770_v34, 0.0  ;;  %v771_v48 = vmul.f32 %v6417_v37, %v6417_v37  ;;  %v827_v16 = vstv %s359_s23 }
 0x122   : > { %v750_v40 = vadd.f32 %v749_v38, %v748_v36  ;;  %v780_v41 = vadd.f32 %v779_v32, %v778_v35 }
 0x123   : > { %v785_v51 = vsel %vm431_vm0, %v771_v48, 0.0 }
 0x124   : > { %v752_v45 = vadd.f32 %v751_v39, %v750_v40  ;;  %v782_v46 = vadd.f32 %v781_v42, %v780_v41 }
 0x126   : > { %v754_v49 = vadd.f32 %v753_v47, %v752_v45  ;;  %v784_v50 = vadd.f32 %v783_v43, %v782_v46 }
 0x128   : > { %755 = vadd.xlane.f32.xlu0 %v754_v49  ;;  %v786_v52 = vadd.f32 %v785_v51, %v784_v50 }
 0x12c   : > { %787 = vadd.xlane.f32.xlu0 %v786_v52 }
 0x1b5   : > { %v756_v53 = vpop.xlane.xlu0 %755 }
 0x1b6   : > { %v757_v54 = vrot.slane %v756_v53, 4 }
 0x1b8   : > { %v758_v55 = vadd.f32 %v757_v54, %v756_v53 }
 0x1b9   : > { %v788_v56 = vpop.xlane.xlu0 %787 }
 0x1ba   : > { %v759_v57 = vrot.slane %v758_v55, 2  ;;  %v789_v59 = vrot.slane %v788_v56, 4 }
 0x1bc   : > { %v790_v61 = vadd.f32 %v789_v59, %v788_v56  ;;  %v760_v62 = vadd.f32 %v759_v57, %v758_v55 }
 0x1be   : > { %v791_v63 = vrot.slane %v790_v61, 2  ;;  %v761_v0 = vrot.slane %v760_v62, 1 }
 0x1c0   : > { %v792_v1 = vadd.f32 %v791_v63, %v790_v61  ;;  %v762_v3 = vadd.f32 %v761_v0, %v760_v62 }
 0x1c2   : > { %6081 = vpush %v762_v3  ;;  %v793_v4 = vrot.slane %v792_v1, 1 }
 0x1c4   : > { %v794_v5 = vadd.f32 %v793_v4, %v792_v1 }
 0x1c6   : > { %6083 = vpush %v794_v5 }
 0x1f3   : > { %s6082_s8 = spop %6081 }
 0x1f4   : > { %s798_s9 = smul.f32 0.00048828125, %s6082_s8  ;;  %s362_s8 = sadd.s32 %s4006_s30, %s6435_s18 }
 0x1f6   : > { %s802_s10 = smul.f32 %s798_s9, %s798_s9  ;;  %v804_v9 = vstv %s798_s9  ;;  %s367_s9 = sld [smem:[#allocation3 + %s366_s7]] }
 0x1f7   : > { %s6084_s11 = spop %6083  ;;  %v805_v10 = vsub.f32 %v6373_v58, %v804_v9  ;;  %v806_v11 = vsub.f32 %v6375_v60, %v804_v9  ;;  %v807_v12 = vsub.f32 %v6382_v2, %v804_v9  ;;  %v808_v13 = vsub.f32 %v6388_v7, %v804_v9 }
 0x1f8   : > { %s801_s12 = smul.f32 0.00048828125, %s6084_s11  ;;  %v809_v15 = vsub.f32 %v6398_v17, %v804_v9  ;;  %v810_v22 = vsub.f32 %v6401_v23, %v804_v9  ;;  %v811_v2 = vsub.f32 %v6409_v28, %v804_v9  ;;  %v812_v23 = vsub.f32 %v6417_v37, %v804_v9 }
 0x1fa   : > { %s803_s13 = ssub.f32 %s801_s12, %s802_s10  ;;  %s363_s10 = sld [smem:[#allocation3 + %s362_s8]] }
 0x1fc   : > { %s813_s14 = sadd.f32 1e-05, %s803_s13 }
 0x1fe   : > { %v814_v6 = vstv %s813_s14 }
 0x1ff   : > { %6131 = vrsqrt.f32 %v814_v6 }
 0x209   : > { %v6132_v8 = vpop.eup %6131 }
 0x20a   : > { %6085 = vpush %v6132_v8 }
 0x23b   : > { %s6086_s21 = spop %6085 }
 0x23c   : > { %s817_s26 = smul.f32 %s6086_s21, %s351_s20 }
 0x23e   : > { %v818_v14 = vstv %s817_s26 }
 0x23f   : > { %v819_v18 = vmul.f32 %v818_v14, %v805_v10  ;;  %v820_v19 = vmul.f32 %v818_v14, %v806_v11  ;;  %v821_v20 = vmul.f32 %v818_v14, %v807_v12  ;;  %v822_v21 = vmul.f32 %v818_v14, %v808_v13  ;;  %v941_v11 = vld [vmem:[%s8765_s3 + $0x8] sm:$0xff]  ;;  %v943_v13 = vld [vmem:[%s8765_s3 + $0x18] sm:$0xff] }
 0x240   : > { %v823_v24 = vmul.f32 %v818_v14, %v809_v15  ;;  %v824_v7 = vmul.f32 %v818_v14, %v810_v22  ;;  %v825_v29 = vmul.f32 %v818_v14, %v811_v2  ;;  %v826_v35 = vmul.f32 %v818_v14, %v812_v23  ;;  %v949_v12 = vld [vmem:[%s8765_s3 + $0x48] sm:$0xff]  ;;  %v951_v15 = vld [vmem:[%s8765_s3 + $0x58] sm:$0xff]  ;;  %v950_v22 = vld [vmem:[%s8765_s3 + $0x50] sm:$0xff] }
 0x241   : > { %v6445_v25 = vadd.f32 %v827_v16, %v819_v18  ;;  %v6447_v58 = vadd.f32 %v827_v16, %v820_v19  ;;  %v6449_v60 = vadd.f32 %v827_v16, %v821_v20  ;;  %v6452_v26 = vadd.f32 %v827_v16, %v822_v21  ;;  %v948_v18 = vld [vmem:[%s8765_s3 + $0x40] sm:$0xff]  ;;  %v942_v21 = vld [vmem:[%s8765_s3 + $0x10] sm:$0xff] }
 0x242   : > { %v6459_v30 = vadd.f32 %v827_v16, %v823_v24  ;;  %v6469_v36 = vadd.f32 %v827_v16, %v824_v7  ;;  %v6477_v45 = vadd.f32 %v827_v16, %v825_v29  ;;  %v6484_v51 = vadd.f32 %v827_v16, %v826_v35  ;;  %v940_v16 = vld [vmem:[%s8765_s3] sm:$0xff]  ;;  %v957_v24 = vld [vmem:[%s8765_s3 + $0x88] sm:$0xff] }
 0x243   : > { %v836_v17 = vsel %vm431_vm0, %v6445_v25, 0.0  ;;  %v837_v27 = vsel %vm431_vm0, %v6447_v58, 0.0  ;;  %v839_v32 = vsel %vm431_vm0, %v6449_v60, 0.0  ;;  %v860_v28 = vmul.f32 %v6445_v25, %v6445_v25  ;;  %v965_v7 = vld [vmem:[%s8765_s3 + $0xc8] sm:$0xff] }
 0x244   : > { %v838_v31 = vadd.f32 %v837_v27, %v836_v17  ;;  %v861_v33 = vmul.f32 %v6447_v58, %v6447_v58  ;;  %v862_v34 = vmul.f32 %v6449_v60, %v6449_v60  ;;  %v841_v38 = vsel %vm431_vm0, %v6452_v26, 0.0  ;;  %v959_v17 = vld [vmem:[%s8765_s3 + $0x98] sm:$0xff] }
 0x245   : > { %v863_v39 = vmul.f32 %v6452_v26, %v6452_v26  ;;  %v868_v40 = vsel %vm431_vm0, %v860_v28, 0.0  ;;  %v843_v46 = vsel %vm431_vm0, %v6459_v30, 0.0  ;;  %v864_v47 = vmul.f32 %v6459_v30, %v6459_v30  ;;  %v967_v27 = vld [vmem:[%s8765_s3 + $0xd8] sm:$0xff]  ;;  %v958_v28 = vld [vmem:[%s8765_s3 + $0x90] sm:$0xff] }
 0x246   : > { %v840_v37 = vadd.f32 %v839_v32, %v838_v31  ;;  %v869_v41 = vsel %vm431_vm0, %v861_v33, 0.0  ;;  %v871_v48 = vsel %vm431_vm0, %v862_v34, 0.0  ;;  %v845_v52 = vsel %vm431_vm0, %v6469_v36, 0.0  ;;  %v956_v31 = vld [vmem:[%s8765_s3 + $0x80] sm:$0xff]  ;;  %v966_v34 = vld [vmem:[%s8765_s3 + $0xd0] sm:$0xff] }
 0x247   : > { %v870_v43 = vadd.f32 %v869_v41, %v868_v40  ;;  %v865_v53 = vmul.f32 %v6469_v36, %v6469_v36  ;;  %v873_v54 = vsel %vm431_vm0, %v863_v39, 0.0  ;;  %v847_v57 = vsel %vm431_vm0, %v6477_v45, 0.0  ;;  %v964_v32 = vld [vmem:[%s8765_s3 + $0xc0] sm:$0xff]  ;;  %v975_v39 = vld [vmem:[%s8765_s3 + $0x118] sm:$0xff] }
 0x248   : > { %v842_v42 = vadd.f32 %v841_v38, %v840_v37  ;;  %v866_v59 = vmul.f32 %v6477_v45, %v6477_v45  ;;  %v875_v61 = vsel %vm431_vm0, %v864_v47, 0.0  ;;  %v849_v0 = vsel %vm431_vm0, %v6484_v51, 0.0  ;;  %v973_v37 = vld [vmem:[%s8765_s3 + $0x108] sm:$0xff]  ;;  %v983_v41 = vld [vmem:[%s8765_s3 + $0x158] sm:$0xff] }
 0x249   : > { %v872_v50 = vadd.f32 %v871_v48, %v870_v43  ;;  %v867_v1 = vmul.f32 %v6484_v51, %v6484_v51  ;;  %v877_v3 = vsel %vm431_vm0, %v865_v53, 0.0  ;;  %v6512_v14 = vpack.c.bf16 %v949_v12, %v941_v11  ;;  %v981_v38 = vld [vmem:[%s8765_s3 + $0x148] sm:$0xff]  ;;  %v980_v43 = vld [vmem:[%s8765_s3 + $0x140] sm:$0xff]  ;;  %v974_v48 = vld [vmem:[%s8765_s3 + $0x110] sm:$0xff] }
 0x24a   : > { %v844_v49 = vadd.f32 %v843_v46, %v842_v42  ;;  %v879_v6 = vsel %vm431_vm0, %v866_v59, 0.0  ;;  %v6523_v19 = vpack.c.bf16 %v951_v15, %v943_v13  ;;  %v6525_v20 = vpack.c.bf16 %v948_v18, %v940_v16  ;;  %v972_v42 = vld [vmem:[%s8765_s3 + $0x100] sm:$0xff]  ;;  %v997_v53 = vld [vmem:[%s8765_s3 + $0x1c8] sm:$0xff]  ;;  %v1006_v12 = vld [vmem:[%s8765_s3 + $0x210] sm:$0xff] }
 0x24b   : > { %v874_v56 = vadd.f32 %v873_v54, %v872_v50  ;;  %v881_v9 = vsel %vm431_vm0, %v867_v1, 0.0  ;;  %9040 = vst [vmem:[#allocation7_spill] sm:$0xff] %v6512_v14  ;;  %4034 = vmatprep.subr.bf16.mxu0 %v6512_v14  ;;  %v6537_v2 = vpack.c.bf16 %v950_v22, %v942_v21  ;;  %v6550_v23 = vpack.c.bf16 %v965_v7, %v957_v24  ;;  %v989_v50 = vld [vmem:[%s8765_s3 + $0x188] sm:$0xff]  ;;  %v991_v54 = vld [vmem:[%s8765_s3 + $0x198] sm:$0xff]  ;;  %v988_v59 = vld [vmem:[%s8765_s3 + $0x180] sm:$0xff] }
 0x24c   : > { %v846_v55 = vadd.f32 %v845_v52, %v844_v49  ;;  %9041 = vst [vmem:[#allocation8_spill] sm:$0xff] %v6523_v19  ;;  %9042 = vst [vmem:[#allocation9_spill] sm:$0xff] %v6525_v20  ;;  %4098 = vmatprep.subr.bf16.mxu1 %v6523_v19  ;;  %4036 = vmatpush1.bf16.msra.mxu0 %v6525_v20  ;;  %v6552_v29 = vpack.c.bf16 %v967_v27, %v959_v17  ;;  %v982_v49 = vld [vmem:[%s8765_s3 + $0x150] sm:$0xff]  ;;  %v1005_v1 = vld [vmem:[%s8765_s3 + $0x208] sm:$0xff] }
 0x24d   : > { %v876_v63 = vadd.f32 %v875_v61, %v874_v56  ;;  %9043 = vst [vmem:[#allocation10_spill] sm:$0xff] %v6537_v2  ;;  %9044 = vst [vmem:[#allocation11_spill] sm:$0xff] %v6550_v23  ;;  %4100 = vmatpush1.bf16.msra.mxu1 %v6537_v2  ;;  %v6564_v33 = vpack.c.bf16 %v964_v32, %v956_v31  ;;  %4038 = vmatprep.subr.bf16.mxu0 %v6550_v23  ;;  %v996_v61 = vld [vmem:[%s8765_s3 + $0x1c0] sm:$0xff]  ;;  %v1014_v13 = vld [vmem:[%s8765_s3 + $0x250] sm:$0xff] }
 0x24e   : > { %v848_v62 = vadd.f32 %v847_v57, %v846_v55  ;;  %9045 = vst [vmem:[#allocation12_spill] sm:$0xff] %v6552_v29  ;;  %4102 = vmatprep.subr.bf16.mxu1 %v6552_v29  ;;  %v6571_v35 = vpack.c.bf16 %v966_v34, %v958_v28  ;;  %v6584_v40 = vpack.c.bf16 %v981_v38, %v973_v37  ;;  %v999_v55 = vld [vmem:[%s8765_s3 + $0x1d8] sm:$0xff]  ;;  %v1012_v11 = vld [vmem:[%s8765_s3 + $0x240] sm:$0xff]  ;;  %v1021_v16 = vld [vmem:[%s8765_s3 + $0x288] sm:$0xff] }
 0x24f   : > { %v878_v5 = vadd.f32 %v877_v3, %v876_v63  ;;  %9046 = vst [vmem:[#allocation13_spill] sm:$0xff] %v6564_v33  ;;  %v6595_v46 = vpack.c.bf16 %v983_v41, %v975_v39  ;;  %v6597_v47 = vpack.c.bf16 %v980_v43, %v972_v42  ;;  %v6609_v52 = vpack.c.bf16 %v982_v49, %v974_v48  ;;  %v1013_v3 = vld [vmem:[%s8765_s3 + $0x248] sm:$0xff]  ;;  %v1023_v21 = vld [vmem:[%s8765_s3 + $0x298] sm:$0xff]  ;;  %v1020_v17 = vld [vmem:[%s8765_s3 + $0x280] sm:$0xff] }
 0x250   : > { %v850_v4 = vadd.f32 %v849_v0, %v848_v62  ;;  %9047 = vst [vmem:[#allocation14_spill] sm:$0xff] %v6571_v35  ;;  %4040 = vmatpush1.bf16.msra.mxu0 %v6564_v33  ;;  %9048 = vst [vmem:[#allocation15_spill] sm:$0xff] %v6584_v40  ;;  %v6622_v56 = vpack.c.bf16 %v997_v53, %v989_v50  ;;  %v6624_v57 = vpack.c.bf16 %v999_v55, %v991_v54  ;;  %v990_v62 = vld [vmem:[%s8765_s3 + $0x190] sm:$0xff]  ;;  %v1029_v18 = vld [vmem:[%s8765_s3 + $0x2c8] sm:$0xff] }
 0x251   : > { %v880_v8 = vadd.f32 %v879_v6, %v878_v5  ;;  %4104 = vmatpush1.bf16.msra.mxu1 %v6571_v35  ;;  %9049 = vst [vmem:[#allocation16_spill] sm:$0xff] %v6595_v46  ;;  %9050 = vst [vmem:[#allocation17_spill] sm:$0xff] %v6597_v47  ;;  %4042 = vmatprep.subr.bf16.mxu0 %v6584_v40  ;;  %v6636_v63 = vpack.c.bf16 %v996_v61, %v988_v59  ;;  %v998_v0 = vld [vmem:[%s8765_s3 + $0x1d0] sm:$0xff]  ;;  %v1007_v6 = vld [vmem:[%s8765_s3 + $0x218] sm:$0xff] }
 0x252   : > { %851 = vadd.xlane.f32.xlu1 %v850_v4  ;;  %9051 = vst [vmem:[#allocation18_spill] sm:$0xff] %v6609_v52  ;;  %4106 = vmatprep.subr.bf16.mxu1 %v6595_v46  ;;  %9052 = vst [vmem:[#allocation19_spill] sm:$0xff] %v6622_v56  ;;  %v6649_v4 = vpack.c.bf16 %v998_v0, %v990_v62  ;;  %v6651_v5 = vpack.c.bf16 %v1013_v3, %v1005_v1  ;;  %v1031_v7 = vld [vmem:[%s8765_s3 + $0x2d8] sm:$0xff]  ;;  %v1028_v27 = vld [vmem:[%s8765_s3 + $0x2c0] sm:$0xff] }
 0x253   : > { %v882_v10 = vadd.f32 %v881_v9, %v880_v8  ;;  %9053 = vst [vmem:[#allocation20_spill] sm:$0xff] %v6624_v57  ;;  %9054 = vst [vmem:[#allocation21_spill] sm:$0xff] %v6636_v63  ;;  %v1015_v8 = vld [vmem:[%s8765_s3 + $0x258] sm:$0xff]  ;;  %v1004_v9 = vld [vmem:[%s8765_s3 + $0x200] sm:$0xff]  ;;  %v6687_v22 = vpack.c.bf16 %v1014_v13, %v1006_v12  ;;  %v6689_v24 = vpack.c.bf16 %v1029_v18, %v1021_v16 }
 0x254   : > { %4044 = vmatpush1.bf16.msra.mxu0 %v6597_v47  ;;  %9055 = vst [vmem:[#allocation22_spill] sm:$0xff] %v6649_v4  ;;  %9056 = vst [vmem:[#allocation23_spill] sm:$0xff] %v6651_v5  ;;  %v6674_v15 = vpack.c.bf16 %v1012_v11, %v1004_v9  ;;  %v6701_v31 = vpack.c.bf16 %v1031_v7, %v1023_v21  ;;  %v1022_v32 = vld [vmem:[%s8765_s3 + $0x290] sm:$0xff]  ;;  %v1037_v34 = vld [vmem:[%s8765_s3 + $0x308] sm:$0xff]  ;;  %v6722_v41 = vpack.c.bf16 %v1028_v27, %v1020_v17 }
 0x255   : > { %4108 = vmatpush1.bf16.msra.mxu1 %v6609_v52  ;;  %4046 = vmatprep.subr.bf16.mxu0 %v6622_v56  ;;  %9059 = vst [vmem:[#allocation26_spill] sm:$0xff] %v6687_v22  ;;  %9060 = vst [vmem:[#allocation27_spill] sm:$0xff] %v6689_v24  ;;  %v1030_v28 = vld [vmem:[%s8765_s3 + $0x2d0] sm:$0xff]  ;;  %v1045_v37 = vld [vmem:[%s8765_s3 + $0x348] sm:$0xff] }
 0x256   : > { %883 = vadd.xlane.f32.xlu1 %v882_v10  ;;  %4110 = vmatprep.subr.bf16.mxu1 %v6624_v57  ;;  %v6662_v10 = vpack.c.bf16 %v1015_v8, %v1007_v6  ;;  %9058 = vst [vmem:[#allocation25_spill] sm:$0xff] %v6674_v15  ;;  %9061 = vst [vmem:[#allocation28_spill] sm:$0xff] %v6701_v31  ;;  %v1039_v38 = vld [vmem:[%s8765_s3 + $0x318] sm:$0xff]  ;;  %v6726_v42 = vpack.c.bf16 %v1030_v28, %v1022_v32  ;;  %v1036_v48 = vld [vmem:[%s8765_s3 + $0x300] sm:$0xff] }
 0x257   : > { %v1047_v39 = vld [vmem:[%s8765_s3 + $0x358] sm:$0xff]  ;;  %v6728_v43 = vpack.c.bf16 %v1045_v37, %v1037_v34  ;;  %v1044_v49 = vld [vmem:[%s8765_s3 + $0x340] sm:$0xff]  ;;  %v1038_v50 = vld [vmem:[%s8765_s3 + $0x310] sm:$0xff] }
 0x258   : > { %9057 = vst [vmem:[#allocation24_spill] sm:$0xff] %v6662_v10  ;;  %4048 = vmatpush1.bf16.msra.mxu0 %v6636_v63  ;;  %v6740_v53 = vpack.c.bf16 %v1047_v39, %v1039_v38  ;;  %v1046_v54 = vld [vmem:[%s8765_s3 + $0x350] sm:$0xff]  ;;  %v1053_v55 = vld [vmem:[%s8765_s3 + $0x388] sm:$0xff]  ;;  %v1055_v61 = vld [vmem:[%s8765_s3 + $0x398] sm:$0xff]  ;;  %v6758_v0 = vpack.c.bf16 %v1044_v49, %v1036_v48 }
 0x259   : > { %4112 = vmatpush1.bf16.msra.mxu1 %v6649_v4  ;;  %4050 = vmatprep.subr.bf16.mxu0 %v6651_v5  ;;  %v1061_v59 = vld [vmem:[%s8765_s3 + $0x3c8] sm:$0xff]  ;;  %v1063_v62 = vld [vmem:[%s8765_s3 + $0x3d8] sm:$0xff]  ;;  %v6762_v1 = vpack.c.bf16 %v1046_v54, %v1038_v50  ;;  %v1052_v6 = vld [vmem:[%s8765_s3 + $0x380] sm:$0xff] }
 0x25a   : > { %4114 = vmatprep.subr.bf16.mxu1 %v6662_v10  ;;  %9062 = vst [vmem:[#allocation29_spill] sm:$0xff] %v6740_v53  ;;  %9063 = vst [vmem:[#allocation30_spill] sm:$0xff] %v6758_v0  ;;  %v6764_v3 = vpack.c.bf16 %v1061_v59, %v1053_v55  ;;  %v1060_v8 = vld [vmem:[%s8765_s3 + $0x3c0] sm:$0xff]  ;;  %v1054_v9 = vld [vmem:[%s8765_s3 + $0x390] sm:$0xff]  ;;  %v6776_v11 = vpack.c.bf16 %v1063_v62, %v1055_v61 }
 0x25b   : > { %v1062_v12 = vld [vmem:[%s8765_s3 + $0x3d0] sm:$0xff]  ;;  %v1069_v13 = vld [vmem:[%s8765_s3 + $0x408] sm:$0xff]  ;;  %v1071_v18 = vld [vmem:[%s8765_s3 + $0x418] sm:$0xff]  ;;  %v6794_v7 = vpack.c.bf16 %v1060_v8, %v1052_v6 }
 0x25c   : > { %4052 = vmatpush1.bf16.msra.mxu0 %v6674_v15  ;;  %9064 = vst [vmem:[#allocation31_spill] sm:$0xff] %v6764_v3  ;;  %9065 = vst [vmem:[#allocation32_spill] sm:$0xff] %v6776_v11  ;;  %v1077_v16 = vld [vmem:[%s8765_s3 + $0x448] sm:$0xff]  ;;  %v1079_v21 = vld [vmem:[%s8765_s3 + $0x458] sm:$0xff]  ;;  %v6798_v17 = vpack.c.bf16 %v1062_v12, %v1054_v9 }
 0x25d   : > { %4116 = vmatpush1.bf16.msra.mxu1 %v6687_v22  ;;  %4054 = vmatprep.subr.bf16.mxu0 %v6689_v24  ;;  %9066 = vst [vmem:[#allocation33_spill] sm:$0xff] %v6794_v7  ;;  %v6800_v27 = vpack.c.bf16 %v1077_v16, %v1069_v13  ;;  %v1068_v32 = vld [vmem:[%s8765_s3 + $0x400] sm:$0xff]  ;;  %v1070_v34 = vld [vmem:[%s8765_s3 + $0x410] sm:$0xff]  ;;  %v6812_v37 = vpack.c.bf16 %v1079_v21, %v1071_v18  ;;  %v1085_v39 = vld [vmem:[%s8765_s3 + $0x488] sm:$0xff] }
 0x25e   : > { %4118 = vmatprep.subr.bf16.mxu1 %v6701_v31  ;;  %9067 = vst [vmem:[#allocation34_spill] sm:$0xff] %v6798_v17  ;;  %v1076_v28 = vld [vmem:[%s8765_s3 + $0x440] sm:$0xff]  ;;  %v1078_v38 = vld [vmem:[%s8765_s3 + $0x450] sm:$0xff]  ;;  %v1093_v48 = vld [vmem:[%s8765_s3 + $0x4c8] sm:$0xff] }
 0x25f   : > { %9068 = vst [vmem:[#allocation35_spill] sm:$0xff] %v6800_v27  ;;  %9069 = vst [vmem:[#allocation36_spill] sm:$0xff] %v6812_v37  ;;  %v1087_v49 = vld [vmem:[%s8765_s3 + $0x498] sm:$0xff]  ;;  %v6830_v54 = vpack.c.bf16 %v1076_v28, %v1068_v32  ;;  %v6834_v55 = vpack.c.bf16 %v1078_v38, %v1070_v34  ;;  %v6836_v59 = vpack.c.bf16 %v1093_v48, %v1085_v39  ;;  %v1084_v61 = vld [vmem:[%s8765_s3 + $0x480] sm:$0xff] }
 0x260   : > { %4056 = vmatpush1.bf16.msra.mxu0 %v6722_v41  ;;  %v1095_v50 = vld [vmem:[%s8765_s3 + $0x4d8] sm:$0xff]  ;;  %v1092_v62 = vld [vmem:[%s8765_s3 + $0x4c0] sm:$0xff]  ;;  %v1086_v6 = vld [vmem:[%s8765_s3 + $0x490] sm:$0xff] }
 0x261   : > { %4120 = vmatpush1.bf16.msra.mxu1 %v6726_v42  ;;  %4058 = vmatprep.subr.bf16.mxu0 %v6728_v43  ;;  %9070 = vst [vmem:[#allocation37_spill] sm:$0xff] %v6830_v54  ;;  %9071 = vst [vmem:[#allocation38_spill] sm:$0xff] %v6834_v55  ;;  %v6848_v8 = vpack.c.bf16 %v1095_v50, %v1087_v49  ;;  %v1094_v9 = vld [vmem:[%s8765_s3 + $0x4d0] sm:$0xff]  ;;  %v1101_v12 = vld [vmem:[%s8765_s3 + $0x508] sm:$0xff]  ;;  %v6866_v21 = vpack.c.bf16 %v1092_v62, %v1084_v61 }
 0x262   : > { %4122 = vmatprep.subr.bf16.mxu1 %v6740_v53  ;;  %9072 = vst [vmem:[#allocation39_spill] sm:$0xff] %v6836_v59  ;;  %v1109_v13 = vld [vmem:[%s8765_s3 + $0x548] sm:$0xff]  ;;  %v1103_v16 = vld [vmem:[%s8765_s3 + $0x518] sm:$0xff]  ;;  %v6870_v32 = vpack.c.bf16 %v1094_v9, %v1086_v6  ;;  %v1100_v34 = vld [vmem:[%s8765_s3 + $0x500] sm:$0xff] }
 0x263   : > { %9073 = vst [vmem:[#allocation40_spill] sm:$0xff] %v6848_v8  ;;  %v1111_v18 = vld [vmem:[%s8765_s3 + $0x558] sm:$0xff]  ;;  %9074 = vst [vmem:[#allocation41_spill] sm:$0xff] %v6866_v21  ;;  %v6872_v28 = vpack.c.bf16 %v1109_v13, %v1101_v12  ;;  %v1108_v38 = vld [vmem:[%s8765_s3 + $0x540] sm:$0xff] }
 0x264   : > { %4060 = vmatpush1.bf16.msra.mxu0 %v6758_v0  ;;  %9075 = vst [vmem:[#allocation42_spill] sm:$0xff] %v6870_v32  ;;  %v1102_v39 = vld [vmem:[%s8765_s3 + $0x510] sm:$0xff]  ;;  %v6884_v48 = vpack.c.bf16 %v1111_v18, %v1103_v16  ;;  %v1117_v50 = vld [vmem:[%s8765_s3 + $0x588] sm:$0xff]  ;;  %v1119_v62 = vld [vmem:[%s8765_s3 + $0x598] sm:$0xff]  ;;  %v6902_v9 = vpack.c.bf16 %v1108_v38, %v1100_v34 }
 0x265   : > { %4124 = vmatpush1.bf16.msra.mxu1 %v6762_v1  ;;  %4062 = vmatprep.subr.bf16.mxu0 %v6764_v3  ;;  %9076 = vst [vmem:[#allocation43_spill] sm:$0xff] %v6872_v28  ;;  %v1110_v49 = vld [vmem:[%s8765_s3 + $0x550] sm:$0xff]  ;;  %v1125_v61 = vld [vmem:[%s8765_s3 + $0x5c8] sm:$0xff]  ;;  %v1127_v6 = vld [vmem:[%s8765_s3 + $0x5d8] sm:$0xff] }
 0x266   : > { %4126 = vmatprep.subr.bf16.mxu1 %v6776_v11  ;;  %9077 = vst [vmem:[#allocation44_spill] sm:$0xff] %v6884_v48  ;;  %9078 = vst [vmem:[#allocation45_spill] sm:$0xff] %v6902_v9  ;;  %v6906_v12 = vpack.c.bf16 %v1110_v49, %v1102_v39  ;;  %v6908_v13 = vpack.c.bf16 %v1125_v61, %v1117_v50  ;;  %v1116_v16 = vld [vmem:[%s8765_s3 + $0x580] sm:$0xff]  ;;  %v1118_v34 = vld [vmem:[%s8765_s3 + $0x590] sm:$0xff]  ;;  %v6920_v38 = vpack.c.bf16 %v1127_v6, %v1119_v62 }
 0x267   : > { %v1124_v18 = vld [vmem:[%s8765_s3 + $0x5c0] sm:$0xff]  ;;  %v1126_v39 = vld [vmem:[%s8765_s3 + $0x5d0] sm:$0xff]  ;;  %v1133_v49 = vld [vmem:[%s8765_s3 + $0x608] sm:$0xff] }
 0x268   : > { %4064 = vmatpush1.bf16.msra.mxu0 %v6794_v7  ;;  %9079 = vst [vmem:[#allocation46_spill] sm:$0xff] %v6906_v12  ;;  %9080 = vst [vmem:[#allocation47_spill] sm:$0xff] %v6908_v13  ;;  %v1141_v50 = vld [vmem:[%s8765_s3 + $0x648] sm:$0xff]  ;;  %v1135_v61 = vld [vmem:[%s8765_s3 + $0x618] sm:$0xff]  ;;  %v6938_v6 = vpack.c.bf16 %v1124_v18, %v1116_v16  ;;  %v6942_v44 = vpack.c.bf16 %v1126_v39, %v1118_v34 }
 0x269   : > { %4128 = vmatpush1.bf16.msra.mxu1 %v6798_v17  ;;  %4066 = vmatprep.subr.bf16.mxu0 %v6800_v27  ;;  %9081 = vst [vmem:[#allocation48_spill] sm:$0xff] %v6920_v38  ;;  %v1143_v62 = vld [vmem:[%s8765_s3 + $0x658] sm:$0xff]  ;;  %v1134_v16 = vld [vmem:[%s8765_s3 + $0x610] sm:$0xff]  ;;  %v1149_v39 = vld [vmem:[%s8765_s3 + $0x688] sm:$0xff] }
 0x26a   : > { %4130 = vmatprep.subr.bf16.mxu1 %v6812_v37  ;;  %9082 = vst [vmem:[#allocation49_spill] sm:$0xff] %v6938_v6  ;;  %9083 = vst [vmem:[#allocation50_spill] sm:$0xff] %v6942_v44  ;;  %v6956_v18 = vpack.c.bf16 %v1143_v62, %v1135_v61  ;;  %v1142_v34 = vld [vmem:[%s8765_s3 + $0x650] sm:$0xff]  ;;  %v1159_v61 = vld [vmem:[%s8765_s3 + $0x6d8] sm:$0xff] }
 0x26c   : > { %4068 = vmatpush1.bf16.msra.mxu0 %v6830_v54  ;;  %9085 = vst [vmem:[#allocation52_spill] sm:$0xff] %v6956_v18 }
 0x26d   : > { %4132 = vmatpush1.bf16.msra.mxu1 %v6834_v55  ;;  %4070 = vmatprep.subr.bf16.mxu0 %v6836_v59 }
 0x26e   : > { %4134 = vmatprep.subr.bf16.mxu1 %v6848_v8 }
 0x270   : > { %4072 = vmatpush1.bf16.msra.mxu0 %v6866_v21 }
 0x271   : > { %4136 = vmatpush1.bf16.msra.mxu1 %v6870_v32  ;;  %4074 = vmatprep.subr.bf16.mxu0 %v6872_v28  ;;  %v1132_v28 = vld [vmem:[%s8765_s3 + $0x600] sm:$0xff] }
 0x272   : > { %4138 = vmatprep.subr.bf16.mxu1 %v6884_v48  ;;  %v6944_v48 = vpack.c.bf16 %v1141_v50, %v1133_v49  ;;  %v1140_v32 = vld [vmem:[%s8765_s3 + $0x640] sm:$0xff]  ;;  %v1157_v49 = vld [vmem:[%s8765_s3 + $0x6c8] sm:$0xff]  ;;  %v1151_v50 = vld [vmem:[%s8765_s3 + $0x698] sm:$0xff] }
 0x273   : > { %v6974_v62 = vpack.c.bf16 %v1140_v32, %v1132_v28  ;;  %v6989_v32 = vpack.c.bf16 %v1159_v61, %v1151_v50  ;;  %v1150_v28 = vld [vmem:[%s8765_s3 + $0x690] sm:$0xff] }
 0x274   : > { %4076 = vmatpush1.bf16.msra.mxu0 %v6902_v9  ;;  %9084 = vst [vmem:[#allocation51_spill] sm:$0xff] %v6944_v48  ;;  %v1156_v9 = vld [vmem:[%s8765_s3 + $0x6c0] sm:$0xff] }
 0x275   : > { %4140 = vmatpush1.bf16.msra.mxu1 %v6906_v12  ;;  %4078 = vmatprep.subr.bf16.mxu0 %v6908_v13  ;;  %9086 = vst [vmem:[#allocation53_spill] sm:$0xff] %v6974_v62  ;;  %v6980_v13 = vpack.c.bf16 %v1157_v49, %v1149_v39  ;;  %v1148_v12 = vld [vmem:[%s8765_s3 + $0x680] sm:$0xff]  ;;  %9089 = vst [vmem:[#allocation56_spill] sm:$0xff] %v6989_v32 }
 0x276   : > { %4142 = vmatprep.subr.bf16.mxu1 %v6920_v38  ;;  %v6978_v38 = vpack.c.bf16 %v1142_v34, %v1134_v16  ;;  %v1158_v16 = vld [vmem:[%s8765_s3 + $0x6d0] sm:$0xff]  ;;  %v6998_v49 = vpack.c.bf16 %v1156_v9, %v1148_v12  ;;  %v1165_v9 = vld [vmem:[%s8765_s3 + $0x708] sm:$0xff] }
 0x277   : > { %9088 = vst [vmem:[#allocation55_spill] sm:$0xff] %v6980_v13  ;;  %v7002_v50 = vpack.c.bf16 %v1158_v16, %v1150_v28  ;;  %v1173_v12 = vld [vmem:[%s8765_s3 + $0x748] sm:$0xff]  ;;  %v1167_v28 = vld [vmem:[%s8765_s3 + $0x718] sm:$0xff] }
 0x278   : > { %4080 = vmatpush1.bf16.msra.mxu0 %v6938_v6  ;;  %9087 = vst [vmem:[#allocation54_spill] sm:$0xff] %v6978_v38  ;;  %9090 = vst [vmem:[#allocation57_spill] sm:$0xff] %v6998_v49  ;;  %v7016_v16 = vpack.c.bf16 %v1173_v12, %v1165_v9  ;;  %v1166_v9 = vld [vmem:[%s8765_s3 + $0x710] sm:$0xff] }
 0x279   : > { %4144 = vmatpush1.bf16.msra.mxu1 %v6942_v44  ;;  %4082 = vmatprep.subr.bf16.mxu0 %v6944_v48  ;;  %9091 = vst [vmem:[#allocation58_spill] sm:$0xff] %v7002_v50  ;;  %v1174_v12 = vld [vmem:[%s8765_s3 + $0x750] sm:$0xff] }
 0x27a   : > { %4146 = vmatprep.subr.bf16.mxu1 %v6956_v18  ;;  %9092 = vst [vmem:[#allocation59_spill] sm:$0xff] %v7016_v16 }
 0x27c   : > { %4084 = vmatpush1.bf16.msra.mxu0 %v6974_v62 }
 0x27d   : > { %4148 = vmatpush1.bf16.msra.mxu1 %v6978_v38  ;;  %4086 = vmatprep.subr.bf16.mxu0 %v6980_v13  ;;  %v1182_v38 = vld [vmem:[%s8765_s3 + $0x790] sm:$0xff] }
 0x27e   : > { %4150 = vmatprep.subr.bf16.mxu1 %v6989_v32  ;;  %v7041_v32 = vpack.c.bf16 %v1174_v12, %v1166_v9  ;;  %v1180_v12 = vld [vmem:[%s8765_s3 + $0x780] sm:$0xff] }
 0x280   : > { %4088 = vmatpush1.bf16.msra.mxu0 %v6998_v49  ;;  %v1181_v49 = vld [vmem:[%s8765_s3 + $0x788] sm:$0xff]  ;;  %9095 = vst [vmem:[#allocation62_spill] sm:$0xff] %v7041_v32 }
 0x281   : > { %4152 = vmatpush1.bf16.msra.mxu1 %v7002_v50  ;;  %4090 = vmatprep.subr.bf16.mxu0 %v7016_v16  ;;  %v1188_v16 = vld [vmem:[%s8765_s3 + $0x7c0] sm:$0xff] }
 0x2df   : > { %v852_v34 = vpop.xlane.xlu1 %851 }
 0x2e0   : > { %v853_v39 = vrot.slane %v852_v34, 4 }
 0x2e2   : > { %v854_v61 = vadd.f32 %v853_v39, %v852_v34  ;;  %v1175_v34 = vld [vmem:[%s8765_s3 + $0x758] sm:$0xff] }
 0x2e3   : > { %v884_v18 = vpop.xlane.xlu1 %883 }
 0x2e4   : > { %v855_v48 = vrot.slane %v854_v61, 2  ;;  %v885_v44 = vrot.slane %v884_v18, 4 }
 0x2e6   : > { %v886_v6 = vadd.f32 %v885_v44, %v884_v18  ;;  %v856_v62 = vadd.f32 %v855_v48, %v854_v61  ;;  %v1164_v44 = vld [vmem:[%s8765_s3 + $0x700] sm:$0xff]  ;;  %v7027_v61 = vpack.c.bf16 %v1175_v34, %v1167_v28  ;;  %v1189_v28 = vld [vmem:[%s8765_s3 + $0x7c8] sm:$0xff]  ;;  %v1183_v34 = vld [vmem:[%s8765_s3 + $0x798] sm:$0xff] }
 0x2e7   : > { %v1172_v48 = vld [vmem:[%s8765_s3 + $0x740] sm:$0xff]  ;;  %v7054_v9 = vpack.c.bf16 %v1189_v28, %v1181_v49  ;;  %v1190_v49 = vld [vmem:[%s8765_s3 + $0x7d0] sm:$0xff]  ;;  %v945_v28 = vld [vmem:[%s8765_s3 + $0x28] sm:$0xff] }
 0x2e8   : > { %v887_v18 = vrot.slane %v886_v6, 2  ;;  %v857_v39 = vrot.slane %v856_v62, 1  ;;  %9093 = vst [vmem:[#allocation60_spill] sm:$0xff] %v7027_v61  ;;  %v7029_v50 = vpack.c.bf16 %v1172_v48, %v1164_v44  ;;  %v1191_v44 = vld [vmem:[%s8765_s3 + $0x7d8] sm:$0xff]  ;;  %4154 = vmatprep.subr.bf16.mxu1 %v7027_v61 }
 0x2e9   : > { %9096 = vst [vmem:[#allocation63_spill] sm:$0xff] %v7054_v9  ;;  %4156 = vmatpush1.bf16.msra.mxu1 %v7041_v32 }
 0x2ea   : > { %9094 = vst [vmem:[#allocation61_spill] sm:$0xff] %v7029_v50  ;;  %v888_v48 = vadd.f32 %v887_v18, %v886_v6  ;;  %v858_v13 = vadd.f32 %v857_v39, %v856_v62  ;;  %4092 = vmatpush1.bf16.msra.mxu0 %v7029_v50  ;;  %v7066_v6 = vpack.c.bf16 %v1191_v44, %v1183_v34  ;;  %v947_v34 = vld [vmem:[%s8765_s3 + $0x38] sm:$0xff] }
 0x2eb   : > { %v7068_v62 = vpack.c.bf16 %v1188_v16, %v1180_v12  ;;  %4094 = vmatprep.subr.bf16.mxu0 %v7054_v9  ;;  %v7074_v39 = vpack.c.bf16 %v1190_v49, %v1182_v38  ;;  %v953_v16 = vld [vmem:[%s8765_s3 + $0x68] sm:$0xff]  ;;  %v955_v38 = vld [vmem:[%s8765_s3 + $0x78] sm:$0xff] }
 0x2ec   : > { %9097 = vst [vmem:[#allocation64_spill] sm:$0xff] %v7066_v6  ;;  %6087 = vpush %v858_v13  ;;  %v889_v18 = vrot.slane %v888_v48, 1  ;;  %4158 = vmatprep.subr.bf16.mxu1 %v7066_v6  ;;  %v7087_v44 = vpack.c.bf16 %v953_v16, %v945_v28  ;;  %v7093_v12 = vpack.c.bf16 %v955_v38, %v947_v34  ;;  %v952_v16 = vld [vmem:[%s8765_s3 + $0x60] sm:$0xff]  ;;  %v946_v34 = vld [vmem:[%s8765_s3 + $0x30] sm:$0xff] }
 0x2ed   : > { %9098 = vst [vmem:[#allocation65_spill] sm:$0xff] %v7068_v62  ;;  %9099 = vst [vmem:[#allocation66_spill] sm:$0xff] %v7074_v39  ;;  %4160 = vmatpush1.bf16.msra.mxu1 %v7074_v39 }
 0x2ee   : > { %v890_v13 = vadd.f32 %v889_v18, %v888_v48  ;;  %4096 = vmatpush1.bf16.msra.mxu0 %v7068_v62  ;;  %9100 = vst [vmem:[#allocation67_spill] sm:$0xff] %v7087_v44  ;;  %9101 = vst [vmem:[#allocation68_spill] sm:$0xff] %v7093_v12  ;;  %4226 = vmatprep.subr.bf16.mxu1 %v7093_v12  ;;  %v944_v18 = vld [vmem:[%s8765_s3 + $0x20] sm:$0xff] }
 0x2ef   : > { %4162 = vmatprep.subr.bf16.mxu0 %v7087_v44 }
 0x2f0   : > { %6089 = vpush %v890_v13  ;;  %v954_v13 = vld [vmem:[%s8765_s3 + $0x70] sm:$0xff] }
 0x2f1   : > { %v7116_v12 = vpack.c.bf16 %v954_v13, %v946_v34  ;;  %v968_v13 = vld [vmem:[%s8765_s3 + $0xe0] sm:$0xff] }
 0x2f3   : > { %9103 = vst [vmem:[#allocation70_spill] sm:$0xff] %v7116_v12 }
 0x31d   : > { %s6088_s17 = spop %6087 }
 0x31e   : > { %s894_s19 = smul.f32 0.00048828125, %s6088_s17 }
 0x320   : > { %s898_s20 = smul.f32 %s894_s19, %s894_s19  ;;  %v900_v28 = vstv %s894_s19  ;;  %s3981_s19 = sshll.u32 %s6249_s24, 6 }
 0x321   : > { %s6090_s23 = spop %6089  ;;  %v902_v38 = vsub.f32 %v6447_v58, %v900_v28  ;;  %v901_v44 = vsub.f32 %v6445_v25, %v900_v28  ;;  %v904_v39 = vsub.f32 %v6452_v26, %v900_v28  ;;  %v903_v62 = vsub.f32 %v6449_v60, %v900_v28  ;;  %v969_v60 = vld [vmem:[%s8765_s3 + $0xe8] sm:$0xff]  ;;  %v963_v26 = vld [vmem:[%s8765_s3 + $0xb8] sm:$0xff]  ;;  %p340_p6 = scmp.lt.s32.totalorder %s3981_s19, 191 }
 0x322   : > { %s897_s21 = smul.f32 0.00048828125, %s6090_s23  ;;  %v906_v6 = vsub.f32 %v6469_v36, %v900_v28  ;;  %v905_v32 = vsub.f32 %v6459_v30, %v900_v28  ;;  %v908_v50 = vsub.f32 %v6484_v51, %v900_v28  ;;  %v907_v58 = vsub.f32 %v6477_v45, %v900_v28  ;;  %v971_v30 = vld [vmem:[%s8765_s3 + $0xf8] sm:$0xff] }
 0x323   : > { %s9689_s19 = smov (!%p340_p6, %s3981_s19), 191 }
 0x324   : > { %s899_s26 = ssub.f32 %s897_s21, %s898_s20  ;;  %s3982_s24 = sshll.u32 %s9689_s19, 1 }
 0x325   : > { %s8029_s7 = scalar_lea.vmem %s8767_s5, %s3982_s24 }
 0x326   : > { %s909_s27 = sadd.f32 1e-05, %s899_s26 }
 0x328   : > { %v910_v48 = vstv %s909_s27  ;;  %s7875_s27 = scalar_lea.vmem %s8768_s6, %s3982_s24 }
 0x329   : > { %6133 = vrsqrt.f32 %v910_v48  ;;  %v923_v48 = vstv %s367_s9 }
 0x333   : > { %v6134_v49 = vpop.eup %6133 }
 0x334   : > { %6091 = vpush %v6134_v49  ;;  %v7114_v49 = vpack.c.bf16 %v952_v16, %v944_v18  ;;  %v961_v16 = vld [vmem:[%s8765_s3 + $0xa8] sm:$0xff] }
 0x336   : > { %9102 = vst [vmem:[#allocation69_spill] sm:$0xff] %v7114_v49 }
 0x365   : > { %s6092_s16 = spop %6091 }
 0x366   : > { %s913_s18 = smul.f32 %s6092_s16, %s363_s10 }
 0x368   : > { %v914_v9 = vstv %s913_s18 }
 0x369   : > { %v916_v61 = vmul.f32 %v914_v9, %v902_v38  ;;  %v915_v18 = vmul.f32 %v914_v9, %v901_v44  ;;  %v918_v25 = vmul.f32 %v914_v9, %v904_v39  ;;  %v917_v34 = vmul.f32 %v914_v9, %v903_v62  ;;  %v960_v62 = vld [vmem:[%s8765_s3 + $0xa0] sm:$0xff] }
 0x36a   : > { %v920_v36 = vmul.f32 %v914_v9, %v906_v6  ;;  %v919_v45 = vmul.f32 %v914_v9, %v905_v32  ;;  %v922_v51 = vmul.f32 %v914_v9, %v908_v50  ;;  %v921_v44 = vmul.f32 %v914_v9, %v907_v58  ;;  %v962_v32 = vld [vmem:[%s8765_s3 + $0xb0] sm:$0xff] }
 0x36b   : > { %v7137_v28 = vadd.f32 %v923_v48, %v916_v61  ;;  %v7139_v39 = vadd.f32 %v923_v48, %v915_v18  ;;  %v7147_v38 = vadd.f32 %v923_v48, %v918_v25  ;;  %v7149_v21 = vadd.f32 %v923_v48, %v917_v34  ;;  %v970_v50 = vld [vmem:[%s8765_s3 + $0xf0] sm:$0xff]  ;;  %v977_v61 = vld [vmem:[%s8765_s3 + $0x128] sm:$0xff] }
 0x36c   : > { %v7160_v9 = vadd.f32 %v923_v48, %v920_v36  ;;  %v7162_v6 = vadd.f32 %v923_v48, %v919_v45  ;;  %v7164_v58 = vadd.f32 %v923_v48, %v922_v51  ;;  %v7166_v18 = vadd.f32 %v923_v48, %v921_v44  ;;  %v979_v36 = vld [vmem:[%s8765_s3 + $0x138] sm:$0xff]  ;;  %v978_v44 = vld [vmem:[%s8765_s3 + $0x130] sm:$0xff] }
 0x36d   : > { %9104 = vst [vmem:[#allocation71_spill] sm:$0xff] %v7147_v38  ;;  %9105 = vst [vmem:[#allocation72_spill] sm:$0xff] %v7149_v21  ;;  %1260 = vmatprep.mubr.f32.mxu0 %v7137_v28  ;;  %1331 = vmatprep.mubr.f32.mxu1 %v7137_v28  ;;  %v7170_v25 = vpack.c.bf16 %v969_v60, %v961_v16  ;;  %v7172_v34 = vpack.c.bf16 %v971_v30, %v963_v26  ;;  %v985_v21 = vld [vmem:[%s8765_s3 + $0x168] sm:$0xff]  ;;  %v987_v48 = vld [vmem:[%s8765_s3 + $0x178] sm:$0xff]  ;;  %6135 = vtanh.f32 %v7137_v28 }
 0x36e   : > { %9106 = vst [vmem:[#allocation73_spill] sm:$0xff] %v7160_v9  ;;  %9107 = vst [vmem:[#allocation74_spill] sm:$0xff] %v7162_v6  ;;  %1261 = vmatmul.mubr.f32.vlgmr.msra.gmra.mrb[4].mxu0 %v7139_v39  ;;  %1332 = vmatmul.mubr.f32.vlgmr.msra.gmra.mrb[4].mxu1 %v7139_v39  ;;  %v7187_v16 = vpack.c.bf16 %v968_v13, %v960_v62  ;;  %v7189_v60 = vpack.c.bf16 %v970_v50, %v962_v32  ;;  %v976_v26 = vld [vmem:[%s8765_s3 + $0x120] sm:$0xff]  ;;  %v986_v62 = vld [vmem:[%s8765_s3 + $0x170] sm:$0xff]  ;;  %6137 = vtanh.f32 %v7139_v39 }
 0x36f   : > { %9108 = vst [vmem:[#allocation75_spill] sm:$0xff] %v7164_v58  ;;  %9109 = vst [vmem:[#allocation76_spill] sm:$0xff] %v7166_v18  ;;  %4164 = vmatpush1.bf16.msra.mxu0 %v7114_v49  ;;  %4228 = vmatpush1.bf16.msra.mxu1 %v7116_v12  ;;  %v984_v30 = vld [vmem:[%s8765_s3 + $0x160] sm:$0xff]  ;;  %v7199_v45 = vpack.c.bf16 %v985_v21, %v977_v61  ;;  %v7201_v51 = vpack.c.bf16 %v987_v48, %v979_v36  ;;  %v993_v13 = vld [vmem:[%s8765_s3 + $0x1a8] sm:$0xff] }
 0x370   : > { %9110 = vst [vmem:[#allocation77_spill] sm:$0xff] %v7170_v25  ;;  %9111 = vst [vmem:[#allocation78_spill] sm:$0xff] %v7172_v34  ;;  %1402 = vmatprep.mubr.f32.mxu0 %v7137_v28  ;;  %1473 = vmatprep.mubr.f32.mxu1 %v7137_v28  ;;  %v1001_v21 = vld [vmem:[%s8765_s3 + $0x1e8] sm:$0xff]  ;;  %v995_v32 = vld [vmem:[%s8765_s3 + $0x1b8] sm:$0xff]  ;;  %v7225_v61 = vpack.c.bf16 %v984_v30, %v976_v26  ;;  %v7227_v36 = vpack.c.bf16 %v986_v62, %v978_v44 }
 0x371   : > { %9112 = vst [vmem:[#allocation79_spill] sm:$0xff] %v7187_v16  ;;  %9113 = vst [vmem:[#allocation80_spill] sm:$0xff] %v7189_v60  ;;  %4166 = vmatprep.subr.bf16.mxu0 %v7170_v25  ;;  %4230 = vmatprep.subr.bf16.mxu1 %v7172_v34  ;;  %v1003_v50 = vld [vmem:[%s8765_s3 + $0x1f8] sm:$0xff]  ;;  %v992_v48 = vld [vmem:[%s8765_s3 + $0x1a0] sm:$0xff]  ;;  %v7237_v58 = vpack.c.bf16 %v1001_v21, %v993_v13 }
 0x372   : > { %9114 = vst [vmem:[#allocation81_spill] sm:$0xff] %v7199_v45  ;;  %9115 = vst [vmem:[#allocation82_spill] sm:$0xff] %v7201_v51  ;;  %v1000_v18 = vld [vmem:[%s8765_s3 + $0x1e0] sm:$0xff]  ;;  %v7239_v6 = vpack.c.bf16 %v1003_v50, %v995_v32  ;;  %v994_v26 = vld [vmem:[%s8765_s3 + $0x1b0] sm:$0xff] }
 0x373   : > { %4168 = vmatpush1.bf16.msra.mxu0 %v7187_v16  ;;  %4232 = vmatpush1.bf16.msra.mxu1 %v7189_v60  ;;  %9116 = vst [vmem:[#allocation83_spill] sm:$0xff] %v7225_v61  ;;  %9117 = vst [vmem:[#allocation84_spill] sm:$0xff] %v7227_v36  ;;  %v1002_v30 = vld [vmem:[%s8765_s3 + $0x1f0] sm:$0xff]  ;;  %v1009_v44 = vld [vmem:[%s8765_s3 + $0x228] sm:$0xff]  ;;  %v7261_v32 = vpack.c.bf16 %v1000_v18, %v992_v48 }
 0x374   : > { %4170 = vmatprep.subr.bf16.mxu0 %v7199_v45  ;;  %4234 = vmatprep.subr.bf16.mxu1 %v7201_v51  ;;  %9118 = vst [vmem:[#allocation85_spill] sm:$0xff] %v7237_v58  ;;  %9119 = vst [vmem:[#allocation86_spill] sm:$0xff] %v7239_v6  ;;  %v1017_v62 = vld [vmem:[%s8765_s3 + $0x268] sm:$0xff]  ;;  %v1011_v13 = vld [vmem:[%s8765_s3 + $0x238] sm:$0xff]  ;;  %v7263_v50 = vpack.c.bf16 %v1002_v30, %v994_v26 }
 0x375   : > { %v1019_v21 = vld [vmem:[%s8765_s3 + $0x278] sm:$0xff]  ;;  %9120 = vst [vmem:[#allocation87_spill] sm:$0xff] %v7261_v32  ;;  %v1008_v9 = vld [vmem:[%s8765_s3 + $0x220] sm:$0xff]  ;;  %v7273_v51 = vpack.c.bf16 %v1017_v62, %v1009_v44  ;;  %v1010_v18 = vld [vmem:[%s8765_s3 + $0x230] sm:$0xff] }
 0x376   : > { %9121 = vst [vmem:[#allocation88_spill] sm:$0xff] %v7263_v50  ;;  %v1016_v38 = vld [vmem:[%s8765_s3 + $0x260] sm:$0xff]  ;;  %v1018_v48 = vld [vmem:[%s8765_s3 + $0x270] sm:$0xff]  ;;  %v1025_v26 = vld [vmem:[%s8765_s3 + $0x2a8] sm:$0xff] }
 0x377   : > { %4172 = vmatpush1.bf16.msra.mxu0 %v7225_v61  ;;  %4236 = vmatpush1.bf16.msra.mxu1 %v7227_v36  ;;  %9122 = vst [vmem:[#allocation89_spill] sm:$0xff] %v7273_v51  ;;  %v7275_v61 = vpack.c.bf16 %v1019_v21, %v1011_v13  ;;  %v1033_v30 = vld [vmem:[%s8765_s3 + $0x2e8] sm:$0xff]  ;;  %v1027_v44 = vld [vmem:[%s8765_s3 + $0x2b8] sm:$0xff]  ;;  %v7297_v13 = vpack.c.bf16 %v1016_v38, %v1008_v9  ;;  %v1026_v38 = vld [vmem:[%s8765_s3 + $0x2b0] sm:$0xff] }
 0x378   : > { %4174 = vmatprep.subr.bf16.mxu0 %v7237_v58  ;;  %4238 = vmatprep.subr.bf16.mxu1 %v7239_v6  ;;  %v1035_v62 = vld [vmem:[%s8765_s3 + $0x2f8] sm:$0xff]  ;;  %v7299_v21 = vpack.c.bf16 %v1018_v48, %v1010_v18  ;;  %v1024_v6 = vld [vmem:[%s8765_s3 + $0x2a0] sm:$0xff]  ;;  %v7309_v36 = vpack.c.bf16 %v1033_v30, %v1025_v26  ;;  %v1034_v9 = vld [vmem:[%s8765_s3 + $0x2f0] sm:$0xff] }
 0x379   : > { %9123 = vst [vmem:[#allocation90_spill] sm:$0xff] %v7275_v61  ;;  %9124 = vst [vmem:[#allocation91_spill] sm:$0xff] %v7297_v13  ;;  %v1032_v58 = vld [vmem:[%s8765_s3 + $0x2e0] sm:$0xff]  ;;  %v1041_v18 = vld [vmem:[%s8765_s3 + $0x328] sm:$0xff] }
 0x37a   : > { %9125 = vst [vmem:[#allocation92_spill] sm:$0xff] %v7299_v21  ;;  %9126 = vst [vmem:[#allocation93_spill] sm:$0xff] %v7309_v36  ;;  %v1049_v48 = vld [vmem:[%s8765_s3 + $0x368] sm:$0xff]  ;;  %v1043_v26 = vld [vmem:[%s8765_s3 + $0x338] sm:$0xff] }
 0x37b   : > { %4176 = vmatpush1.bf16.msra.mxu0 %v7261_v32  ;;  %4240 = vmatpush1.bf16.msra.mxu1 %v7263_v50  ;;  %v7311_v32 = vpack.c.bf16 %v1035_v62, %v1027_v44  ;;  %v1051_v30 = vld [vmem:[%s8765_s3 + $0x378] sm:$0xff]  ;;  %v7333_v44 = vpack.c.bf16 %v1032_v58, %v1024_v6  ;;  %v7335_v62 = vpack.c.bf16 %v1034_v9, %v1026_v38  ;;  %v1042_v6 = vld [vmem:[%s8765_s3 + $0x330] sm:$0xff]  ;;  %v1057_v38 = vld [vmem:[%s8765_s3 + $0x3a8] sm:$0xff] }
 0x37c   : > { %4178 = vmatprep.subr.bf16.mxu0 %v7273_v51  ;;  %4242 = vmatprep.subr.bf16.mxu1 %v7275_v61  ;;  %v1040_v61 = vld [vmem:[%s8765_s3 + $0x320] sm:$0xff]  ;;  %v7345_v50 = vpack.c.bf16 %v1049_v48, %v1041_v18  ;;  %v1050_v58 = vld [vmem:[%s8765_s3 + $0x370] sm:$0xff]  ;;  %v1065_v9 = vld [vmem:[%s8765_s3 + $0x3e8] sm:$0xff] }
 0x37d   : > { %9127 = vst [vmem:[#allocation94_spill] sm:$0xff] %v7311_v32  ;;  %9128 = vst [vmem:[#allocation95_spill] sm:$0xff] %v7333_v44  ;;  %v1048_v51 = vld [vmem:[%s8765_s3 + $0x360] sm:$0xff]  ;;  %v1059_v18 = vld [vmem:[%s8765_s3 + $0x3b8] sm:$0xff] }
 0x37e   : > { %9129 = vst [vmem:[#allocation96_spill] sm:$0xff] %v7335_v62  ;;  %9130 = vst [vmem:[#allocation97_spill] sm:$0xff] %v7345_v50  ;;  %v1067_v48 = vld [vmem:[%s8765_s3 + $0x3f8] sm:$0xff]  ;;  %v1194_v28 = vld [vmem:[%s8765_s3 + $0x7f0] sm:$0xff] }
 0x37f   : > { %4180 = vmatpush1.bf16.msra.mxu0 %v7297_v13  ;;  %4244 = vmatpush1.bf16.msra.mxu1 %v7299_v21  ;;  %v7347_v13 = vpack.c.bf16 %v1051_v30, %v1043_v26  ;;  %v7369_v26 = vpack.c.bf16 %v1048_v51, %v1040_v61  ;;  %v7371_v30 = vpack.c.bf16 %v1050_v58, %v1042_v6  ;;  %v1058_v51 = vld [vmem:[%s8765_s3 + $0x3b0] sm:$0xff]  ;;  %v1073_v6 = vld [vmem:[%s8765_s3 + $0x428] sm:$0xff] }
 0x380   : > { %4182 = vmatprep.subr.bf16.mxu0 %v7309_v36  ;;  %4246 = vmatprep.subr.bf16.mxu1 %v7311_v32  ;;  %v1056_v32 = vld [vmem:[%s8765_s3 + $0x3a0] sm:$0xff]  ;;  %v7381_v21 = vpack.c.bf16 %v1065_v9, %v1057_v38  ;;  %v1066_v61 = vld [vmem:[%s8765_s3 + $0x3f0] sm:$0xff]  ;;  %v1081_v58 = vld [vmem:[%s8765_s3 + $0x468] sm:$0xff] }
 0x381   : > { %9131 = vst [vmem:[#allocation98_spill] sm:$0xff] %v7347_v13  ;;  %9132 = vst [vmem:[#allocation99_spill] sm:$0xff] %v7369_v26  ;;  %v1064_v36 = vld [vmem:[%s8765_s3 + $0x3e0] sm:$0xff]  ;;  %v1075_v38 = vld [vmem:[%s8765_s3 + $0x438] sm:$0xff] }
 0x382   : > { %9133 = vst [vmem:[#allocation100_spill] sm:$0xff] %v7371_v30  ;;  %9134 = vst [vmem:[#allocation101_spill] sm:$0xff] %v7381_v21  ;;  %v1083_v9 = vld [vmem:[%s8765_s3 + $0x478] sm:$0xff] }
 0x383   : > { %4184 = vmatpush1.bf16.msra.mxu0 %v7333_v44  ;;  %4248 = vmatpush1.bf16.msra.mxu1 %v7335_v62  ;;  %v7383_v44 = vpack.c.bf16 %v1067_v48, %v1059_v18  ;;  %v7405_v18 = vpack.c.bf16 %v1064_v36, %v1056_v32  ;;  %v7407_v48 = vpack.c.bf16 %v1066_v61, %v1058_v51  ;;  %v1074_v36 = vld [vmem:[%s8765_s3 + $0x430] sm:$0xff]  ;;  %v1089_v51 = vld [vmem:[%s8765_s3 + $0x4a8] sm:$0xff] }
 0x384   : > { %4186 = vmatprep.subr.bf16.mxu0 %v7345_v50  ;;  %4250 = vmatprep.subr.bf16.mxu1 %v7347_v13  ;;  %v1072_v13 = vld [vmem:[%s8765_s3 + $0x420] sm:$0xff]  ;;  %v7417_v62 = vpack.c.bf16 %v1081_v58, %v1073_v6  ;;  %v1082_v32 = vld [vmem:[%s8765_s3 + $0x470] sm:$0xff]  ;;  %v1097_v61 = vld [vmem:[%s8765_s3 + $0x4e8] sm:$0xff] }
 0x385   : > { %9135 = vst [vmem:[#allocation102_spill] sm:$0xff] %v7383_v44  ;;  %9136 = vst [vmem:[#allocation103_spill] sm:$0xff] %v7405_v18  ;;  %v1080_v50 = vld [vmem:[%s8765_s3 + $0x460] sm:$0xff]  ;;  %v1091_v6 = vld [vmem:[%s8765_s3 + $0x4b8] sm:$0xff] }
 0x386   : > { %9137 = vst [vmem:[#allocation104_spill] sm:$0xff] %v7407_v48  ;;  %9138 = vst [vmem:[#allocation105_spill] sm:$0xff] %v7417_v62  ;;  %v1099_v58 = vld [vmem:[%s8765_s3 + $0x4f8] sm:$0xff] }
 0x387   : > { %4188 = vmatpush1.bf16.msra.mxu0 %v7369_v26  ;;  %4252 = vmatpush1.bf16.msra.mxu1 %v7371_v30  ;;  %v7419_v26 = vpack.c.bf16 %v1083_v9, %v1075_v38  ;;  %v7441_v38 = vpack.c.bf16 %v1080_v50, %v1072_v13  ;;  %v7443_v9 = vpack.c.bf16 %v1082_v32, %v1074_v36  ;;  %v1090_v50 = vld [vmem:[%s8765_s3 + $0x4b0] sm:$0xff]  ;;  %v1105_v36 = vld [vmem:[%s8765_s3 + $0x528] sm:$0xff] }
 0x388   : > { %4190 = vmatprep.subr.bf16.mxu0 %v7381_v21  ;;  %4254 = vmatprep.subr.bf16.mxu1 %v7383_v44  ;;  %v1088_v44 = vld [vmem:[%s8765_s3 + $0x4a0] sm:$0xff]  ;;  %v7453_v30 = vpack.c.bf16 %v1097_v61, %v1089_v51  ;;  %v1098_v13 = vld [vmem:[%s8765_s3 + $0x4f0] sm:$0xff]  ;;  %v1113_v32 = vld [vmem:[%s8765_s3 + $0x568] sm:$0xff] }
 0x389   : > { %9139 = vst [vmem:[#allocation106_spill] sm:$0xff] %v7419_v26  ;;  %9140 = vst [vmem:[#allocation107_spill] sm:$0xff] %v7441_v38  ;;  %v1096_v21 = vld [vmem:[%s8765_s3 + $0x4e0] sm:$0xff]  ;;  %v1107_v51 = vld [vmem:[%s8765_s3 + $0x538] sm:$0xff] }
 0x38a   : > { %9141 = vst [vmem:[#allocation108_spill] sm:$0xff] %v7443_v9  ;;  %9142 = vst [vmem:[#allocation109_spill] sm:$0xff] %v7453_v30  ;;  %v1115_v61 = vld [vmem:[%s8765_s3 + $0x578] sm:$0xff] }
 0x38b   : > { %4192 = vmatpush1.bf16.msra.mxu0 %v7405_v18  ;;  %4256 = vmatpush1.bf16.msra.mxu1 %v7407_v48  ;;  %v7455_v18 = vpack.c.bf16 %v1099_v58, %v1091_v6  ;;  %v7477_v6 = vpack.c.bf16 %v1096_v21, %v1088_v44  ;;  %v7479_v58 = vpack.c.bf16 %v1098_v13, %v1090_v50  ;;  %v1106_v21 = vld [vmem:[%s8765_s3 + $0x530] sm:$0xff]  ;;  %v1121_v50 = vld [vmem:[%s8765_s3 + $0x5a8] sm:$0xff] }
 0x38c   : > { %4194 = vmatprep.subr.bf16.mxu0 %v7417_v62  ;;  %4258 = vmatprep.subr.bf16.mxu1 %v7419_v26  ;;  %v1104_v26 = vld [vmem:[%s8765_s3 + $0x520] sm:$0xff]  ;;  %v7489_v48 = vpack.c.bf16 %v1113_v32, %v1105_v36  ;;  %v1114_v44 = vld [vmem:[%s8765_s3 + $0x570] sm:$0xff]  ;;  %v1129_v13 = vld [vmem:[%s8765_s3 + $0x5e8] sm:$0xff] }
 0x38d   : > { %9143 = vst [vmem:[#allocation110_spill] sm:$0xff] %v7455_v18  ;;  %9144 = vst [vmem:[#allocation111_spill] sm:$0xff] %v7477_v6  ;;  %v1112_v62 = vld [vmem:[%s8765_s3 + $0x560] sm:$0xff]  ;;  %v1123_v36 = vld [vmem:[%s8765_s3 + $0x5b8] sm:$0xff] }
 0x38e   : > { %9145 = vst [vmem:[#allocation112_spill] sm:$0xff] %v7479_v58  ;;  %9146 = vst [vmem:[#allocation113_spill] sm:$0xff] %v7489_v48  ;;  %v1131_v32 = vld [vmem:[%s8765_s3 + $0x5f8] sm:$0xff] }
 0x38f   : > { %4196 = vmatpush1.bf16.msra.mxu0 %v7441_v38  ;;  %4260 = vmatpush1.bf16.msra.mxu1 %v7443_v9  ;;  %v7491_v38 = vpack.c.bf16 %v1115_v61, %v1107_v51  ;;  %v7513_v51 = vpack.c.bf16 %v1112_v62, %v1104_v26  ;;  %v7515_v61 = vpack.c.bf16 %v1114_v44, %v1106_v21  ;;  %v1122_v62 = vld [vmem:[%s8765_s3 + $0x5b0] sm:$0xff]  ;;  %v1137_v21 = vld [vmem:[%s8765_s3 + $0x628] sm:$0xff] }
 0x390   : > { %4198 = vmatprep.subr.bf16.mxu0 %v7453_v30  ;;  %4262 = vmatprep.subr.bf16.mxu1 %v7455_v18  ;;  %v1120_v18 = vld [vmem:[%s8765_s3 + $0x5a0] sm:$0xff]  ;;  %v7525_v9 = vpack.c.bf16 %v1129_v13, %v1121_v50  ;;  %v1130_v26 = vld [vmem:[%s8765_s3 + $0x5f0] sm:$0xff]  ;;  %v1145_v44 = vld [vmem:[%s8765_s3 + $0x668] sm:$0xff] }
 0x391   : > { %9147 = vst [vmem:[#allocation114_spill] sm:$0xff] %v7491_v38  ;;  %9148 = vst [vmem:[#allocation115_spill] sm:$0xff] %v7513_v51  ;;  %v1128_v30 = vld [vmem:[%s8765_s3 + $0x5e0] sm:$0xff]  ;;  %v1139_v50 = vld [vmem:[%s8765_s3 + $0x638] sm:$0xff] }
 0x392   : > { %9149 = vst [vmem:[#allocation116_spill] sm:$0xff] %v7515_v61  ;;  %9150 = vst [vmem:[#allocation117_spill] sm:$0xff] %v7525_v9  ;;  %v1147_v13 = vld [vmem:[%s8765_s3 + $0x678] sm:$0xff] }
 0x393   : > { %4200 = vmatpush1.bf16.msra.mxu0 %v7477_v6  ;;  %4264 = vmatpush1.bf16.msra.mxu1 %v7479_v58  ;;  %v7527_v6 = vpack.c.bf16 %v1131_v32, %v1123_v36  ;;  %v7549_v36 = vpack.c.bf16 %v1128_v30, %v1120_v18  ;;  %v7551_v32 = vpack.c.bf16 %v1130_v26, %v1122_v62  ;;  %v1138_v30 = vld [vmem:[%s8765_s3 + $0x630] sm:$0xff]  ;;  %v1153_v62 = vld [vmem:[%s8765_s3 + $0x6a8] sm:$0xff] }
 0x394   : > { %4202 = vmatprep.subr.bf16.mxu0 %v7489_v48  ;;  %4266 = vmatprep.subr.bf16.mxu1 %v7491_v38  ;;  %v1136_v38 = vld [vmem:[%s8765_s3 + $0x620] sm:$0xff]  ;;  %v7561_v58 = vpack.c.bf16 %v1145_v44, %v1137_v21  ;;  %v1146_v18 = vld [vmem:[%s8765_s3 + $0x670] sm:$0xff]  ;;  %v1161_v26 = vld [vmem:[%s8765_s3 + $0x6e8] sm:$0xff] }
 0x395   : > { %9151 = vst [vmem:[#allocation118_spill] sm:$0xff] %v7527_v6  ;;  %9152 = vst [vmem:[#allocation119_spill] sm:$0xff] %v7549_v36  ;;  %v1144_v48 = vld [vmem:[%s8765_s3 + $0x660] sm:$0xff]  ;;  %v1155_v21 = vld [vmem:[%s8765_s3 + $0x6b8] sm:$0xff] }
 0x396   : > { %9153 = vst [vmem:[#allocation120_spill] sm:$0xff] %v7551_v32  ;;  %9154 = vst [vmem:[#allocation121_spill] sm:$0xff] %v7561_v58  ;;  %v1163_v44 = vld [vmem:[%s8765_s3 + $0x6f8] sm:$0xff] }
 0x397   : > { %4204 = vmatpush1.bf16.msra.mxu0 %v7513_v51  ;;  %4268 = vmatpush1.bf16.msra.mxu1 %v7515_v61  ;;  %v7563_v51 = vpack.c.bf16 %v1147_v13, %v1139_v50  ;;  %v7585_v50 = vpack.c.bf16 %v1144_v48, %v1136_v38  ;;  %v7587_v13 = vpack.c.bf16 %v1146_v18, %v1138_v30  ;;  %v1154_v48 = vld [vmem:[%s8765_s3 + $0x6b0] sm:$0xff]  ;;  %v1169_v30 = vld [vmem:[%s8765_s3 + $0x728] sm:$0xff] }
 0x398   : > { %4206 = vmatprep.subr.bf16.mxu0 %v7525_v9  ;;  %4270 = vmatprep.subr.bf16.mxu1 %v7527_v6  ;;  %v1152_v6 = vld [vmem:[%s8765_s3 + $0x6a0] sm:$0xff]  ;;  %v7597_v61 = vpack.c.bf16 %v1161_v26, %v1153_v62  ;;  %v1162_v38 = vld [vmem:[%s8765_s3 + $0x6f0] sm:$0xff]  ;;  %v1177_v18 = vld [vmem:[%s8765_s3 + $0x768] sm:$0xff] }
 0x399   : > { %9155 = vst [vmem:[#allocation122_spill] sm:$0xff] %v7563_v51  ;;  %9156 = vst [vmem:[#allocation123_spill] sm:$0xff] %v7585_v50  ;;  %v1160_v9 = vld [vmem:[%s8765_s3 + $0x6e0] sm:$0xff]  ;;  %v1171_v62 = vld [vmem:[%s8765_s3 + $0x738] sm:$0xff] }
 0x39a   : > { %9157 = vst [vmem:[#allocation124_spill] sm:$0xff] %v7587_v13  ;;  %9158 = vst [vmem:[#allocation125_spill] sm:$0xff] %v7597_v61  ;;  %v1179_v26 = vld [vmem:[%s8765_s3 + $0x778] sm:$0xff] }
 0x39b   : > { %4208 = vmatpush1.bf16.msra.mxu0 %v7549_v36  ;;  %4272 = vmatpush1.bf16.msra.mxu1 %v7551_v32  ;;  %v7599_v36 = vpack.c.bf16 %v1163_v44, %v1155_v21  ;;  %v7621_v21 = vpack.c.bf16 %v1160_v9, %v1152_v6  ;;  %v7623_v44 = vpack.c.bf16 %v1162_v38, %v1154_v48  ;;  %v1170_v9 = vld [vmem:[%s8765_s3 + $0x730] sm:$0xff]  ;;  %v1185_v48 = vld [vmem:[%s8765_s3 + $0x7a8] sm:$0xff] }
 0x39c   : > { %4210 = vmatprep.subr.bf16.mxu0 %v7561_v58  ;;  %4274 = vmatprep.subr.bf16.mxu1 %v7563_v51  ;;  %v1168_v51 = vld [vmem:[%s8765_s3 + $0x720] sm:$0xff]  ;;  %v7633_v32 = vpack.c.bf16 %v1177_v18, %v1169_v30  ;;  %v1178_v6 = vld [vmem:[%s8765_s3 + $0x770] sm:$0xff]  ;;  %v1193_v38 = vld [vmem:[%s8765_s3 + $0x7e8] sm:$0xff] }
 0x39d   : > { %9159 = vst [vmem:[#allocation126_spill] sm:$0xff] %v7599_v36  ;;  %v1176_v58 = vld [vmem:[%s8765_s3 + $0x760] sm:$0xff]  ;;  %v1187_v30 = vld [vmem:[%s8765_s3 + $0x7b8] sm:$0xff] }
 0x39e   : > { %v1195_v18 = vld [vmem:[%s8765_s3 + $0x7f8] sm:$0xff] }
 0x39f   : > { %4212 = vmatpush1.bf16.msra.mxu0 %v7585_v50  ;;  %4276 = vmatpush1.bf16.msra.mxu1 %v7587_v13  ;;  %v7635_v50 = vpack.c.bf16 %v1179_v26, %v1171_v62  ;;  %v7657_v62 = vpack.c.bf16 %v1176_v58, %v1168_v51  ;;  %v7659_v26 = vpack.c.bf16 %v1178_v6, %v1170_v9  ;;  %v1192_v58 = vld [vmem:[%s8765_s3 + $0x7e0] sm:$0xff]  ;;  %v1186_v51 = vld [vmem:[%s8765_s3 + $0x7b0] sm:$0xff] }
 0x3a0   : > { %4214 = vmatprep.subr.bf16.mxu0 %v7597_v61  ;;  %4278 = vmatprep.subr.bf16.mxu1 %v7599_v36  ;;  %v1184_v36 = vld [vmem:[%s8765_s3 + $0x7a0] sm:$0xff]  ;;  %v7667_v61 = vpack.c.bf16 %v1193_v38, %v1185_v48  ;;  %v7669_v13 = vpack.c.bf16 %v1195_v18, %v1187_v30  ;;  %v7684_v6 = vpack.c.bf16 %v1194_v28, %v1186_v51  ;;  %v7692_v48 = vpop.eup %6135  ;;  %v9169_v30 = vld [vmem:[#allocation43_spill] sm:$0xff]  ;;  %v9170_v18 = vld [vmem:[#allocation44_spill] sm:$0xff] }
 0x3a1   : > { %9160 = vst [vmem:[#allocation127_spill] sm:$0xff] %v7635_v50  ;;  %9161 = vst [vmem:[#allocation128_spill] sm:$0xff] %v7657_v62  ;;  %v7682_v9 = vpack.c.bf16 %v1192_v58, %v1184_v36  ;;  %v9167_v36 = vld [vmem:[#allocation41_spill] sm:$0xff]  ;;  %v9168_v38 = vld [vmem:[#allocation42_spill] sm:$0xff] }
 0x3a2   : > { %9162 = vst [vmem:[#allocation129_spill] sm:$0xff] %v7659_v26  ;;  %9163 = vst [vmem:[#allocation130_spill] sm:$0xff] %v7667_v61  ;;  %v9171_v58 = vld [vmem:[#allocation45_spill] sm:$0xff]  ;;  %v9172_v51 = vld [vmem:[#allocation46_spill] sm:$0xff] }
 0x3a3   : > { %4216 = vmatpush1.bf16.msra.mxu0 %v7621_v21  ;;  %4280 = vmatpush1.bf16.msra.mxu1 %v7623_v44  ;;  %9164 = vst [vmem:[#allocation131_spill] sm:$0xff] %v7669_v13  ;;  %9165 = vst [vmem:[#allocation132_spill] sm:$0xff] %v7682_v9  ;;  %v9173_v28 = vld [vmem:[#allocation47_spill] sm:$0xff] }
 0x3a4   : > { %4218 = vmatprep.subr.bf16.mxu0 %v7633_v32  ;;  %4282 = vmatprep.subr.bf16.mxu1 %v7635_v50  ;;  %9166 = vst [vmem:[#allocation133_spill] sm:$0xff] %v7684_v6 }
 0x3a7   : > { %4220 = vmatpush1.bf16.msra.mxu0 %v7657_v62  ;;  %4284 = vmatpush1.bf16.msra.mxu1 %v7659_v26 }
 0x3a8   : > { %4222 = vmatprep.subr.bf16.mxu0 %v7667_v61  ;;  %4286 = vmatprep.subr.bf16.mxu1 %v7669_v13 }
 0x3ab   : > { %4224 = vmatpush1.bf16.msra.mxu0 %v7682_v9  ;;  %4288 = vmatpush1.bf16.msra.mxu1 %v7684_v6 }
 0x3ac   : > { %4290 = vmatprep.subr.bf16.mxu0 %v6512_v14  ;;  %4354 = vmatprep.subr.bf16.mxu1 %v6523_v19 }
 0x3ae   : > { %1403 = vmatmul.mubr.f32.vlgmr.msra.gmra.mrb[6].mxu0 %v7139_v39  ;;  %1474 = vmatmul.mubr.f32.vlgmr.msra.gmra.mrb[6].mxu1 %v7139_v39  ;;  %v9193_v39 = vld [vmem:[#allocation67_spill] sm:$0xff] }
 0x3af   : > { %4292 = vmatpush1.bf16.msra.mxu0 %v6525_v20  ;;  %1544 = vmatprep.mubr.f32.mxu0 %v7692_v48 }
 0x3b0   : > { %4356 = vmatpush1.bf16.msra.mxu1 %v6537_v2  ;;  %1615 = vmatprep.mubr.f32.mxu1 %v7692_v48 }
 0x3b1   : > { %4294 = vmatprep.subr.bf16.mxu0 %v6550_v23  ;;  %4358 = vmatprep.subr.bf16.mxu1 %v6552_v29 }
 0x3b3   : > { %4296 = vmatpush1.bf16.msra.mxu0 %v6564_v33 }
 0x3b4   : > { %4360 = vmatpush1.bf16.msra.mxu1 %v6571_v35  ;;  %4298 = vmatprep.subr.bf16.mxu0 %v6584_v40 }
 0x3b5   : > { %4362 = vmatprep.subr.bf16.mxu1 %v6595_v46 }
 0x3b7   : > { %4300 = vmatpush1.bf16.msra.mxu0 %v6597_v47 }
 0x3b8   : > { %4364 = vmatpush1.bf16.msra.mxu1 %v6609_v52  ;;  %4302 = vmatprep.subr.bf16.mxu0 %v6622_v56 }
 0x3b9   : > { %4366 = vmatprep.subr.bf16.mxu1 %v6624_v57 }
 0x3bb   : > { %4304 = vmatpush1.bf16.msra.mxu0 %v6636_v63 }
 0x3bc   : > { %4368 = vmatpush1.bf16.msra.mxu1 %v6649_v4  ;;  %4306 = vmatprep.subr.bf16.mxu0 %v6651_v5 }
 0x3bd   : > { %4370 = vmatprep.subr.bf16.mxu1 %v6662_v10 }
 0x3bf   : > { %4308 = vmatpush1.bf16.msra.mxu0 %v6674_v15 }
 0x3c0   : > { %4372 = vmatpush1.bf16.msra.mxu1 %v6687_v22  ;;  %4310 = vmatprep.subr.bf16.mxu0 %v6689_v24 }
 0x3c1   : > { %4374 = vmatprep.subr.bf16.mxu1 %v6701_v31 }
 0x3c3   : > { %4312 = vmatpush1.bf16.msra.mxu0 %v6722_v41 }
 0x3c4   : > { %4376 = vmatpush1.bf16.msra.mxu1 %v6726_v42  ;;  %4314 = vmatprep.subr.bf16.mxu0 %v6728_v43 }
 0x3c5   : > { %4378 = vmatprep.subr.bf16.mxu1 %v6740_v53 }
 0x3c7   : > { %4316 = vmatpush1.bf16.msra.mxu0 %v6758_v0 }
 0x3c8   : > { %4380 = vmatpush1.bf16.msra.mxu1 %v6762_v1  ;;  %4318 = vmatprep.subr.bf16.mxu0 %v6764_v3 }
 0x3c9   : > { %4382 = vmatprep.subr.bf16.mxu1 %v6776_v11 }
 0x3cb   : > { %4320 = vmatpush1.bf16.msra.mxu0 %v6794_v7 }
 0x3cc   : > { %4384 = vmatpush1.bf16.msra.mxu1 %v6798_v17  ;;  %4322 = vmatprep.subr.bf16.mxu0 %v6800_v27 }
 0x3cd   : > { %4386 = vmatprep.subr.bf16.mxu1 %v6812_v37 }
 0x3cf   : > { %4324 = vmatpush1.bf16.msra.mxu0 %v6830_v54  ;;  %v9174_v54 = vld [vmem:[#allocation48_spill] sm:$0xff] }
 0x3d0   : > { %4388 = vmatpush1.bf16.msra.mxu1 %v6834_v55  ;;  %4326 = vmatprep.subr.bf16.mxu0 %v6836_v59  ;;  %v9175_v55 = vld [vmem:[#allocation49_spill] sm:$0xff]  ;;  %v9176_v59 = vld [vmem:[#allocation50_spill] sm:$0xff] }
 0x3d1   : > { %4390 = vmatprep.subr.bf16.mxu1 %v6848_v8  ;;  %v9177_v8 = vld [vmem:[#allocation51_spill] sm:$0xff] }
 0x3d3   : > { %4328 = vmatpush1.bf16.msra.mxu0 %v9167_v36  ;;  %v9178_v36 = vld [vmem:[#allocation52_spill] sm:$0xff] }
 0x3d4   : > { %4392 = vmatpush1.bf16.msra.mxu1 %v9168_v38  ;;  %4330 = vmatprep.subr.bf16.mxu0 %v9169_v30  ;;  %v9179_v38 = vld [vmem:[#allocation53_spill] sm:$0xff]  ;;  %v9180_v30 = vld [vmem:[#allocation54_spill] sm:$0xff] }
 0x3d5   : > { %4394 = vmatprep.subr.bf16.mxu1 %v9170_v18  ;;  %v9181_v18 = vld [vmem:[#allocation55_spill] sm:$0xff] }
 0x3d7   : > { %4332 = vmatpush1.bf16.msra.mxu0 %v9171_v58  ;;  %v9182_v58 = vld [vmem:[#allocation56_spill] sm:$0xff] }
 0x3d8   : > { %4396 = vmatpush1.bf16.msra.mxu1 %v9172_v51  ;;  %4334 = vmatprep.subr.bf16.mxu0 %v9173_v28  ;;  %v9183_v28 = vld [vmem:[#allocation57_spill] sm:$0xff] }
 0x3d9   : > { %4398 = vmatprep.subr.bf16.mxu1 %v9174_v54  ;;  %v9184_v54 = vld [vmem:[#allocation58_spill] sm:$0xff] }
 0x3db   : > { %4336 = vmatpush1.bf16.msra.mxu0 %v9175_v55  ;;  %v9185_v55 = vld [vmem:[#allocation59_spill] sm:$0xff] }
 0x3dc   : > { %4400 = vmatpush1.bf16.msra.mxu1 %v9176_v59  ;;  %4338 = vmatprep.subr.bf16.mxu0 %v9177_v8  ;;  %v9186_v59 = vld [vmem:[#allocation60_spill] sm:$0xff]  ;;  %v9187_v8 = vld [vmem:[#allocation61_spill] sm:$0xff] }
 0x3dd   : > { %4402 = vmatprep.subr.bf16.mxu1 %v9178_v36  ;;  %v9188_v36 = vld [vmem:[#allocation62_spill] sm:$0xff] }
 0x3df   : > { %4340 = vmatpush1.bf16.msra.mxu0 %v9179_v38  ;;  %v9189_v38 = vld [vmem:[#allocation63_spill] sm:$0xff] }
 0x3e0   : > { %4404 = vmatpush1.bf16.msra.mxu1 %v9180_v30  ;;  %4342 = vmatprep.subr.bf16.mxu0 %v9181_v18  ;;  %v9190_v30 = vld [vmem:[#allocation64_spill] sm:$0xff]  ;;  %v9191_v18 = vld [vmem:[#allocation65_spill] sm:$0xff] }
 0x3e1   : > { %4406 = vmatprep.subr.bf16.mxu1 %v9182_v58  ;;  %v9192_v58 = vld [vmem:[#allocation66_spill] sm:$0xff] }
 0x3e3   : > { %4344 = vmatpush1.bf16.msra.mxu0 %v9183_v28  ;;  %v7762_v28 = vpop.eup %6137 }
 0x3e4   : > { %4408 = vmatpush1.bf16.msra.mxu1 %v9184_v54  ;;  %4346 = vmatprep.subr.bf16.mxu0 %v9185_v55  ;;  %v9194_v54 = vld [vmem:[#allocation68_spill] sm:$0xff] }
 0x3e5   : > { %4410 = vmatprep.subr.bf16.mxu1 %v9186_v59 }
 0x3e7   : > { %4348 = vmatpush1.bf16.msra.mxu0 %v9187_v8 }
 0x3e8   : > { %4412 = vmatpush1.bf16.msra.mxu1 %v9188_v36  ;;  %4350 = vmatprep.subr.bf16.mxu0 %v9189_v38 }
 0x3e9   : > { %4414 = vmatprep.subr.bf16.mxu1 %v9190_v30 }
 0x3eb   : > { %4352 = vmatpush1.bf16.msra.mxu0 %v9191_v18 }
 0x3ec   : > { %4416 = vmatpush1.bf16.msra.mxu1 %v9192_v58  ;;  %4418 = vmatprep.subr.bf16.mxu0 %v9193_v39  ;;  %v9196_v39 = vld [vmem:[#allocation83_spill] sm:$0xff]  ;;  %v9198_v58 = vld [vmem:[#allocation85_spill] sm:$0xff] }
 0x3ed   : > { %4482 = vmatprep.subr.bf16.mxu1 %v9194_v54  ;;  %v9195_v54 = vld [vmem:[#allocation82_spill] sm:$0xff] }
 0x3ee   : > { %1545 = vmatmul.mubr.f32.vlgmr.msra.gmra.mrb[8].mxu0 %v7762_v28 }
 0x3ef   : > { %1616 = vmatmul.mubr.f32.vlgmr.msra.gmra.mrb[8].mxu1 %v7762_v28  ;;  %4420 = vmatpush1.bf16.msra.mxu0 %v7114_v49  ;;  %v9197_v49 = vld [vmem:[#allocation84_spill] sm:$0xff] }
 0x3f0   : > { %1686 = vmatprep.mubr.f32.mxu0 %v7692_v48  ;;  %4484 = vmatpush1.bf16.msra.mxu1 %v7116_v12  ;;  %v9199_v12 = vld [vmem:[#allocation86_spill] sm:$0xff] }
 0x3f1   : > { %1757 = vmatprep.mubr.f32.mxu1 %v7692_v48  ;;  %4422 = vmatprep.subr.bf16.mxu0 %v7170_v25  ;;  %v9200_v48 = vld [vmem:[#allocation87_spill] sm:$0xff]  ;;  %v9201_v25 = vld [vmem:[#allocation88_spill] sm:$0xff] }
 0x3f2   : > { %4486 = vmatprep.subr.bf16.mxu1 %v7172_v34  ;;  %v9202_v34 = vld [vmem:[#allocation89_spill] sm:$0xff] }
 0x3f3   : > { %4424 = vmatpush1.bf16.msra.mxu0 %v7187_v16  ;;  %v9203_v16 = vld [vmem:[#allocation90_spill] sm:$0xff] }
 0x3f4   : > { %4488 = vmatpush1.bf16.msra.mxu1 %v7189_v60  ;;  %4426 = vmatprep.subr.bf16.mxu0 %v7199_v45  ;;  %v9204_v60 = vld [vmem:[#allocation91_spill] sm:$0xff]  ;;  %v9205_v45 = vld [vmem:[#allocation92_spill] sm:$0xff] }
 0x3f5   : > { %4490 = vmatprep.subr.bf16.mxu1 %v9195_v54  ;;  %v9206_v54 = vld [vmem:[#allocation93_spill] sm:$0xff] }
 0x3f7   : > { %4428 = vmatpush1.bf16.msra.mxu0 %v9196_v39  ;;  %v9207_v39 = vld [vmem:[#allocation94_spill] sm:$0xff] }
 0x3f8   : > { %4492 = vmatpush1.bf16.msra.mxu1 %v9197_v49  ;;  %4430 = vmatprep.subr.bf16.mxu0 %v9198_v58  ;;  %v9208_v49 = vld [vmem:[#allocation95_spill] sm:$0xff]  ;;  %v9209_v58 = vld [vmem:[#allocation96_spill] sm:$0xff] }
 0x3f9   : > { %4494 = vmatprep.subr.bf16.mxu1 %v9199_v12  ;;  %v9210_v12 = vld [vmem:[#allocation97_spill] sm:$0xff] }
 0x3fb   : > { %4432 = vmatpush1.bf16.msra.mxu0 %v9200_v48  ;;  %v9211_v48 = vld [vmem:[#allocation98_spill] sm:$0xff] }
 0x3fc   : > { %4496 = vmatpush1.bf16.msra.mxu1 %v9201_v25  ;;  %4434 = vmatprep.subr.bf16.mxu0 %v9202_v34  ;;  %v9212_v25 = vld [vmem:[#allocation99_spill] sm:$0xff]  ;;  %v9213_v34 = vld [vmem:[#allocation100_spill] sm:$0xff] }
 0x3fd   : > { %4498 = vmatprep.subr.bf16.mxu1 %v9203_v16  ;;  %v9214_v16 = vld [vmem:[#allocation101_spill] sm:$0xff] }
 0x3ff   : > { %4436 = vmatpush1.bf16.msra.mxu0 %v9204_v60  ;;  %v9215_v60 = vld [vmem:[#allocation102_spill] sm:$0xff] }
 0x400   : > { %4500 = vmatpush1.bf16.msra.mxu1 %v9205_v45  ;;  %4438 = vmatprep.subr.bf16.mxu0 %v9206_v54  ;;  %v9216_v45 = vld [vmem:[#allocation103_spill] sm:$0xff]  ;;  %v9217_v54 = vld [vmem:[#allocation104_spill] sm:$0xff] }
 0x401   : > { %4502 = vmatprep.subr.bf16.mxu1 %v9207_v39  ;;  %v9218_v39 = vld [vmem:[#allocation105_spill] sm:$0xff] }
 0x403   : > { %4440 = vmatpush1.bf16.msra.mxu0 %v9208_v49  ;;  %v9219_v49 = vld [vmem:[#allocation106_spill] sm:$0xff] }
 0x404   : > { %4504 = vmatpush1.bf16.msra.mxu1 %v9209_v58  ;;  %4442 = vmatprep.subr.bf16.mxu0 %v9210_v12  ;;  %v9220_v58 = vld [vmem:[#allocation107_spill] sm:$0xff]  ;;  %v9221_v12 = vld [vmem:[#allocation108_spill] sm:$0xff] }
 0x405   : > { %4506 = vmatprep.subr.bf16.mxu1 %v9211_v48  ;;  %v9222_v48 = vld [vmem:[#allocation109_spill] sm:$0xff] }
 0x407   : > { %4444 = vmatpush1.bf16.msra.mxu0 %v9212_v25  ;;  %v9223_v25 = vld [vmem:[#allocation110_spill] sm:$0xff] }
 0x408   : > { %4508 = vmatpush1.bf16.msra.mxu1 %v9213_v34  ;;  %4446 = vmatprep.subr.bf16.mxu0 %v9214_v16  ;;  %v9224_v34 = vld [vmem:[#allocation111_spill] sm:$0xff]  ;;  %v9225_v16 = vld [vmem:[#allocation112_spill] sm:$0xff] }
 0x409   : > { %4510 = vmatprep.subr.bf16.mxu1 %v9215_v60  ;;  %v9226_v60 = vld [vmem:[#allocation113_spill] sm:$0xff] }
 0x40b   : > { %4448 = vmatpush1.bf16.msra.mxu0 %v9216_v45  ;;  %v9227_v45 = vld [vmem:[#allocation114_spill] sm:$0xff] }
 0x40c   : > { %4512 = vmatpush1.bf16.msra.mxu1 %v9217_v54  ;;  %4450 = vmatprep.subr.bf16.mxu0 %v9218_v39  ;;  %v9228_v54 = vld [vmem:[#allocation115_spill] sm:$0xff]  ;;  %v9229_v39 = vld [vmem:[#allocation116_spill] sm:$0xff] }
 0x40d   : > { %4514 = vmatprep.subr.bf16.mxu1 %v9219_v49  ;;  %v9230_v49 = vld [vmem:[#allocation117_spill] sm:$0xff] }
 0x40f   : > { %4452 = vmatpush1.bf16.msra.mxu0 %v9220_v58  ;;  %v9231_v58 = vld [vmem:[#allocation118_spill] sm:$0xff] }
 0x410   : > { %4516 = vmatpush1.bf16.msra.mxu1 %v9221_v12  ;;  %4454 = vmatprep.subr.bf16.mxu0 %v9222_v48  ;;  %v9232_v12 = vld [vmem:[#allocation119_spill] sm:$0xff]  ;;  %v9233_v48 = vld [vmem:[#allocation120_spill] sm:$0xff] }
 0x411   : > { %4518 = vmatprep.subr.bf16.mxu1 %v9223_v25  ;;  %v9234_v25 = vld [vmem:[#allocation121_spill] sm:$0xff] }
 0x413   : > { %4456 = vmatpush1.bf16.msra.mxu0 %v9224_v34  ;;  %v9235_v34 = vld [vmem:[#allocation122_spill] sm:$0xff] }
 0x414   : > { %4520 = vmatpush1.bf16.msra.mxu1 %v9225_v16  ;;  %4458 = vmatprep.subr.bf16.mxu0 %v9226_v60  ;;  %v9236_v16 = vld [vmem:[#allocation123_spill] sm:$0xff]  ;;  %v9237_v60 = vld [vmem:[#allocation124_spill] sm:$0xff] }
 0x415   : > { %4522 = vmatprep.subr.bf16.mxu1 %v9227_v45  ;;  %v9238_v45 = vld [vmem:[#allocation125_spill] sm:$0xff] }
 0x417   : > { %4460 = vmatpush1.bf16.msra.mxu0 %v9228_v54  ;;  %v9239_v54 = vld [vmem:[#allocation126_spill] sm:$0xff] }
 0x418   : > { %4524 = vmatpush1.bf16.msra.mxu1 %v9229_v39  ;;  %4462 = vmatprep.subr.bf16.mxu0 %v9230_v49 }
 0x419   : > { %4526 = vmatprep.subr.bf16.mxu1 %v9231_v58 }
 0x41b   : > { %4464 = vmatpush1.bf16.msra.mxu0 %v9232_v12 }
 0x41c   : > { %4528 = vmatpush1.bf16.msra.mxu1 %v9233_v48  ;;  %4466 = vmatprep.subr.bf16.mxu0 %v9234_v25 }
 0x41d   : > { %4530 = vmatprep.subr.bf16.mxu1 %v9235_v34 }
 0x41f   : > { %4468 = vmatpush1.bf16.msra.mxu0 %v9236_v16 }
 0x420   : > { %4532 = vmatpush1.bf16.msra.mxu1 %v9237_v60  ;;  %4470 = vmatprep.subr.bf16.mxu0 %v9238_v45 }
 0x421   : > { %4534 = vmatprep.subr.bf16.mxu1 %v9239_v54 }
 0x423   : > { %4472 = vmatpush1.bf16.msra.mxu0 %v7621_v21 }
 0x424   : > { %4536 = vmatpush1.bf16.msra.mxu1 %v7623_v44  ;;  %4474 = vmatprep.subr.bf16.mxu0 %v7633_v32 }
 0x425   : > { %4538 = vmatprep.subr.bf16.mxu1 %v7635_v50 }
 0x427   : > { %4476 = vmatpush1.bf16.msra.mxu0 %v7657_v62 }
 0x428   : > { %4540 = vmatpush1.bf16.msra.mxu1 %v7659_v26  ;;  %4478 = vmatprep.subr.bf16.mxu0 %v7667_v61  ;;  %v9240_v26 = vld [vmem:[#allocation71_spill] sm:$0xff] }
 0x429   : > { %4542 = vmatprep.subr.bf16.mxu1 %v7669_v13  ;;  %6139 = vtanh.f32 %v9240_v26 }
 0x42b   : > { %4480 = vmatpush1.bf16.msra.mxu0 %v7682_v9 }
 0x42c   : > { %4544 = vmatpush1.bf16.msra.mxu1 %v7684_v6  ;;  %4546 = vmatprep.subr.bf16.mxu0 %v6512_v14 }
 0x42d   : > { %4610 = vmatprep.subr.bf16.mxu1 %v6523_v19 }
 0x42e   : > { %1687 = vmatmul.mubr.f32.vlgmr.msra.gmra.mrb[10].mxu0 %v7762_v28 }
 0x42f   : > { %1758 = vmatmul.mubr.f32.vlgmr.msra.gmra.mrb[10].mxu1 %v7762_v28  ;;  %4548 = vmatpush1.bf16.msra.mxu0 %v6525_v20  ;;  %v6197_v28 = vmov 1983009808  }
 0x430   : > { %1924 = vmatprep.mubr.f32.mxu0 %v9240_v26  ;;  %4612 = vmatpush1.bf16.msra.mxu1 %v6537_v2 }
 0x431   : > { %1995 = vmatprep.mubr.f32.mxu1 %v9240_v26  ;;  %4550 = vmatprep.subr.bf16.mxu0 %v6550_v23  ;;  %v1775_v23 = vunpack.c.l.s4 %v6197_v28 }
 0x432   : > { %4614 = vmatprep.subr.bf16.mxu1 %v6552_v29 }
 0x433   : > { %4552 = vmatpush1.bf16.msra.mxu0 %v6564_v33 }
 0x434   : > { %4616 = vmatpush1.bf16.msra.mxu1 %v6571_v35  ;;  %4554 = vmatprep.subr.bf16.mxu0 %v6584_v40 }
 0x435   : > { %4618 = vmatprep.subr.bf16.mxu1 %v6595_v46  ;;  %v1776_v46 = vunpack.c.0.s8 %v1775_v23 }
 0x437   : > { %4556 = vmatpush1.bf16.msra.mxu0 %v6597_v47 }
 0x438   : > { %4620 = vmatpush1.bf16.msra.mxu1 %v6609_v52  ;;  %4558 = vmatprep.subr.bf16.mxu0 %v6622_v56 }
 0x439   : > { %4622 = vmatprep.subr.bf16.mxu1 %v6624_v57 }
 0x43b   : > { %4560 = vmatpush1.bf16.msra.mxu0 %v6636_v63 }
 0x43c   : > { %4624 = vmatpush1.bf16.msra.mxu1 %v6649_v4  ;;  %4562 = vmatprep.subr.bf16.mxu0 %v6651_v5  ;;  %v9241_v4 = vld [vmem:[#allocation6_spill] sm:$0xff] }
 0x43d   : > { %4626 = vmatprep.subr.bf16.mxu1 %v6662_v10  ;;  %v7861_v57 = vsub.s32 %v1776_v46, %v9241_v4  ;;  %v9243_v4 = vld [vmem:[#allocation38_spill] sm:$0xff] }
 0x43f   : > { %4564 = vmatpush1.bf16.msra.mxu0 %v6674_v15 }
 0x440   : > { %4628 = vmatpush1.bf16.msra.mxu1 %v6687_v22  ;;  %4566 = vmatprep.subr.bf16.mxu0 %v6689_v24 }
 0x441   : > { %v1262_v28 = vpop.f32.mrb[4].mxu0  ;;  %v1333_v63 = vpop.f32.mrb[4].mxu1  ;;  %4630 = vmatprep.subr.bf16.mxu1 %v6701_v31 }
 0x442   : > { %v1264_v5 = vpop.f32.mrb[5].mxu0  ;;  %v1335_v10 = vpop.f32.mrb[5].mxu1 }
 0x443   : > { %v1772_v23 = vcombine.low %v1262_v28, %v1264_v5  ;;  %v1773_v15 = vcombine.low %v1333_v63, %v1335_v10  ;;  %4568 = vmatpush1.bf16.msra.mxu0 %v6722_v41  ;;  %v9242_v63 = vld [vmem:[#allocation37_spill] sm:$0xff]  ;;  %v9244_v5 = vld [vmem:[#allocation39_spill] sm:$0xff]  ;;  %v9245_v10 = vld [vmem:[#allocation40_spill] sm:$0xff] }
 0x444   : > { %4632 = vmatpush1.bf16.msra.mxu1 %v6726_v42  ;;  %4570 = vmatprep.subr.bf16.mxu0 %v6728_v43  ;;  %v9249_v28 = vld [vmem:[#allocation44_spill] sm:$0xff] }
 0x445   : > { %v1780_v24 = vrot.slane %v1772_v23, %v7861_v57  ;;  %v1787_v22 = vrot.slane %v1773_v15, %v7861_v57  ;;  %4634 = vmatprep.subr.bf16.mxu1 %v6740_v53  ;;  %v9246_v15 = vld [vmem:[#allocation41_spill] sm:$0xff] }
 0x446   : > { %v9250_v23 = vld [vmem:[#allocation45_spill] sm:$0xff] }
 0x447   : > { %v1788_v46 = vcombine.low %v1780_v24, %v1787_v22  ;;  %4572 = vmatpush1.bf16.msra.mxu0 %v6758_v0  ;;  %v9247_v22 = vld [vmem:[#allocation42_spill] sm:$0xff]  ;;  %v9248_v24 = vld [vmem:[#allocation43_spill] sm:$0xff] }
 0x448   : > { %4636 = vmatpush1.bf16.msra.mxu1 %v6762_v1  ;;  %4574 = vmatprep.subr.bf16.mxu0 %v6764_v3 }
 0x449   : > { %1808 = vst [vmem:[%s7875_s27] sm:$0xff] %v1788_v46  ;;  %1856 = vst [vmem:[%s7875_s27 + $0x10] sm:$0xff] %v1788_v46  ;;  %4638 = vmatprep.subr.bf16.mxu1 %v6776_v11  ;;  %v9251_v46 = vld [vmem:[#allocation47_spill] sm:$0xff] }
 0x44b   : > { %4576 = vmatpush1.bf16.msra.mxu0 %v6794_v7 }
 0x44c   : > { %4640 = vmatpush1.bf16.msra.mxu1 %v6798_v17  ;;  %4578 = vmatprep.subr.bf16.mxu0 %v6800_v27 }
 0x44d   : > { %4642 = vmatprep.subr.bf16.mxu1 %v6812_v37 }
 0x44f   : > { %4580 = vmatpush1.bf16.msra.mxu0 %v9242_v63  ;;  %v9252_v63 = vld [vmem:[#allocation48_spill] sm:$0xff] }
 0x450   : > { %4644 = vmatpush1.bf16.msra.mxu1 %v9243_v4  ;;  %4582 = vmatprep.subr.bf16.mxu0 %v9244_v5  ;;  %v9253_v4 = vld [vmem:[#allocation49_spill] sm:$0xff]  ;;  %v9254_v5 = vld [vmem:[#allocation50_spill] sm:$0xff] }
 0x451   : > { %4646 = vmatprep.subr.bf16.mxu1 %v9245_v10  ;;  %v9255_v10 = vld [vmem:[#allocation51_spill] sm:$0xff] }
 0x453   : > { %4584 = vmatpush1.bf16.msra.mxu0 %v9246_v15  ;;  %v9256_v15 = vld [vmem:[#allocation52_spill] sm:$0xff] }
 0x454   : > { %4648 = vmatpush1.bf16.msra.mxu1 %v9247_v22  ;;  %4586 = vmatprep.subr.bf16.mxu0 %v9248_v24  ;;  %v9257_v22 = vld [vmem:[#allocation53_spill] sm:$0xff]  ;;  %v9258_v24 = vld [vmem:[#allocation54_spill] sm:$0xff] }
 0x455   : > { %4650 = vmatprep.subr.bf16.mxu1 %v9249_v28  ;;  %v9259_v28 = vld [vmem:[#allocation55_spill] sm:$0xff] }
 0x457   : > { %4588 = vmatpush1.bf16.msra.mxu0 %v9250_v23  ;;  %v9260_v23 = vld [vmem:[#allocation56_spill] sm:$0xff] }
 0x458   : > { %4652 = vmatpush1.bf16.msra.mxu1 %v9172_v51  ;;  %4590 = vmatprep.subr.bf16.mxu0 %v9251_v46  ;;  %v9261_v51 = vld [vmem:[#allocation57_spill] sm:$0xff]  ;;  %v9262_v46 = vld [vmem:[#allocation58_spill] sm:$0xff] }
 0x459   : > { %4654 = vmatprep.subr.bf16.mxu1 %v9252_v63 }
 0x45b   : > { %4592 = vmatpush1.bf16.msra.mxu0 %v9253_v4  ;;  %v9293_v4 = vld [vmem:[#allocation101_spill] sm:$0xff] }
 0x45c   : > { %4656 = vmatpush1.bf16.msra.mxu1 %v9254_v5  ;;  %4594 = vmatprep.subr.bf16.mxu0 %v9255_v10  ;;  %v9291_v5 = vld [vmem:[#allocation99_spill] sm:$0xff] }
 0x45d   : > { %4658 = vmatprep.subr.bf16.mxu1 %v9256_v15  ;;  %v9287_v15 = vld [vmem:[#allocation95_spill] sm:$0xff] }
 0x45f   : > { %4596 = vmatpush1.bf16.msra.mxu0 %v9257_v22  ;;  %v9286_v22 = vld [vmem:[#allocation94_spill] sm:$0xff] }
 0x460   : > { %4660 = vmatpush1.bf16.msra.mxu1 %v9258_v24  ;;  %4598 = vmatprep.subr.bf16.mxu0 %v9259_v28  ;;  %v9263_v28 = vld [vmem:[#allocation66_spill] sm:$0xff]  ;;  %v9279_v24 = vld [vmem:[#allocation87_spill] sm:$0xff] }
 0x461   : > { %4662 = vmatprep.subr.bf16.mxu1 %v9260_v23  ;;  %v9264_v23 = vld [vmem:[#allocation67_spill] sm:$0xff] }
 0x463   : > { %4600 = vmatpush1.bf16.msra.mxu0 %v9261_v51  ;;  %v9265_v51 = vld [vmem:[#allocation68_spill] sm:$0xff] }
 0x464   : > { %4664 = vmatpush1.bf16.msra.mxu1 %v9262_v46  ;;  %4602 = vmatprep.subr.bf16.mxu0 %v9185_v55  ;;  %v9266_v46 = vld [vmem:[#allocation72_spill] sm:$0xff]  ;;  %v9277_v55 = vld [vmem:[#allocation85_spill] sm:$0xff] }
 0x465   : > { %4666 = vmatprep.subr.bf16.mxu1 %v9186_v59  ;;  %v9267_v59 = vld [vmem:[#allocation69_spill] sm:$0xff]  ;;  %6141 = vtanh.f32 %v9266_v46 }
 0x467   : > { %4604 = vmatpush1.bf16.msra.mxu0 %v9187_v8  ;;  %v9275_v8 = vld [vmem:[#allocation83_spill] sm:$0xff] }
 0x468   : > { %4668 = vmatpush1.bf16.msra.mxu1 %v9188_v36  ;;  %4606 = vmatprep.subr.bf16.mxu0 %v9189_v38  ;;  %v9268_v36 = vld [vmem:[#allocation70_spill] sm:$0xff] }
 0x469   : > { %4670 = vmatprep.subr.bf16.mxu1 %v9190_v30  ;;  %v9269_v30 = vld [vmem:[#allocation77_spill] sm:$0xff]  ;;  %v9274_v38 = vld [vmem:[#allocation82_spill] sm:$0xff] }
 0x46b   : > { %4608 = vmatpush1.bf16.msra.mxu0 %v9191_v18  ;;  %v9270_v18 = vld [vmem:[#allocation78_spill] sm:$0xff] }
 0x46c   : > { %4672 = vmatpush1.bf16.msra.mxu1 %v9263_v28  ;;  %4674 = vmatprep.subr.bf16.mxu0 %v9264_v23  ;;  %v9271_v28 = vld [vmem:[#allocation79_spill] sm:$0xff]  ;;  %v9272_v23 = vld [vmem:[#allocation80_spill] sm:$0xff] }
 0x46d   : > { %4738 = vmatprep.subr.bf16.mxu1 %v9265_v51  ;;  %v9273_v51 = vld [vmem:[#allocation81_spill] sm:$0xff] }
 0x46e   : > { %1925 = vmatmul.mubr.f32.vlgmr.msra.gmra.mrb[12].mxu0 %v9266_v46 }
 0x46f   : > { %1996 = vmatmul.mubr.f32.vlgmr.msra.gmra.mrb[12].mxu1 %v9266_v46  ;;  %4676 = vmatpush1.bf16.msra.mxu0 %v9267_v59  ;;  %v9276_v59 = vld [vmem:[#allocation84_spill] sm:$0xff] }
 0x470   : > { %2066 = vmatprep.mubr.f32.mxu0 %v9240_v26  ;;  %4740 = vmatpush1.bf16.msra.mxu1 %v9268_v36  ;;  %v9278_v36 = vld [vmem:[#allocation86_spill] sm:$0xff] }
 0x471   : > { %2137 = vmatprep.mubr.f32.mxu1 %v9240_v26  ;;  %4678 = vmatprep.subr.bf16.mxu0 %v9269_v30  ;;  %v9280_v30 = vld [vmem:[#allocation88_spill] sm:$0xff]  ;;  %v7993_v26 = vpop.eup %6139 }
 0x472   : > { %4742 = vmatprep.subr.bf16.mxu1 %v9270_v18  ;;  %v9281_v18 = vld [vmem:[#allocation89_spill] sm:$0xff] }
 0x473   : > { %4680 = vmatpush1.bf16.msra.mxu0 %v9271_v28  ;;  %v9282_v28 = vld [vmem:[#allocation90_spill] sm:$0xff] }
 0x474   : > { %4744 = vmatpush1.bf16.msra.mxu1 %v9272_v23  ;;  %4682 = vmatprep.subr.bf16.mxu0 %v9273_v51  ;;  %v9283_v23 = vld [vmem:[#allocation91_spill] sm:$0xff]  ;;  %v9284_v51 = vld [vmem:[#allocation92_spill] sm:$0xff] }
 0x475   : > { %4746 = vmatprep.subr.bf16.mxu1 %v9274_v38  ;;  %v9285_v38 = vld [vmem:[#allocation93_spill] sm:$0xff] }
 0x477   : > { %4684 = vmatpush1.bf16.msra.mxu0 %v9275_v8 }
 0x478   : > { %4748 = vmatpush1.bf16.msra.mxu1 %v9276_v59  ;;  %4686 = vmatprep.subr.bf16.mxu0 %v9277_v55 }
 0x479   : > { %4750 = vmatprep.subr.bf16.mxu1 %v9278_v36 }
 0x47b   : > { %4688 = vmatpush1.bf16.msra.mxu0 %v9279_v24 }
 0x47c   : > { %4752 = vmatpush1.bf16.msra.mxu1 %v9280_v30  ;;  %4690 = vmatprep.subr.bf16.mxu0 %v9281_v18  ;;  %v9288_v18 = vld [vmem:[#allocation96_spill] sm:$0xff] }
 0x47d   : > { %4754 = vmatprep.subr.bf16.mxu1 %v9282_v28  ;;  %v9289_v28 = vld [vmem:[#allocation97_spill] sm:$0xff] }
 0x47f   : > { %4692 = vmatpush1.bf16.msra.mxu0 %v9283_v23  ;;  %v9290_v23 = vld [vmem:[#allocation98_spill] sm:$0xff] }
 0x480   : > { %4756 = vmatpush1.bf16.msra.mxu1 %v9284_v51  ;;  %4694 = vmatprep.subr.bf16.mxu0 %v9285_v38 }
 0x481   : > { %v1404_v8 = vpop.f32.mrb[6].mxu0  ;;  %v1475_v59 = vpop.f32.mrb[6].mxu1  ;;  %4758 = vmatprep.subr.bf16.mxu1 %v9286_v22  ;;  %v9292_v22 = vld [vmem:[#allocation100_spill] sm:$0xff] }
 0x482   : > { %v1406_v36 = vpop.f32.mrb[7].mxu0  ;;  %v1477_v24 = vpop.f32.mrb[7].mxu1 }
 0x483   : > { %v1789_v55 = vcombine.low %v1404_v8, %v1406_v36  ;;  %v1790_v30 = vcombine.low %v1475_v59, %v1477_v24  ;;  %4696 = vmatpush1.bf16.msra.mxu0 %v9287_v15  ;;  %v9294_v59 = vld [vmem:[#allocation102_spill] sm:$0xff]  ;;  %v9295_v8 = vld [vmem:[#allocation103_spill] sm:$0xff]  ;;  %v9296_v36 = vld [vmem:[#allocation104_spill] sm:$0xff] }
 0x484   : > { %4760 = vmatpush1.bf16.msra.mxu1 %v9288_v18  ;;  %4698 = vmatprep.subr.bf16.mxu0 %v9289_v28  ;;  %v9299_v24 = vld [vmem:[#allocation107_spill] sm:$0xff] }
 0x485   : > { %v1797_v51 = vrot.slane %v1789_v55, %v7861_v57  ;;  %v1804_v38 = vrot.slane %v1790_v30, %v7861_v57  ;;  %4762 = vmatprep.subr.bf16.mxu1 %v9290_v23  ;;  %v9297_v55 = vld [vmem:[#allocation105_spill] sm:$0xff]  ;;  %v9298_v30 = vld [vmem:[#allocation106_spill] sm:$0xff] }
 0x487   : > { %v1805_v10 = vcombine.low %v1797_v51, %v1804_v38  ;;  %4700 = vmatpush1.bf16.msra.mxu0 %v9291_v5  ;;  %v9300_v38 = vld [vmem:[#allocation108_spill] sm:$0xff]  ;;  %v9301_v51 = vld [vmem:[#allocation109_spill] sm:$0xff] }
 0x488   : > { %4764 = vmatpush1.bf16.msra.mxu1 %v9292_v22  ;;  %4702 = vmatprep.subr.bf16.mxu0 %v9293_v4  ;;  %v9302_v22 = vld [vmem:[#allocation110_spill] sm:$0xff]  ;;  %v9303_v4 = vld [vmem:[#allocation111_spill] sm:$0xff] }
 0x489   : > { %1809 = vst [vmem:[%s7875_s27 + $0x8] sm:$0xff] %v1805_v10  ;;  %1857 = vst [vmem:[%s7875_s27 + $0x18] sm:$0xff] %v1805_v10  ;;  %4766 = vmatprep.subr.bf16.mxu1 %v9294_v59  ;;  %v9304_v10 = vld [vmem:[#allocation112_spill] sm:$0xff]  ;;  %v9305_v59 = vld [vmem:[#allocation113_spill] sm:$0xff] }
 0x48b   : > { %4704 = vmatpush1.bf16.msra.mxu0 %v9295_v8  ;;  %v9306_v8 = vld [vmem:[#allocation114_spill] sm:$0xff] }
 0x48c   : > { %4768 = vmatpush1.bf16.msra.mxu1 %v9296_v36  ;;  %4706 = vmatprep.subr.bf16.mxu0 %v9297_v55  ;;  %v9307_v36 = vld [vmem:[#allocation115_spill] sm:$0xff] }
 0x48d   : > { %4770 = vmatprep.subr.bf16.mxu1 %v9298_v30 }
 0x48f   : > { %4708 = vmatpush1.bf16.msra.mxu0 %v9299_v24 }
 0x490   : > { %4772 = vmatpush1.bf16.msra.mxu1 %v9300_v38  ;;  %4710 = vmatprep.subr.bf16.mxu0 %v9301_v51 }
 0x491   : > { %4774 = vmatprep.subr.bf16.mxu1 %v9302_v22 }
 0x493   : > { %4712 = vmatpush1.bf16.msra.mxu0 %v9303_v4 }
 0x494   : > { %4776 = vmatpush1.bf16.msra.mxu1 %v9304_v10  ;;  %4714 = vmatprep.subr.bf16.mxu0 %v9305_v59 }
 0x495   : > { %4778 = vmatprep.subr.bf16.mxu1 %v9306_v8 }
 0x497   : > { %4716 = vmatpush1.bf16.msra.mxu0 %v9307_v36 }
 0x498   : > { %4780 = vmatpush1.bf16.msra.mxu1 %v9229_v39  ;;  %4718 = vmatprep.subr.bf16.mxu0 %v9230_v49 }
 0x499   : > { %4782 = vmatprep.subr.bf16.mxu1 %v9231_v58 }
 0x49b   : > { %4720 = vmatpush1.bf16.msra.mxu0 %v9232_v12 }
 0x49c   : > { %4784 = vmatpush1.bf16.msra.mxu1 %v9233_v48  ;;  %4722 = vmatprep.subr.bf16.mxu0 %v9234_v25 }
 0x49d   : > { %4786 = vmatprep.subr.bf16.mxu1 %v9235_v34  ;;  %v9308_v34 = vld [vmem:[#allocation129_spill] sm:$0xff] }
 0x49f   : > { %4724 = vmatpush1.bf16.msra.mxu0 %v9236_v16 }
 0x4a0   : > { %4788 = vmatpush1.bf16.msra.mxu1 %v9237_v60  ;;  %4726 = vmatprep.subr.bf16.mxu0 %v9238_v45 }
 0x4a1   : > { %4790 = vmatprep.subr.bf16.mxu1 %v9239_v54 }
 0x4a3   : > { %4728 = vmatpush1.bf16.msra.mxu0 %v7621_v21 }
 0x4a4   : > { %4792 = vmatpush1.bf16.msra.mxu1 %v7623_v44  ;;  %4730 = vmatprep.subr.bf16.mxu0 %v7633_v32 }
 0x4a5   : > { %4794 = vmatprep.subr.bf16.mxu1 %v7635_v50 }
 0x4a7   : > { %4732 = vmatpush1.bf16.msra.mxu0 %v7657_v62 }
 0x4a8   : > { %4796 = vmatpush1.bf16.msra.mxu1 %v9308_v34  ;;  %4734 = vmatprep.subr.bf16.mxu0 %v7667_v61 }
 0x4a9   : > { %4798 = vmatprep.subr.bf16.mxu1 %v7669_v13 }
 0x4ab   : > { %4736 = vmatpush1.bf16.msra.mxu0 %v7682_v9  ;;  %v9309_v9 = vld [vmem:[#allocation11_spill] sm:$0xff] }
 0x4ac   : > { %4800 = vmatpush1.bf16.msra.mxu1 %v7684_v6  ;;  %4802 = vmatprep.subr.bf16.mxu0 %v6512_v14 }
 0x4ad   : > { %4866 = vmatprep.subr.bf16.mxu1 %v6523_v19  ;;  %v9310_v19 = vld [vmem:[#allocation16_spill] sm:$0xff] }
 0x4ae   : > { %2067 = vmatmul.mubr.f32.vlgmr.msra.gmra.mrb[14].mxu0 %v9266_v46 }
 0x4af   : > { %2138 = vmatmul.mubr.f32.vlgmr.msra.gmra.mrb[14].mxu1 %v9266_v46  ;;  %4804 = vmatpush1.bf16.msra.mxu0 %v6525_v20  ;;  %v9312_v20 = vld [vmem:[#allocation21_spill] sm:$0xff]  ;;  %v9348_v46 = vld [vmem:[#allocation67_spill] sm:$0xff] }
 0x4b0   : > { %2208 = vmatprep.mubr.f32.mxu0 %v7993_v26  ;;  %4868 = vmatpush1.bf16.msra.mxu1 %v6537_v2  ;;  %v9311_v2 = vld [vmem:[#allocation20_spill] sm:$0xff] }
 0x4b1   : > { %2279 = vmatprep.mubr.f32.mxu1 %v7993_v26  ;;  %4806 = vmatprep.subr.bf16.mxu0 %v9309_v9  ;;  %v9313_v9 = vld [vmem:[#allocation22_spill] sm:$0xff] }
 0x4b2   : > { %4870 = vmatprep.subr.bf16.mxu1 %v6552_v29  ;;  %v9314_v29 = vld [vmem:[#allocation23_spill] sm:$0xff] }
 0x4b3   : > { %4808 = vmatpush1.bf16.msra.mxu0 %v6564_v33  ;;  %v9315_v33 = vld [vmem:[#allocation24_spill] sm:$0xff] }
 0x4b4   : > { %4872 = vmatpush1.bf16.msra.mxu1 %v6571_v35  ;;  %4810 = vmatprep.subr.bf16.mxu0 %v6584_v40  ;;  %v9316_v35 = vld [vmem:[#allocation25_spill] sm:$0xff]  ;;  %v9317_v40 = vld [vmem:[#allocation26_spill] sm:$0xff] }
 0x4b5   : > { %4874 = vmatprep.subr.bf16.mxu1 %v9310_v19 }
 0x4b7   : > { %4812 = vmatpush1.bf16.msra.mxu0 %v6597_v47  ;;  %v9318_v47 = vld [vmem:[#allocation27_spill] sm:$0xff] }
 0x4b8   : > { %4876 = vmatpush1.bf16.msra.mxu1 %v6609_v52  ;;  %4814 = vmatprep.subr.bf16.mxu0 %v6622_v56 }
 0x4b9   : > { %4878 = vmatprep.subr.bf16.mxu1 %v9311_v2 }
 0x4bb   : > { %4816 = vmatpush1.bf16.msra.mxu0 %v9312_v20 }
 0x4bc   : > { %4880 = vmatpush1.bf16.msra.mxu1 %v9313_v9  ;;  %4818 = vmatprep.subr.bf16.mxu0 %v9314_v29 }
 0x4bd   : > { %4882 = vmatprep.subr.bf16.mxu1 %v9315_v33 }
 0x4bf   : > { %4820 = vmatpush1.bf16.msra.mxu0 %v9316_v35 }
 0x4c0   : > { %4884 = vmatpush1.bf16.msra.mxu1 %v9317_v40  ;;  %4822 = vmatprep.subr.bf16.mxu0 %v9318_v47 }
 0x4c1   : > { %v1546_v52 = vpop.f32.mrb[8].mxu0  ;;  %4886 = vmatprep.subr.bf16.mxu1 %v6701_v31 }
 0x4c2   : > { %v1617_v56 = vpop.f32.mrb[8].mxu1  ;;  %v1548_v2 = vpop.f32.mrb[9].mxu0 }
 0x4c3   : > { %v1818_v19 = vcombine.low %v1546_v52, %v1548_v2  ;;  %v1619_v20 = vpop.f32.mrb[9].mxu1  ;;  %4824 = vmatpush1.bf16.msra.mxu0 %v6722_v41  ;;  %v9320_v2 = vld [vmem:[#allocation38_spill] sm:$0xff]  ;;  %v9323_v52 = vld [vmem:[#allocation41_spill] sm:$0xff] }
 0x4c4   : > { %v1819_v9 = vcombine.low %v1617_v56, %v1619_v20  ;;  %4888 = vmatpush1.bf16.msra.mxu1 %v6726_v42  ;;  %4826 = vmatprep.subr.bf16.mxu0 %v6728_v43  ;;  %v9324_v56 = vld [vmem:[#allocation42_spill] sm:$0xff] }
 0x4c5   : > { %v1826_v35 = vrot.slane %v1818_v19, %v7861_v57  ;;  %4890 = vmatprep.subr.bf16.mxu1 %v6740_v53  ;;  %v9319_v19 = vld [vmem:[#allocation37_spill] sm:$0xff] }
 0x4c6   : > { %v1833_v47 = vrot.slane %v1819_v9, %v7861_v57  ;;  %v9325_v9 = vld [vmem:[#allocation43_spill] sm:$0xff] }
 0x4c7   : > { %4828 = vmatpush1.bf16.msra.mxu0 %v6758_v0 }
 0x4c8   : > { %v1834_v20 = vcombine.low %v1826_v35, %v1833_v47  ;;  %4892 = vmatpush1.bf16.msra.mxu1 %v6762_v1  ;;  %4830 = vmatprep.subr.bf16.mxu0 %v6764_v3  ;;  %v9321_v35 = vld [vmem:[#allocation39_spill] sm:$0xff]  ;;  %v9322_v47 = vld [vmem:[#allocation40_spill] sm:$0xff] }
 0x4c9   : > { %4894 = vmatprep.subr.bf16.mxu1 %v6776_v11 }
 0x4ca   : > { %1854 = vst [vmem:[%s8029_s7] sm:$0xff] %v1834_v20  ;;  %1858 = vst [vmem:[%s8029_s7 + $0x10] sm:$0xff] %v1834_v20  ;;  %v9326_v20 = vld [vmem:[#allocation44_spill] sm:$0xff] }
 0x4cb   : > { %4832 = vmatpush1.bf16.msra.mxu0 %v6794_v7 }
 0x4cc   : > { %4896 = vmatpush1.bf16.msra.mxu1 %v6798_v17  ;;  %4834 = vmatprep.subr.bf16.mxu0 %v6800_v27  ;;  %v9327_v17 = vld [vmem:[#allocation45_spill] sm:$0xff]  ;;  %v9328_v27 = vld [vmem:[#allocation46_spill] sm:$0xff] }
 0x4cd   : > { %4898 = vmatprep.subr.bf16.mxu1 %v6812_v37  ;;  %v9329_v37 = vld [vmem:[#allocation47_spill] sm:$0xff] }
 0x4cf   : > { %4836 = vmatpush1.bf16.msra.mxu0 %v9319_v19 }
 0x4d0   : > { %4900 = vmatpush1.bf16.msra.mxu1 %v9320_v2  ;;  %4838 = vmatprep.subr.bf16.mxu0 %v9321_v35  ;;  %v9330_v2 = vld [vmem:[#allocation49_spill] sm:$0xff]  ;;  %v9331_v35 = vld [vmem:[#allocation50_spill] sm:$0xff] }
 0x4d1   : > { %4902 = vmatprep.subr.bf16.mxu1 %v9322_v47  ;;  %v9332_v47 = vld [vmem:[#allocation51_spill] sm:$0xff] }
 0x4d3   : > { %4840 = vmatpush1.bf16.msra.mxu0 %v9323_v52  ;;  %v9333_v52 = vld [vmem:[#allocation52_spill] sm:$0xff] }
 0x4d4   : > { %4904 = vmatpush1.bf16.msra.mxu1 %v9324_v56  ;;  %4842 = vmatprep.subr.bf16.mxu0 %v9325_v9  ;;  %v9334_v56 = vld [vmem:[#allocation53_spill] sm:$0xff]  ;;  %v9335_v9 = vld [vmem:[#allocation54_spill] sm:$0xff] }
 0x4d5   : > { %4906 = vmatprep.subr.bf16.mxu1 %v9326_v20  ;;  %v9336_v20 = vld [vmem:[#allocation55_spill] sm:$0xff] }
 0x4d7   : > { %4844 = vmatpush1.bf16.msra.mxu0 %v9327_v17  ;;  %v9337_v17 = vld [vmem:[#allocation56_spill] sm:$0xff] }
 0x4d8   : > { %4908 = vmatpush1.bf16.msra.mxu1 %v9328_v27  ;;  %4846 = vmatprep.subr.bf16.mxu0 %v9329_v37  ;;  %v9338_v37 = vld [vmem:[#allocation57_spill] sm:$0xff] }
 0x4d9   : > { %4910 = vmatprep.subr.bf16.mxu1 %v9252_v63  ;;  %v9339_v63 = vld [vmem:[#allocation58_spill] sm:$0xff] }
 0x4db   : > { %4848 = vmatpush1.bf16.msra.mxu0 %v9330_v2  ;;  %v9340_v2 = vld [vmem:[#allocation59_spill] sm:$0xff] }
 0x4dc   : > { %4912 = vmatpush1.bf16.msra.mxu1 %v9331_v35  ;;  %4850 = vmatprep.subr.bf16.mxu0 %v9332_v47  ;;  %v9341_v35 = vld [vmem:[#allocation60_spill] sm:$0xff]  ;;  %v9342_v47 = vld [vmem:[#allocation61_spill] sm:$0xff] }
 0x4dd   : > { %4914 = vmatprep.subr.bf16.mxu1 %v9333_v52  ;;  %v9343_v52 = vld [vmem:[#allocation62_spill] sm:$0xff] }
 0x4df   : > { %4852 = vmatpush1.bf16.msra.mxu0 %v9334_v56  ;;  %v9344_v56 = vld [vmem:[#allocation63_spill] sm:$0xff] }
 0x4e0   : > { %4916 = vmatpush1.bf16.msra.mxu1 %v9335_v9  ;;  %4854 = vmatprep.subr.bf16.mxu0 %v9336_v20  ;;  %v9345_v9 = vld [vmem:[#allocation64_spill] sm:$0xff]  ;;  %v9346_v20 = vld [vmem:[#allocation65_spill] sm:$0xff] }
 0x4e1   : > { %4918 = vmatprep.subr.bf16.mxu1 %v9337_v17  ;;  %v9347_v17 = vld [vmem:[#allocation66_spill] sm:$0xff] }
 0x4e3   : > { %4856 = vmatpush1.bf16.msra.mxu0 %v9338_v37  ;;  %v8073_v37 = vpop.eup %6141 }
 0x4e4   : > { %4920 = vmatpush1.bf16.msra.mxu1 %v9339_v63  ;;  %4858 = vmatprep.subr.bf16.mxu0 %v9340_v2  ;;  %v9349_v63 = vld [vmem:[#allocation68_spill] sm:$0xff]  ;;  %v9360_v2 = vld [vmem:[#allocation85_spill] sm:$0xff] }
 0x4e5   : > { %4922 = vmatprep.subr.bf16.mxu1 %v9341_v35  ;;  %v9358_v35 = vld [vmem:[#allocation83_spill] sm:$0xff] }
 0x4e7   : > { %4860 = vmatpush1.bf16.msra.mxu0 %v9342_v47  ;;  %v9350_v47 = vld [vmem:[#allocation69_spill] sm:$0xff] }
 0x4e8   : > { %4924 = vmatpush1.bf16.msra.mxu1 %v9343_v52  ;;  %4862 = vmatprep.subr.bf16.mxu0 %v9344_v56  ;;  %v9351_v56 = vld [vmem:[#allocation70_spill] sm:$0xff] }
 0x4e9   : > { %4926 = vmatprep.subr.bf16.mxu1 %v9345_v9  ;;  %v9355_v9 = vld [vmem:[#allocation80_spill] sm:$0xff]  ;;  %v9357_v52 = vld [vmem:[#allocation82_spill] sm:$0xff] }
 0x4eb   : > { %4864 = vmatpush1.bf16.msra.mxu0 %v9346_v20  ;;  %v9352_v20 = vld [vmem:[#allocation77_spill] sm:$0xff] }
 0x4ec   : > { %4928 = vmatpush1.bf16.msra.mxu1 %v9347_v17  ;;  %4930 = vmatprep.subr.bf16.mxu0 %v9348_v46  ;;  %v9353_v17 = vld [vmem:[#allocation78_spill] sm:$0xff]  ;;  %v9354_v46 = vld [vmem:[#allocation79_spill] sm:$0xff] }
 0x4ed   : > { %4994 = vmatprep.subr.bf16.mxu1 %v9349_v63  ;;  %v9356_v63 = vld [vmem:[#allocation81_spill] sm:$0xff] }
 0x4ee   : > { %2209 = vmatmul.mubr.f32.vlgmr.msra.gmra.mrb[16].mxu0 %v8073_v37 }
 0x4ef   : > { %2280 = vmatmul.mubr.f32.vlgmr.msra.gmra.mrb[16].mxu1 %v8073_v37  ;;  %4932 = vmatpush1.bf16.msra.mxu0 %v9350_v47  ;;  %v9359_v47 = vld [vmem:[#allocation84_spill] sm:$0xff] }
 0x4f0   : > { %2350 = vmatprep.mubr.f32.mxu0 %v7993_v26  ;;  %4996 = vmatpush1.bf16.msra.mxu1 %v9351_v56  ;;  %v9361_v56 = vld [vmem:[#allocation86_spill] sm:$0xff] }
 0x4f1   : > { %2421 = vmatprep.mubr.f32.mxu1 %v7993_v26  ;;  %4934 = vmatprep.subr.bf16.mxu0 %v9352_v20  ;;  %v9362_v26 = vld [vmem:[#allocation87_spill] sm:$0xff]  ;;  %v9363_v20 = vld [vmem:[#allocation88_spill] sm:$0xff] }
 0x4f2   : > { %4998 = vmatprep.subr.bf16.mxu1 %v9353_v17  ;;  %v9364_v17 = vld [vmem:[#allocation89_spill] sm:$0xff] }
 0x4f3   : > { %4936 = vmatpush1.bf16.msra.mxu0 %v9354_v46  ;;  %v9365_v46 = vld [vmem:[#allocation90_spill] sm:$0xff] }
 0x4f4   : > { %5000 = vmatpush1.bf16.msra.mxu1 %v9355_v9  ;;  %4938 = vmatprep.subr.bf16.mxu0 %v9356_v63  ;;  %v9366_v9 = vld [vmem:[#allocation91_spill] sm:$0xff]  ;;  %v9367_v63 = vld [vmem:[#allocation92_spill] sm:$0xff] }
 0x4f5   : > { %5002 = vmatprep.subr.bf16.mxu1 %v9357_v52  ;;  %v9368_v52 = vld [vmem:[#allocation93_spill] sm:$0xff] }
 0x4f7   : > { %4940 = vmatpush1.bf16.msra.mxu0 %v9358_v35 }
 0x4f8   : > { %5004 = vmatpush1.bf16.msra.mxu1 %v9359_v47  ;;  %4942 = vmatprep.subr.bf16.mxu0 %v9360_v2  ;;  %v9369_v47 = vld [vmem:[#allocation94_spill] sm:$0xff] }
 0x4f9   : > { %5006 = vmatprep.subr.bf16.mxu1 %v9361_v56 }
 0x4fb   : > { %4944 = vmatpush1.bf16.msra.mxu0 %v9362_v26 }
 0x4fc   : > { %5008 = vmatpush1.bf16.msra.mxu1 %v9363_v20  ;;  %4946 = vmatprep.subr.bf16.mxu0 %v9364_v17 }
 0x4fd   : > { %5010 = vmatprep.subr.bf16.mxu1 %v9365_v46 }
 0x4ff   : > { %4948 = vmatpush1.bf16.msra.mxu0 %v9366_v9  ;;  %v9370_v9 = vld [vmem:[#allocation100_spill] sm:$0xff] }
 0x500   : > { %5012 = vmatpush1.bf16.msra.mxu1 %v9367_v63  ;;  %4950 = vmatprep.subr.bf16.mxu0 %v9368_v52 }
 0x501   : > { %v1688_v35 = vpop.f32.mrb[10].mxu0  ;;  %5014 = vmatprep.subr.bf16.mxu1 %v9369_v47 }
 0x502   : > { %v1759_v2 = vpop.f32.mrb[10].mxu1  ;;  %v1690_v56 = vpop.f32.mrb[11].mxu0 }
 0x503   : > { %v1835_v26 = vcombine.low %v1688_v35, %v1690_v56  ;;  %v1761_v27 = vpop.f32.mrb[11].mxu1  ;;  %4952 = vmatpush1.bf16.msra.mxu0 %v9287_v15  ;;  %v9371_v35 = vld [vmem:[#allocation101_spill] sm:$0xff]  ;;  %v9372_v56 = vld [vmem:[#allocation102_spill] sm:$0xff] }
 0x504   : > { %v1836_v17 = vcombine.low %v1759_v2, %v1761_v27  ;;  %5016 = vmatpush1.bf16.msra.mxu1 %v9288_v18  ;;  %4954 = vmatprep.subr.bf16.mxu0 %v9289_v28  ;;  %v9373_v27 = vld [vmem:[#allocation103_spill] sm:$0xff]  ;;  %v9374_v2 = vld [vmem:[#allocation104_spill] sm:$0xff] }
 0x505   : > { %v1843_v63 = vrot.slane %v1835_v26, %v7861_v57  ;;  %5018 = vmatprep.subr.bf16.mxu1 %v9290_v23  ;;  %v9379_v26 = vld [vmem:[#allocation73_spill] sm:$0xff] }
 0x506   : > { %v1850_v52 = vrot.slane %v1836_v17, %v7861_v57  ;;  %v9375_v17 = vld [vmem:[#allocation122_spill] sm:$0xff]  ;;  %6143 = vtanh.f32 %v9379_v26 }
 0x507   : > { %4956 = vmatpush1.bf16.msra.mxu0 %v9291_v5 }
 0x508   : > { %v1851_v47 = vcombine.low %v1843_v63, %v1850_v52  ;;  %5020 = vmatpush1.bf16.msra.mxu1 %v9370_v9  ;;  %4958 = vmatprep.subr.bf16.mxu0 %v9371_v35  ;;  %v9376_v63 = vld [vmem:[#allocation132_spill] sm:$0xff]  ;;  %v9378_v52 = vld [vmem:[#allocation9_spill] sm:$0xff] }
 0x509   : > { %5022 = vmatprep.subr.bf16.mxu1 %v9372_v56 }
 0x50a   : > { %1855 = vst [vmem:[%s8029_s7 + $0x8] sm:$0xff] %v1851_v47  ;;  %1859 = vst [vmem:[%s8029_s7 + $0x18] sm:$0xff] %v1851_v47  ;;  %v9377_v47 = vld [vmem:[#allocation8_spill] sm:$0xff] }
 0x50b   : > { %4960 = vmatpush1.bf16.msra.mxu0 %v9373_v27 }
 0x50c   : > { %5024 = vmatpush1.bf16.msra.mxu1 %v9374_v2  ;;  %4962 = vmatprep.subr.bf16.mxu0 %v9297_v55 }
 0x50d   : > { %5026 = vmatprep.subr.bf16.mxu1 %v9298_v30 }
 0x50f   : > { %4964 = vmatpush1.bf16.msra.mxu0 %v9299_v24 }
 0x510   : > { %5028 = vmatpush1.bf16.msra.mxu1 %v9300_v38  ;;  %4966 = vmatprep.subr.bf16.mxu0 %v9301_v51 }
 0x511   : > { %5030 = vmatprep.subr.bf16.mxu1 %v9302_v22 }
 0x513   : > { %4968 = vmatpush1.bf16.msra.mxu0 %v9303_v4 }
 0x514   : > { %5032 = vmatpush1.bf16.msra.mxu1 %v9304_v10  ;;  %4970 = vmatprep.subr.bf16.mxu0 %v9305_v59 }
 0x515   : > { %5034 = vmatprep.subr.bf16.mxu1 %v9306_v8 }
 0x517   : > { %4972 = vmatpush1.bf16.msra.mxu0 %v9307_v36 }
 0x518   : > { %5036 = vmatpush1.bf16.msra.mxu1 %v9229_v39  ;;  %4974 = vmatprep.subr.bf16.mxu0 %v9230_v49 }
 0x519   : > { %5038 = vmatprep.subr.bf16.mxu1 %v9231_v58 }
 0x51b   : > { %4976 = vmatpush1.bf16.msra.mxu0 %v9232_v12 }
 0x51c   : > { %5040 = vmatpush1.bf16.msra.mxu1 %v9233_v48  ;;  %4978 = vmatprep.subr.bf16.mxu0 %v9234_v25 }
 0x51d   : > { %5042 = vmatprep.subr.bf16.mxu1 %v9375_v17 }
 0x51f   : > { %4980 = vmatpush1.bf16.msra.mxu0 %v9236_v16 }
 0x520   : > { %5044 = vmatpush1.bf16.msra.mxu1 %v9237_v60  ;;  %4982 = vmatprep.subr.bf16.mxu0 %v9238_v45 }
 0x521   : > { %5046 = vmatprep.subr.bf16.mxu1 %v9239_v54 }
 0x523   : > { %4984 = vmatpush1.bf16.msra.mxu0 %v7621_v21 }
 0x524   : > { %5048 = vmatpush1.bf16.msra.mxu1 %v7623_v44  ;;  %4986 = vmatprep.subr.bf16.mxu0 %v7633_v32 }
 0x525   : > { %5050 = vmatprep.subr.bf16.mxu1 %v7635_v50  ;;  %v9391_v50 = vld [vmem:[#allocation21_spill] sm:$0xff] }
 0x527   : > { %4988 = vmatpush1.bf16.msra.mxu0 %v7657_v62  ;;  %v9389_v62 = vld [vmem:[#allocation19_spill] sm:$0xff] }
 0x528   : > { %5052 = vmatpush1.bf16.msra.mxu1 %v9308_v34  ;;  %4990 = vmatprep.subr.bf16.mxu0 %v7667_v61  ;;  %v9380_v34 = vld [vmem:[#allocation10_spill] sm:$0xff]  ;;  %v9386_v61 = vld [vmem:[#allocation16_spill] sm:$0xff] }
 0x529   : > { %5054 = vmatprep.subr.bf16.mxu1 %v7669_v13  ;;  %v9381_v13 = vld [vmem:[#allocation11_spill] sm:$0xff] }
 0x52b   : > { %4992 = vmatpush1.bf16.msra.mxu0 %v9376_v63  ;;  %v9382_v63 = vld [vmem:[#allocation12_spill] sm:$0xff] }
 0x52c   : > { %5056 = vmatpush1.bf16.msra.mxu1 %v7684_v6  ;;  %5058 = vmatprep.subr.bf16.mxu0 %v6512_v14  ;;  %v9383_v6 = vld [vmem:[#allocation13_spill] sm:$0xff]  ;;  %v9384_v14 = vld [vmem:[#allocation14_spill] sm:$0xff] }
 0x52d   : > { %5122 = vmatprep.subr.bf16.mxu1 %v9377_v47  ;;  %v9385_v47 = vld [vmem:[#allocation15_spill] sm:$0xff] }
 0x52e   : > { %2351 = vmatmul.mubr.f32.vlgmr.msra.gmra.mrb[18].mxu0 %v8073_v37 }
 0x52f   : > { %2422 = vmatmul.mubr.f32.vlgmr.msra.gmra.mrb[18].mxu1 %v8073_v37  ;;  %5060 = vmatpush1.bf16.msra.mxu0 %v9378_v52  ;;  %v9387_v37 = vld [vmem:[#allocation17_spill] sm:$0xff]  ;;  %v9388_v52 = vld [vmem:[#allocation18_spill] sm:$0xff] }
 0x530   : > { %2588 = vmatprep.mubr.f32.mxu0 %v9379_v26  ;;  %5124 = vmatpush1.bf16.msra.mxu1 %v9380_v34  ;;  %v9390_v34 = vld [vmem:[#allocation20_spill] sm:$0xff] }
 0x531   : > { %2659 = vmatprep.mubr.f32.mxu1 %v9379_v26  ;;  %5062 = vmatprep.subr.bf16.mxu0 %v9381_v13  ;;  %v9392_v13 = vld [vmem:[#allocation22_spill] sm:$0xff] }
 0x532   : > { %5126 = vmatprep.subr.bf16.mxu1 %v9382_v63 }
 0x533   : > { %5064 = vmatpush1.bf16.msra.mxu0 %v9383_v6 }
 0x534   : > { %5128 = vmatpush1.bf16.msra.mxu1 %v9384_v14  ;;  %5066 = vmatprep.subr.bf16.mxu0 %v9385_v47  ;;  %v9393_v14 = vld [vmem:[#allocation25_spill] sm:$0xff] }
 0x535   : > { %5130 = vmatprep.subr.bf16.mxu1 %v9386_v61  ;;  %v9394_v61 = vld [vmem:[#allocation27_spill] sm:$0xff] }
 0x537   : > { %5068 = vmatpush1.bf16.msra.mxu0 %v9387_v37 }
 0x538   : > { %5132 = vmatpush1.bf16.msra.mxu1 %v9388_v52  ;;  %5070 = vmatprep.subr.bf16.mxu0 %v9389_v62 }
 0x539   : > { %5134 = vmatprep.subr.bf16.mxu1 %v9390_v34 }
 0x53b   : > { %5072 = vmatpush1.bf16.msra.mxu0 %v9391_v50 }
 0x53c   : > { %5136 = vmatpush1.bf16.msra.mxu1 %v9392_v13  ;;  %5074 = vmatprep.subr.bf16.mxu0 %v9314_v29 }
 0x53d   : > { %5138 = vmatprep.subr.bf16.mxu1 %v9315_v33 }
 0x53f   : > { %5076 = vmatpush1.bf16.msra.mxu0 %v9393_v14 }
 0x540   : > { %5140 = vmatpush1.bf16.msra.mxu1 %v9317_v40  ;;  %5078 = vmatprep.subr.bf16.mxu0 %v9394_v61 }
 0x541   : > { %v1926_v37 = vpop.f32.mrb[12].mxu0  ;;  %5142 = vmatprep.subr.bf16.mxu1 %v6701_v31 }
 0x542   : > { %v1997_v62 = vpop.f32.mrb[12].mxu1  ;;  %v1928_v34 = vpop.f32.mrb[13].mxu0 }
 0x543   : > { %v2436_v50 = vcombine.low %v1926_v37, %v1928_v34  ;;  %v1999_v52 = vpop.f32.mrb[13].mxu1  ;;  %5080 = vmatpush1.bf16.msra.mxu0 %v6722_v41  ;;  %v9395_v34 = vld [vmem:[#allocation34_spill] sm:$0xff] }
 0x544   : > { %v2437_v29 = vcombine.low %v1997_v62, %v1999_v52  ;;  %5144 = vmatpush1.bf16.msra.mxu1 %v6726_v42  ;;  %5082 = vmatprep.subr.bf16.mxu0 %v6728_v43  ;;  %v9397_v62 = vld [vmem:[#allocation36_spill] sm:$0xff]  ;;  %v9401_v52 = vld [vmem:[#allocation41_spill] sm:$0xff]  ;;  %v9402_v37 = vld [vmem:[#allocation42_spill] sm:$0xff] }
 0x545   : > { %v2444_v40 = vrot.slane %v2436_v50, %v7861_v57  ;;  %5146 = vmatprep.subr.bf16.mxu1 %v6740_v53  ;;  %v9396_v50 = vld [vmem:[#allocation35_spill] sm:$0xff] }
 0x546   : > { %v2451_v61 = vrot.slane %v2437_v29, %v7861_v57  ;;  %v9398_v29 = vld [vmem:[#allocation38_spill] sm:$0xff] }
 0x547   : > { %5084 = vmatpush1.bf16.msra.mxu0 %v6758_v0 }
 0x548   : > { %v2452_v31 = vcombine.low %v2444_v40, %v2451_v61  ;;  %5148 = vmatpush1.bf16.msra.mxu1 %v6762_v1  ;;  %5086 = vmatprep.subr.bf16.mxu0 %v6764_v3  ;;  %v9399_v40 = vld [vmem:[#allocation39_spill] sm:$0xff]  ;;  %v9400_v61 = vld [vmem:[#allocation40_spill] sm:$0xff] }
 0x549   : > { %5150 = vmatprep.subr.bf16.mxu1 %v6776_v11  ;;  %v9442_v11 = vld [vmem:[#allocation87_spill] sm:$0xff] }
 0x54a   : > { %2472 = vst [vmem:[%s7875_s27 + $0x20] sm:$0xff] %v2452_v31  ;;  %2520 = vst [vmem:[%s7875_s27 + $0x30] sm:$0xff] %v2452_v31  ;;  %v9403_v31 = vld [vmem:[#allocation43_spill] sm:$0xff] }
 0x54b   : > { %5088 = vmatpush1.bf16.msra.mxu0 %v6794_v7  ;;  %v9404_v7 = vld [vmem:[#allocation44_spill] sm:$0xff] }
 0x54c   : > { %5152 = vmatpush1.bf16.msra.mxu1 %v9395_v34  ;;  %5090 = vmatprep.subr.bf16.mxu0 %v9396_v50  ;;  %v9405_v34 = vld [vmem:[#allocation45_spill] sm:$0xff]  ;;  %v9406_v50 = vld [vmem:[#allocation46_spill] sm:$0xff] }
 0x54d   : > { %5154 = vmatprep.subr.bf16.mxu1 %v9397_v62  ;;  %v9407_v62 = vld [vmem:[#allocation47_spill] sm:$0xff] }
 0x54f   : > { %5092 = vmatpush1.bf16.msra.mxu0 %v9319_v19  ;;  %v9408_v19 = vld [vmem:[#allocation48_spill] sm:$0xff] }
 0x550   : > { %5156 = vmatpush1.bf16.msra.mxu1 %v9398_v29  ;;  %5094 = vmatprep.subr.bf16.mxu0 %v9399_v40  ;;  %v9409_v29 = vld [vmem:[#allocation49_spill] sm:$0xff]  ;;  %v9410_v40 = vld [vmem:[#allocation50_spill] sm:$0xff] }
 0x551   : > { %5158 = vmatprep.subr.bf16.mxu1 %v9400_v61  ;;  %v9411_v61 = vld [vmem:[#allocation51_spill] sm:$0xff] }
 0x553   : > { %5096 = vmatpush1.bf16.msra.mxu0 %v9401_v52  ;;  %v9412_v52 = vld [vmem:[#allocation52_spill] sm:$0xff] }
 0x554   : > { %5160 = vmatpush1.bf16.msra.mxu1 %v9402_v37  ;;  %5098 = vmatprep.subr.bf16.mxu0 %v9403_v31  ;;  %v9413_v37 = vld [vmem:[#allocation53_spill] sm:$0xff]  ;;  %v9414_v31 = vld [vmem:[#allocation54_spill] sm:$0xff] }
 0x555   : > { %5162 = vmatprep.subr.bf16.mxu1 %v9404_v7  ;;  %v9415_v7 = vld [vmem:[#allocation55_spill] sm:$0xff] }
 0x557   : > { %5100 = vmatpush1.bf16.msra.mxu0 %v9405_v34  ;;  %v9416_v34 = vld [vmem:[#allocation56_spill] sm:$0xff] }
 0x558   : > { %5164 = vmatpush1.bf16.msra.mxu1 %v9406_v50  ;;  %5102 = vmatprep.subr.bf16.mxu0 %v9407_v62  ;;  %v9417_v50 = vld [vmem:[#allocation57_spill] sm:$0xff]  ;;  %v9418_v62 = vld [vmem:[#allocation58_spill] sm:$0xff] }
 0x559   : > { %5166 = vmatprep.subr.bf16.mxu1 %v9408_v19  ;;  %v9419_v19 = vld [vmem:[#allocation59_spill] sm:$0xff] }
 0x55b   : > { %5104 = vmatpush1.bf16.msra.mxu0 %v9409_v29  ;;  %v9420_v29 = vld [vmem:[#allocation60_spill] sm:$0xff] }
 0x55c   : > { %5168 = vmatpush1.bf16.msra.mxu1 %v9410_v40  ;;  %5106 = vmatprep.subr.bf16.mxu0 %v9411_v61  ;;  %v9421_v40 = vld [vmem:[#allocation61_spill] sm:$0xff]  ;;  %v9422_v61 = vld [vmem:[#allocation62_spill] sm:$0xff] }
 0x55d   : > { %5170 = vmatprep.subr.bf16.mxu1 %v9412_v52  ;;  %v9423_v52 = vld [vmem:[#allocation63_spill] sm:$0xff] }
 0x55f   : > { %5108 = vmatpush1.bf16.msra.mxu0 %v9413_v37  ;;  %v9424_v37 = vld [vmem:[#allocation64_spill] sm:$0xff] }
 0x560   : > { %5172 = vmatpush1.bf16.msra.mxu1 %v9414_v31  ;;  %5110 = vmatprep.subr.bf16.mxu0 %v9415_v7  ;;  %v9425_v31 = vld [vmem:[#allocation65_spill] sm:$0xff]  ;;  %v9426_v7 = vld [vmem:[#allocation66_spill] sm:$0xff] }
 0x561   : > { %5174 = vmatprep.subr.bf16.mxu1 %v9416_v34  ;;  %v9427_v34 = vld [vmem:[#allocation67_spill] sm:$0xff] }
 0x563   : > { %5112 = vmatpush1.bf16.msra.mxu0 %v9417_v50  ;;  %v9428_v50 = vld [vmem:[#allocation68_spill] sm:$0xff] }
 0x564   : > { %5176 = vmatpush1.bf16.msra.mxu1 %v9418_v62  ;;  %5114 = vmatprep.subr.bf16.mxu0 %v9419_v19  ;;  %v9429_v62 = vld [vmem:[#allocation74_spill] sm:$0xff]  ;;  %v9440_v19 = vld [vmem:[#allocation85_spill] sm:$0xff] }
 0x565   : > { %5178 = vmatprep.subr.bf16.mxu1 %v9420_v29  ;;  %v9430_v29 = vld [vmem:[#allocation69_spill] sm:$0xff]  ;;  %6145 = vtanh.f32 %v9429_v62 }
 0x567   : > { %5116 = vmatpush1.bf16.msra.mxu0 %v9421_v40  ;;  %v9438_v40 = vld [vmem:[#allocation83_spill] sm:$0xff] }
 0x568   : > { %5180 = vmatpush1.bf16.msra.mxu1 %v9422_v61  ;;  %5118 = vmatprep.subr.bf16.mxu0 %v9423_v52  ;;  %v9431_v61 = vld [vmem:[#allocation70_spill] sm:$0xff] }
 0x569   : > { %5182 = vmatprep.subr.bf16.mxu1 %v9424_v37  ;;  %v9432_v37 = vld [vmem:[#allocation77_spill] sm:$0xff]  ;;  %v9437_v52 = vld [vmem:[#allocation82_spill] sm:$0xff] }
 0x56b   : > { %5120 = vmatpush1.bf16.msra.mxu0 %v9425_v31  ;;  %v9433_v31 = vld [vmem:[#allocation78_spill] sm:$0xff] }
 0x56c   : > { %5184 = vmatpush1.bf16.msra.mxu1 %v9426_v7  ;;  %5186 = vmatprep.subr.bf16.mxu0 %v9427_v34  ;;  %v9434_v7 = vld [vmem:[#allocation79_spill] sm:$0xff]  ;;  %v9435_v34 = vld [vmem:[#allocation80_spill] sm:$0xff] }
 0x56d   : > { %5250 = vmatprep.subr.bf16.mxu1 %v9428_v50  ;;  %v9436_v50 = vld [vmem:[#allocation81_spill] sm:$0xff] }
 0x56e   : > { %2589 = vmatmul.mubr.f32.vlgmr.msra.gmra.mrb[20].mxu0 %v9429_v62 }
 0x56f   : > { %2660 = vmatmul.mubr.f32.vlgmr.msra.gmra.mrb[20].mxu1 %v9429_v62  ;;  %5188 = vmatpush1.bf16.msra.mxu0 %v9430_v29  ;;  %v9439_v29 = vld [vmem:[#allocation84_spill] sm:$0xff] }
 0x570   : > { %2730 = vmatprep.mubr.f32.mxu0 %v9379_v26  ;;  %5252 = vmatpush1.bf16.msra.mxu1 %v9431_v61  ;;  %v9441_v61 = vld [vmem:[#allocation86_spill] sm:$0xff] }
 0x571   : > { %2801 = vmatprep.mubr.f32.mxu1 %v9379_v26  ;;  %5190 = vmatprep.subr.bf16.mxu0 %v9432_v37  ;;  %v8294_v26 = vpop.eup %6143 }
 0x572   : > { %5254 = vmatprep.subr.bf16.mxu1 %v9433_v31  ;;  %v9443_v31 = vld [vmem:[#allocation89_spill] sm:$0xff] }
 0x573   : > { %5192 = vmatpush1.bf16.msra.mxu0 %v9434_v7 }
 0x574   : > { %5256 = vmatpush1.bf16.msra.mxu1 %v9435_v34  ;;  %5194 = vmatprep.subr.bf16.mxu0 %v9436_v50  ;;  %v9444_v34 = vld [vmem:[#allocation91_spill] sm:$0xff]  ;;  %v9445_v50 = vld [vmem:[#allocation92_spill] sm:$0xff] }
 0x575   : > { %5258 = vmatprep.subr.bf16.mxu1 %v9437_v52  ;;  %v9446_v52 = vld [vmem:[#allocation93_spill] sm:$0xff] }
 0x577   : > { %5196 = vmatpush1.bf16.msra.mxu0 %v9438_v40 }
 0x578   : > { %5260 = vmatpush1.bf16.msra.mxu1 %v9439_v29  ;;  %5198 = vmatprep.subr.bf16.mxu0 %v9440_v19  ;;  %v9447_v29 = vld [vmem:[#allocation94_spill] sm:$0xff] }
 0x579   : > { %5262 = vmatprep.subr.bf16.mxu1 %v9441_v61 }
 0x57b   : > { %5200 = vmatpush1.bf16.msra.mxu0 %v9442_v11 }
 0x57c   : > { %5264 = vmatpush1.bf16.msra.mxu1 %v9363_v20  ;;  %5202 = vmatprep.subr.bf16.mxu0 %v9443_v31 }
 0x57d   : > { %5266 = vmatprep.subr.bf16.mxu1 %v9365_v46 }
 0x57f   : > { %5204 = vmatpush1.bf16.msra.mxu0 %v9444_v34 }
 0x580   : > { %5268 = vmatpush1.bf16.msra.mxu1 %v9445_v50  ;;  %5206 = vmatprep.subr.bf16.mxu0 %v9446_v52 }
 0x581   : > { %v2068_v40 = vpop.f32.mrb[14].mxu0  ;;  %5270 = vmatprep.subr.bf16.mxu1 %v9447_v29 }
 0x582   : > { %v2139_v19 = vpop.f32.mrb[14].mxu1  ;;  %v2070_v61 = vpop.f32.mrb[15].mxu0 }
 0x583   : > { %v2453_v11 = vcombine.low %v2068_v40, %v2070_v61  ;;  %v2141_v7 = vpop.f32.mrb[15].mxu1  ;;  %5208 = vmatpush1.bf16.msra.mxu0 %v9287_v15  ;;  %v9453_v40 = vld [vmem:[#allocation132_spill] sm:$0xff]  ;;  %v9454_v61 = vld [vmem:[#allocation133_spill] sm:$0xff] }
 0x584   : > { %v2454_v31 = vcombine.low %v2139_v19, %v2141_v7  ;;  %5272 = vmatpush1.bf16.msra.mxu1 %v9288_v18  ;;  %5210 = vmatprep.subr.bf16.mxu0 %v9289_v28  ;;  %v9449_v7 = vld [vmem:[#allocation128_spill] sm:$0xff]  ;;  %v9450_v19 = vld [vmem:[#allocation129_spill] sm:$0xff] }
 0x585   : > { %v2461_v50 = vrot.slane %v2453_v11, %v7861_v57  ;;  %5274 = vmatprep.subr.bf16.mxu1 %v9290_v23  ;;  %v9448_v11 = vld [vmem:[#allocation127_spill] sm:$0xff] }
 0x586   : > { %v2468_v52 = vrot.slane %v2454_v31, %v7861_v57  ;;  %v9456_v31 = vld [vmem:[#allocation8_spill] sm:$0xff] }
 0x587   : > { %5212 = vmatpush1.bf16.msra.mxu0 %v9291_v5 }
 0x588   : > { %v2469_v29 = vcombine.low %v2461_v50, %v2468_v52  ;;  %5276 = vmatpush1.bf16.msra.mxu1 %v9370_v9  ;;  %5214 = vmatprep.subr.bf16.mxu0 %v9371_v35  ;;  %v9451_v50 = vld [vmem:[#allocation130_spill] sm:$0xff]  ;;  %v9455_v52 = vld [vmem:[#allocation7_spill] sm:$0xff] }
 0x589   : > { %5278 = vmatprep.subr.bf16.mxu1 %v9372_v56 }
 0x58a   : > { %2473 = vst [vmem:[%s7875_s27 + $0x28] sm:$0xff] %v2469_v29  ;;  %2521 = vst [vmem:[%s7875_s27 + $0x38] sm:$0xff] %v2469_v29  ;;  %v9452_v29 = vld [vmem:[#allocation131_spill] sm:$0xff] }
 0x58b   : > { %5216 = vmatpush1.bf16.msra.mxu0 %v9373_v27 }
 0x58c   : > { %5280 = vmatpush1.bf16.msra.mxu1 %v9374_v2  ;;  %5218 = vmatprep.subr.bf16.mxu0 %v9297_v55 }
 0x58d   : > { %5282 = vmatprep.subr.bf16.mxu1 %v9298_v30 }
 0x58f   : > { %5220 = vmatpush1.bf16.msra.mxu0 %v9299_v24 }
 0x590   : > { %5284 = vmatpush1.bf16.msra.mxu1 %v9300_v38  ;;  %5222 = vmatprep.subr.bf16.mxu0 %v9301_v51 }
 0x591   : > { %5286 = vmatprep.subr.bf16.mxu1 %v9302_v22 }
 0x593   : > { %5224 = vmatpush1.bf16.msra.mxu0 %v9303_v4 }
 0x594   : > { %5288 = vmatpush1.bf16.msra.mxu1 %v9304_v10  ;;  %5226 = vmatprep.subr.bf16.mxu0 %v9305_v59 }
 0x595   : > { %5290 = vmatprep.subr.bf16.mxu1 %v9306_v8 }
 0x597   : > { %5228 = vmatpush1.bf16.msra.mxu0 %v9307_v36 }
 0x598   : > { %5292 = vmatpush1.bf16.msra.mxu1 %v9229_v39  ;;  %5230 = vmatprep.subr.bf16.mxu0 %v9230_v49 }
 0x599   : > { %5294 = vmatprep.subr.bf16.mxu1 %v9231_v58 }
 0x59b   : > { %5232 = vmatpush1.bf16.msra.mxu0 %v9232_v12 }
 0x59c   : > { %5296 = vmatpush1.bf16.msra.mxu1 %v9233_v48  ;;  %5234 = vmatprep.subr.bf16.mxu0 %v9234_v25 }
 0x59d   : > { %5298 = vmatprep.subr.bf16.mxu1 %v9375_v17 }
 0x59f   : > { %5236 = vmatpush1.bf16.msra.mxu0 %v9236_v16 }
 0x5a0   : > { %5300 = vmatpush1.bf16.msra.mxu1 %v9237_v60  ;;  %5238 = vmatprep.subr.bf16.mxu0 %v9238_v45 }
 0x5a1   : > { %5302 = vmatprep.subr.bf16.mxu1 %v9239_v54 }
 0x5a3   : > { %5240 = vmatpush1.bf16.msra.mxu0 %v7621_v21 }
 0x5a4   : > { %5304 = vmatpush1.bf16.msra.mxu1 %v7623_v44  ;;  %5242 = vmatprep.subr.bf16.mxu0 %v7633_v32 }
 0x5a5   : > { %5306 = vmatprep.subr.bf16.mxu1 %v9448_v11 }
 0x5a7   : > { %5244 = vmatpush1.bf16.msra.mxu0 %v9449_v7  ;;  %v9457_v7 = vld [vmem:[#allocation9_spill] sm:$0xff] }
 0x5a8   : > { %5308 = vmatpush1.bf16.msra.mxu1 %v9450_v19  ;;  %5246 = vmatprep.subr.bf16.mxu0 %v9451_v50  ;;  %v9458_v50 = vld [vmem:[#allocation10_spill] sm:$0xff]  ;;  %v9466_v19 = vld [vmem:[#allocation21_spill] sm:$0xff] }
 0x5a9   : > { %5310 = vmatprep.subr.bf16.mxu1 %v9452_v29  ;;  %v9464_v29 = vld [vmem:[#allocation19_spill] sm:$0xff] }
 0x5ab   : > { %5248 = vmatpush1.bf16.msra.mxu0 %v9453_v40  ;;  %v9459_v40 = vld [vmem:[#allocation11_spill] sm:$0xff] }
 0x5ac   : > { %5312 = vmatpush1.bf16.msra.mxu1 %v9454_v61  ;;  %5314 = vmatprep.subr.bf16.mxu0 %v9455_v52  ;;  %v9461_v52 = vld [vmem:[#allocation16_spill] sm:$0xff]  ;;  %v9462_v61 = vld [vmem:[#allocation17_spill] sm:$0xff] }
 0x5ad   : > { %5378 = vmatprep.subr.bf16.mxu1 %v9456_v31  ;;  %v9460_v31 = vld [vmem:[#allocation14_spill] sm:$0xff] }
 0x5ae   : > { %2731 = vmatmul.mubr.f32.vlgmr.msra.gmra.mrb[22].mxu0 %v9429_v62 }
 0x5af   : > { %2802 = vmatmul.mubr.f32.vlgmr.msra.gmra.mrb[22].mxu1 %v9429_v62  ;;  %5316 = vmatpush1.bf16.msra.mxu0 %v9457_v7  ;;  %v9463_v7 = vld [vmem:[#allocation18_spill] sm:$0xff]  ;;  %v9506_v62 = vld [vmem:[#allocation67_spill] sm:$0xff] }
 0x5b0   : > { %2872 = vmatprep.mubr.f32.mxu0 %v8294_v26  ;;  %5380 = vmatpush1.bf16.msra.mxu1 %v9458_v50  ;;  %v9465_v50 = vld [vmem:[#allocation20_spill] sm:$0xff] }
 0x5b1   : > { %2943 = vmatprep.mubr.f32.mxu1 %v8294_v26  ;;  %5318 = vmatprep.subr.bf16.mxu0 %v9459_v40 }
 0x5b2   : > { %5382 = vmatprep.subr.bf16.mxu1 %v9382_v63  ;;  %v9467_v63 = vld [vmem:[#allocation23_spill] sm:$0xff] }
 0x5b3   : > { %5320 = vmatpush1.bf16.msra.mxu0 %v9383_v6 }
 0x5b4   : > { %5384 = vmatpush1.bf16.msra.mxu1 %v9460_v31  ;;  %5322 = vmatprep.subr.bf16.mxu0 %v9385_v47  ;;  %v9468_v47 = vld [vmem:[#allocation26_spill] sm:$0xff] }
 0x5b5   : > { %5386 = vmatprep.subr.bf16.mxu1 %v9461_v52  ;;  %v9469_v52 = vld [vmem:[#allocation27_spill] sm:$0xff] }
 0x5b7   : > { %5324 = vmatpush1.bf16.msra.mxu0 %v9462_v61 }
 0x5b8   : > { %5388 = vmatpush1.bf16.msra.mxu1 %v9463_v7  ;;  %5326 = vmatprep.subr.bf16.mxu0 %v9464_v29  ;;  %v9470_v7 = vld [vmem:[#allocation28_spill] sm:$0xff] }
 0x5b9   : > { %5390 = vmatprep.subr.bf16.mxu1 %v9465_v50 }
 0x5bb   : > { %5328 = vmatpush1.bf16.msra.mxu0 %v9466_v19 }
 0x5bc   : > { %5392 = vmatpush1.bf16.msra.mxu1 %v9392_v13  ;;  %5330 = vmatprep.subr.bf16.mxu0 %v9467_v63 }
 0x5bd   : > { %5394 = vmatprep.subr.bf16.mxu1 %v9315_v33 }
 0x5bf   : > { %5332 = vmatpush1.bf16.msra.mxu0 %v9393_v14 }
 0x5c0   : > { %5396 = vmatpush1.bf16.msra.mxu1 %v9468_v47  ;;  %5334 = vmatprep.subr.bf16.mxu0 %v9469_v52 }
 0x5c1   : > { %v2210_v61 = vpop.f32.mrb[16].mxu0  ;;  %5398 = vmatprep.subr.bf16.mxu1 %v9470_v7 }
 0x5c2   : > { %v2281_v29 = vpop.f32.mrb[16].mxu1  ;;  %v2212_v50 = vpop.f32.mrb[17].mxu0 }
 0x5c3   : > { %v2482_v19 = vcombine.low %v2210_v61, %v2212_v50  ;;  %v2283_v31 = vpop.f32.mrb[17].mxu1  ;;  %5336 = vmatpush1.bf16.msra.mxu0 %v6722_v41  ;;  %v9471_v50 = vld [vmem:[#allocation32_spill] sm:$0xff]  ;;  %v9473_v61 = vld [vmem:[#allocation34_spill] sm:$0xff] }
 0x5c4   : > { %v2483_v63 = vcombine.low %v2281_v29, %v2283_v31  ;;  %5400 = vmatpush1.bf16.msra.mxu1 %v6726_v42  ;;  %5338 = vmatprep.subr.bf16.mxu0 %v6728_v43  ;;  %v9472_v29 = vld [vmem:[#allocation33_spill] sm:$0xff]  ;;  %v9475_v31 = vld [vmem:[#allocation36_spill] sm:$0xff] }
 0x5c5   : > { %v2490_v47 = vrot.slane %v2482_v19, %v7861_v57  ;;  %5402 = vmatprep.subr.bf16.mxu1 %v6740_v53  ;;  %v9474_v19 = vld [vmem:[#allocation35_spill] sm:$0xff] }
 0x5c6   : > { %v2497_v52 = vrot.slane %v2483_v63, %v7861_v57  ;;  %v9476_v63 = vld [vmem:[#allocation37_spill] sm:$0xff] }
 0x5c7   : > { %5340 = vmatpush1.bf16.msra.mxu0 %v6758_v0  ;;  %v9477_v0 = vld [vmem:[#allocation38_spill] sm:$0xff] }
 0x5c8   : > { %v2498_v7 = vcombine.low %v2490_v47, %v2497_v52  ;;  %5404 = vmatpush1.bf16.msra.mxu1 %v6762_v1  ;;  %5342 = vmatprep.subr.bf16.mxu0 %v6764_v3  ;;  %v9478_v47 = vld [vmem:[#allocation39_spill] sm:$0xff]  ;;  %v9479_v52 = vld [vmem:[#allocation40_spill] sm:$0xff]  ;;  %v9480_v3 = vld [vmem:[#allocation41_spill] sm:$0xff] }
 0x5c9   : > { %5406 = vmatprep.subr.bf16.mxu1 %v9471_v50  ;;  %v9481_v50 = vld [vmem:[#allocation42_spill] sm:$0xff] }
 0x5ca   : > { %2518 = vst [vmem:[%s8029_s7 + $0x20] sm:$0xff] %v2498_v7  ;;  %2522 = vst [vmem:[%s8029_s7 + $0x30] sm:$0xff] %v2498_v7  ;;  %v9482_v7 = vld [vmem:[#allocation43_spill] sm:$0xff] }
 0x5cb   : > { %5344 = vmatpush1.bf16.msra.mxu0 %v9472_v29  ;;  %v9483_v29 = vld [vmem:[#allocation44_spill] sm:$0xff] }
 0x5cc   : > { %5408 = vmatpush1.bf16.msra.mxu1 %v9473_v61  ;;  %5346 = vmatprep.subr.bf16.mxu0 %v9474_v19  ;;  %v9484_v61 = vld [vmem:[#allocation45_spill] sm:$0xff]  ;;  %v9485_v19 = vld [vmem:[#allocation46_spill] sm:$0xff] }
 0x5cd   : > { %5410 = vmatprep.subr.bf16.mxu1 %v9475_v31  ;;  %v9486_v31 = vld [vmem:[#allocation47_spill] sm:$0xff] }
 0x5cf   : > { %5348 = vmatpush1.bf16.msra.mxu0 %v9476_v63  ;;  %v9487_v63 = vld [vmem:[#allocation48_spill] sm:$0xff] }
 0x5d0   : > { %5412 = vmatpush1.bf16.msra.mxu1 %v9477_v0  ;;  %5350 = vmatprep.subr.bf16.mxu0 %v9478_v47  ;;  %v9488_v0 = vld [vmem:[#allocation49_spill] sm:$0xff]  ;;  %v9489_v47 = vld [vmem:[#allocation50_spill] sm:$0xff] }
 0x5d1   : > { %5414 = vmatprep.subr.bf16.mxu1 %v9479_v52  ;;  %v9490_v52 = vld [vmem:[#allocation51_spill] sm:$0xff] }
 0x5d3   : > { %5352 = vmatpush1.bf16.msra.mxu0 %v9480_v3  ;;  %v9491_v3 = vld [vmem:[#allocation52_spill] sm:$0xff] }
 0x5d4   : > { %5416 = vmatpush1.bf16.msra.mxu1 %v9481_v50  ;;  %5354 = vmatprep.subr.bf16.mxu0 %v9482_v7  ;;  %v9492_v50 = vld [vmem:[#allocation53_spill] sm:$0xff]  ;;  %v9493_v7 = vld [vmem:[#allocation54_spill] sm:$0xff] }
 0x5d5   : > { %5418 = vmatprep.subr.bf16.mxu1 %v9483_v29  ;;  %v9494_v29 = vld [vmem:[#allocation55_spill] sm:$0xff] }
 0x5d7   : > { %5356 = vmatpush1.bf16.msra.mxu0 %v9484_v61  ;;  %v9495_v61 = vld [vmem:[#allocation56_spill] sm:$0xff] }
 0x5d8   : > { %5420 = vmatpush1.bf16.msra.mxu1 %v9485_v19  ;;  %5358 = vmatprep.subr.bf16.mxu0 %v9486_v31  ;;  %v9496_v31 = vld [vmem:[#allocation57_spill] sm:$0xff] }
 0x5d9   : > { %5422 = vmatprep.subr.bf16.mxu1 %v9487_v63  ;;  %v9497_v63 = vld [vmem:[#allocation58_spill] sm:$0xff] }
 0x5db   : > { %5360 = vmatpush1.bf16.msra.mxu0 %v9488_v0  ;;  %v9498_v0 = vld [vmem:[#allocation59_spill] sm:$0xff] }
 0x5dc   : > { %5424 = vmatpush1.bf16.msra.mxu1 %v9489_v47  ;;  %5362 = vmatprep.subr.bf16.mxu0 %v9490_v52  ;;  %v9499_v47 = vld [vmem:[#allocation60_spill] sm:$0xff]  ;;  %v9500_v52 = vld [vmem:[#allocation61_spill] sm:$0xff] }
 0x5dd   : > { %5426 = vmatprep.subr.bf16.mxu1 %v9491_v3  ;;  %v9501_v3 = vld [vmem:[#allocation62_spill] sm:$0xff] }
 0x5df   : > { %5364 = vmatpush1.bf16.msra.mxu0 %v9492_v50  ;;  %v9502_v50 = vld [vmem:[#allocation63_spill] sm:$0xff] }
 0x5e0   : > { %5428 = vmatpush1.bf16.msra.mxu1 %v9493_v7  ;;  %5366 = vmatprep.subr.bf16.mxu0 %v9494_v29  ;;  %v9503_v7 = vld [vmem:[#allocation64_spill] sm:$0xff]  ;;  %v9504_v29 = vld [vmem:[#allocation65_spill] sm:$0xff] }
 0x5e1   : > { %5430 = vmatprep.subr.bf16.mxu1 %v9495_v61  ;;  %v9505_v61 = vld [vmem:[#allocation66_spill] sm:$0xff] }
 0x5e3   : > { %5368 = vmatpush1.bf16.msra.mxu0 %v9496_v31  ;;  %v8367_v31 = vpop.eup %6145 }
 0x5e4   : > { %5432 = vmatpush1.bf16.msra.mxu1 %v9497_v63  ;;  %5370 = vmatprep.subr.bf16.mxu0 %v9498_v0  ;;  %v9507_v63 = vld [vmem:[#allocation68_spill] sm:$0xff] }
 0x5e5   : > { %5434 = vmatprep.subr.bf16.mxu1 %v9499_v47  ;;  %v9517_v47 = vld [vmem:[#allocation85_spill] sm:$0xff] }
 0x5e7   : > { %5372 = vmatpush1.bf16.msra.mxu0 %v9500_v52  ;;  %v9508_v52 = vld [vmem:[#allocation69_spill] sm:$0xff] }
 0x5e8   : > { %5436 = vmatpush1.bf16.msra.mxu1 %v9501_v3  ;;  %5374 = vmatprep.subr.bf16.mxu0 %v9502_v50  ;;  %v9509_v50 = vld [vmem:[#allocation70_spill] sm:$0xff]  ;;  %v9515_v3 = vld [vmem:[#allocation83_spill] sm:$0xff] }
 0x5e9   : > { %5438 = vmatprep.subr.bf16.mxu1 %v9503_v7  ;;  %v9514_v7 = vld [vmem:[#allocation82_spill] sm:$0xff] }
 0x5eb   : > { %5376 = vmatpush1.bf16.msra.mxu0 %v9504_v29  ;;  %v9512_v29 = vld [vmem:[#allocation80_spill] sm:$0xff] }
 0x5ec   : > { %5440 = vmatpush1.bf16.msra.mxu1 %v9505_v61  ;;  %5442 = vmatprep.subr.bf16.mxu0 %v9506_v62  ;;  %v9510_v61 = vld [vmem:[#allocation78_spill] sm:$0xff]  ;;  %v9511_v62 = vld [vmem:[#allocation79_spill] sm:$0xff] }
 0x5ed   : > { %5506 = vmatprep.subr.bf16.mxu1 %v9507_v63  ;;  %v9513_v63 = vld [vmem:[#allocation81_spill] sm:$0xff] }
 0x5ee   : > { %2873 = vmatmul.mubr.f32.vlgmr.msra.gmra.mrb[24].mxu0 %v8367_v31 }
 0x5ef   : > { %2944 = vmatmul.mubr.f32.vlgmr.msra.gmra.mrb[24].mxu1 %v8367_v31  ;;  %5444 = vmatpush1.bf16.msra.mxu0 %v9508_v52  ;;  %v9516_v52 = vld [vmem:[#allocation84_spill] sm:$0xff] }
 0x5f0   : > { %3014 = vmatprep.mubr.f32.mxu0 %v8294_v26  ;;  %5508 = vmatpush1.bf16.msra.mxu1 %v9509_v50  ;;  %v9518_v50 = vld [vmem:[#allocation86_spill] sm:$0xff] }
 0x5f1   : > { %3085 = vmatprep.mubr.f32.mxu1 %v8294_v26  ;;  %5446 = vmatprep.subr.bf16.mxu0 %v9432_v37  ;;  %v9519_v26 = vld [vmem:[#allocation87_spill] sm:$0xff] }
 0x5f2   : > { %5510 = vmatprep.subr.bf16.mxu1 %v9510_v61  ;;  %v9520_v61 = vld [vmem:[#allocation89_spill] sm:$0xff] }
 0x5f3   : > { %5448 = vmatpush1.bf16.msra.mxu0 %v9511_v62 }
 0x5f4   : > { %5512 = vmatpush1.bf16.msra.mxu1 %v9512_v29  ;;  %5450 = vmatprep.subr.bf16.mxu0 %v9513_v63  ;;  %v9521_v63 = vld [vmem:[#allocation92_spill] sm:$0xff] }
 0x5f5   : > { %5514 = vmatprep.subr.bf16.mxu1 %v9514_v7  ;;  %v9522_v7 = vld [vmem:[#allocation93_spill] sm:$0xff] }
 0x5f7   : > { %5452 = vmatpush1.bf16.msra.mxu0 %v9515_v3 }
 0x5f8   : > { %5516 = vmatpush1.bf16.msra.mxu1 %v9516_v52  ;;  %5454 = vmatprep.subr.bf16.mxu0 %v9517_v47  ;;  %v9523_v52 = vld [vmem:[#allocation94_spill] sm:$0xff] }
 0x5f9   : > { %5518 = vmatprep.subr.bf16.mxu1 %v9518_v50 }
 0x5fb   : > { %5456 = vmatpush1.bf16.msra.mxu0 %v9519_v26 }
 0x5fc   : > { %5520 = vmatpush1.bf16.msra.mxu1 %v9363_v20  ;;  %5458 = vmatprep.subr.bf16.mxu0 %v9520_v61 }
 0x5fd   : > { %5522 = vmatprep.subr.bf16.mxu1 %v9365_v46 }
 0x5ff   : > { %5460 = vmatpush1.bf16.msra.mxu0 %v9444_v34 }
 0x600   : > { %5524 = vmatpush1.bf16.msra.mxu1 %v9521_v63  ;;  %5462 = vmatprep.subr.bf16.mxu0 %v9522_v7 }
 0x601   : > { %v2352_v3 = vpop.f32.mrb[18].mxu0  ;;  %5526 = vmatprep.subr.bf16.mxu1 %v9523_v52 }
 0x602   : > { %v2423_v47 = vpop.f32.mrb[18].mxu1  ;;  %v2354_v50 = vpop.f32.mrb[19].mxu0 }
 0x603   : > { %v2499_v26 = vcombine.low %v2352_v3, %v2354_v50  ;;  %v2425_v29 = vpop.f32.mrb[19].mxu1  ;;  %5464 = vmatpush1.bf16.msra.mxu0 %v9287_v15  ;;  %v9524_v3 = vld [vmem:[#allocation128_spill] sm:$0xff]  ;;  %v9525_v50 = vld [vmem:[#allocation129_spill] sm:$0xff] }
 0x604   : > { %v2500_v61 = vcombine.low %v2423_v47, %v2425_v29  ;;  %5528 = vmatpush1.bf16.msra.mxu1 %v9288_v18  ;;  %5466 = vmatprep.subr.bf16.mxu0 %v9289_v28  ;;  %v9526_v29 = vld [vmem:[#allocation130_spill] sm:$0xff]  ;;  %v9529_v47 = vld [vmem:[#allocation133_spill] sm:$0xff] }
 0x605   : > { %v2507_v63 = vrot.slane %v2499_v26, %v7861_v57  ;;  %5530 = vmatprep.subr.bf16.mxu1 %v9290_v23  ;;  %v9532_v26 = vld [vmem:[#allocation9_spill] sm:$0xff] }
 0x606   : > { %v2514_v7 = vrot.slane %v2500_v61, %v7861_v57  ;;  %v9527_v61 = vld [vmem:[#allocation131_spill] sm:$0xff] }
 0x607   : > { %5468 = vmatpush1.bf16.msra.mxu0 %v9291_v5 }
 0x608   : > { %v2515_v52 = vcombine.low %v2507_v63, %v2514_v7  ;;  %5532 = vmatpush1.bf16.msra.mxu1 %v9370_v9  ;;  %5470 = vmatprep.subr.bf16.mxu0 %v9371_v35  ;;  %v9528_v63 = vld [vmem:[#allocation132_spill] sm:$0xff] }
 0x609   : > { %5534 = vmatprep.subr.bf16.mxu1 %v9372_v56  ;;  %v9531_v7 = vld [vmem:[#allocation8_spill] sm:$0xff] }
 0x60a   : > { %2519 = vst [vmem:[%s8029_s7 + $0x28] sm:$0xff] %v2515_v52  ;;  %2523 = vst [vmem:[%s8029_s7 + $0x38] sm:$0xff] %v2515_v52  ;;  %v9530_v52 = vld [vmem:[#allocation7_spill] sm:$0xff] }
 0x60b   : > { %5472 = vmatpush1.bf16.msra.mxu0 %v9373_v27 }
 0x60c   : > { %5536 = vmatpush1.bf16.msra.mxu1 %v9374_v2  ;;  %5474 = vmatprep.subr.bf16.mxu0 %v9297_v55 }
 0x60d   : > { %5538 = vmatprep.subr.bf16.mxu1 %v9298_v30 }
 0x60f   : > { %5476 = vmatpush1.bf16.msra.mxu0 %v9299_v24 }
 0x610   : > { %5540 = vmatpush1.bf16.msra.mxu1 %v9300_v38  ;;  %5478 = vmatprep.subr.bf16.mxu0 %v9301_v51 }
 0x611   : > { %5542 = vmatprep.subr.bf16.mxu1 %v9302_v22 }
 0x613   : > { %5480 = vmatpush1.bf16.msra.mxu0 %v9303_v4 }
 0x614   : > { %5544 = vmatpush1.bf16.msra.mxu1 %v9304_v10  ;;  %5482 = vmatprep.subr.bf16.mxu0 %v9305_v59 }
 0x615   : > { %5546 = vmatprep.subr.bf16.mxu1 %v9306_v8 }
 0x617   : > { %5484 = vmatpush1.bf16.msra.mxu0 %v9307_v36 }
 0x618   : > { %5548 = vmatpush1.bf16.msra.mxu1 %v9229_v39  ;;  %5486 = vmatprep.subr.bf16.mxu0 %v9230_v49 }
 0x619   : > { %5550 = vmatprep.subr.bf16.mxu1 %v9231_v58 }
 0x61b   : > { %5488 = vmatpush1.bf16.msra.mxu0 %v9232_v12 }
 0x61c   : > { %5552 = vmatpush1.bf16.msra.mxu1 %v9233_v48  ;;  %5490 = vmatprep.subr.bf16.mxu0 %v9234_v25 }
 0x61d   : > { %5554 = vmatprep.subr.bf16.mxu1 %v9375_v17 }
 0x61f   : > { %5492 = vmatpush1.bf16.msra.mxu0 %v9236_v16 }
 0x620   : > { %5556 = vmatpush1.bf16.msra.mxu1 %v9237_v60  ;;  %5494 = vmatprep.subr.bf16.mxu0 %v9238_v45 }
 0x621   : > { %5558 = vmatprep.subr.bf16.mxu1 %v9239_v54 }
 0x623   : > { %5496 = vmatpush1.bf16.msra.mxu0 %v7621_v21 }
 0x624   : > { %5560 = vmatpush1.bf16.msra.mxu1 %v7623_v44  ;;  %5498 = vmatprep.subr.bf16.mxu0 %v7633_v32 }
 0x625   : > { %5562 = vmatprep.subr.bf16.mxu1 %v9448_v11 }
 0x627   : > { %5500 = vmatpush1.bf16.msra.mxu0 %v9524_v3  ;;  %v9533_v3 = vld [vmem:[#allocation75_spill] sm:$0xff] }
 0x628   : > { %5564 = vmatpush1.bf16.msra.mxu1 %v9525_v50  ;;  %5502 = vmatprep.subr.bf16.mxu0 %v9526_v29  ;;  %v9534_v50 = vld [vmem:[#allocation10_spill] sm:$0xff]  ;;  %v9543_v29 = vld [vmem:[#allocation21_spill] sm:$0xff]  ;;  %6147 = vtanh.f32 %v9533_v3 }
 0x629   : > { %5566 = vmatprep.subr.bf16.mxu1 %v9527_v61  ;;  %v9541_v61 = vld [vmem:[#allocation19_spill] sm:$0xff] }
 0x62b   : > { %5504 = vmatpush1.bf16.msra.mxu0 %v9528_v63  ;;  %v9535_v63 = vld [vmem:[#allocation12_spill] sm:$0xff] }
 0x62c   : > { %5568 = vmatpush1.bf16.msra.mxu1 %v9529_v47  ;;  %5570 = vmatprep.subr.bf16.mxu0 %v9530_v52  ;;  %v9536_v52 = vld [vmem:[#allocation14_spill] sm:$0xff]  ;;  %v9538_v47 = vld [vmem:[#allocation16_spill] sm:$0xff] }
 0x62d   : > { %5634 = vmatprep.subr.bf16.mxu1 %v9531_v7  ;;  %v9537_v7 = vld [vmem:[#allocation15_spill] sm:$0xff] }
 0x62e   : > { %3015 = vmatmul.mubr.f32.vlgmr.msra.gmra.mrb[26].mxu0 %v8367_v31 }
 0x62f   : > { %3086 = vmatmul.mubr.f32.vlgmr.msra.gmra.mrb[26].mxu1 %v8367_v31  ;;  %5572 = vmatpush1.bf16.msra.mxu0 %v9532_v26  ;;  %v9539_v31 = vld [vmem:[#allocation17_spill] sm:$0xff]  ;;  %v9540_v26 = vld [vmem:[#allocation18_spill] sm:$0xff] }
 0x630   : > { %3252 = vmatprep.mubr.f32.mxu0 %v9533_v3  ;;  %5636 = vmatpush1.bf16.msra.mxu1 %v9534_v50  ;;  %v9542_v50 = vld [vmem:[#allocation20_spill] sm:$0xff] }
 0x631   : > { %3323 = vmatprep.mubr.f32.mxu1 %v9533_v3  ;;  %5574 = vmatprep.subr.bf16.mxu0 %v9459_v40 }
 0x632   : > { %5638 = vmatprep.subr.bf16.mxu1 %v9535_v63  ;;  %v9544_v63 = vld [vmem:[#allocation23_spill] sm:$0xff] }
 0x633   : > { %5576 = vmatpush1.bf16.msra.mxu0 %v9383_v6 }
 0x634   : > { %5640 = vmatpush1.bf16.msra.mxu1 %v9536_v52  ;;  %5578 = vmatprep.subr.bf16.mxu0 %v9537_v7  ;;  %v9545_v7 = vld [vmem:[#allocation26_spill] sm:$0xff] }
 0x635   : > { %5642 = vmatprep.subr.bf16.mxu1 %v9538_v47  ;;  %v9546_v47 = vld [vmem:[#allocation27_spill] sm:$0xff] }
 0x637   : > { %5580 = vmatpush1.bf16.msra.mxu0 %v9539_v31 }
 0x638   : > { %5644 = vmatpush1.bf16.msra.mxu1 %v9540_v26  ;;  %5582 = vmatprep.subr.bf16.mxu0 %v9541_v61  ;;  %v9547_v26 = vld [vmem:[#allocation28_spill] sm:$0xff] }
 0x639   : > { %5646 = vmatprep.subr.bf16.mxu1 %v9542_v50 }
 0x63b   : > { %5584 = vmatpush1.bf16.msra.mxu0 %v9543_v29 }
 0x63c   : > { %5648 = vmatpush1.bf16.msra.mxu1 %v9392_v13  ;;  %5586 = vmatprep.subr.bf16.mxu0 %v9544_v63 }
 0x63d   : > { %5650 = vmatprep.subr.bf16.mxu1 %v9315_v33 }
 0x63f   : > { %5588 = vmatpush1.bf16.msra.mxu0 %v9393_v14 }
 0x640   : > { %5652 = vmatpush1.bf16.msra.mxu1 %v9545_v7  ;;  %5590 = vmatprep.subr.bf16.mxu0 %v9546_v47 }
 0x641   : > { %v2590_v31 = vpop.f32.mrb[20].mxu0  ;;  %5654 = vmatprep.subr.bf16.mxu1 %v9547_v26  ;;  %v9548_v26 = vld [vmem:[#allocation30_spill] sm:$0xff] }
 0x642   : > { %v2661_v61 = vpop.f32.mrb[20].mxu1  ;;  %v2592_v50 = vpop.f32.mrb[21].mxu0 }
 0x643   : > { %v3100_v29 = vcombine.low %v2590_v31, %v2592_v50  ;;  %v2663_v52 = vpop.f32.mrb[21].mxu1  ;;  %5592 = vmatpush1.bf16.msra.mxu0 %v6722_v41  ;;  %v9549_v50 = vld [vmem:[#allocation31_spill] sm:$0xff]  ;;  %v9550_v31 = vld [vmem:[#allocation32_spill] sm:$0xff] }
 0x644   : > { %v3101_v63 = vcombine.low %v2661_v61, %v2663_v52  ;;  %5656 = vmatpush1.bf16.msra.mxu1 %v6726_v42  ;;  %5594 = vmatprep.subr.bf16.mxu0 %v6728_v43  ;;  %v9551_v61 = vld [vmem:[#allocation33_spill] sm:$0xff]  ;;  %v9552_v52 = vld [vmem:[#allocation34_spill] sm:$0xff] }
 0x645   : > { %v3108_v7 = vrot.slane %v3100_v29, %v7861_v57  ;;  %5658 = vmatprep.subr.bf16.mxu1 %v6740_v53  ;;  %v9553_v29 = vld [vmem:[#allocation35_spill] sm:$0xff]  ;;  %v9554_v53 = vld [vmem:[#allocation36_spill] sm:$0xff] }
 0x646   : > { %v3115_v47 = vrot.slane %v3101_v63, %v7861_v57  ;;  %v9555_v63 = vld [vmem:[#allocation37_spill] sm:$0xff] }
 0x647   : > { %5596 = vmatpush1.bf16.msra.mxu0 %v9548_v26  ;;  %v9556_v26 = vld [vmem:[#allocation38_spill] sm:$0xff] }
 0x648   : > { %v3116_v14 = vcombine.low %v3108_v7, %v3115_v47  ;;  %5660 = vmatpush1.bf16.msra.mxu1 %v6762_v1  ;;  %5598 = vmatprep.subr.bf16.mxu0 %v9549_v50  ;;  %v9557_v47 = vld [vmem:[#allocation39_spill] sm:$0xff]  ;;  %v9558_v7 = vld [vmem:[#allocation40_spill] sm:$0xff]  ;;  %v9559_v50 = vld [vmem:[#allocation41_spill] sm:$0xff] }
 0x649   : > { %5662 = vmatprep.subr.bf16.mxu1 %v9550_v31  ;;  %v9560_v31 = vld [vmem:[#allocation42_spill] sm:$0xff] }
 0x64a   : > { %3136 = vst [vmem:[%s7875_s27 + $0x40] sm:$0xff] %v3116_v14  ;;  %3184 = vst [vmem:[%s7875_s27 + $0x50] sm:$0xff] %v3116_v14  ;;  %v9561_v14 = vld [vmem:[#allocation43_spill] sm:$0xff] }
 0x64b   : > { %5600 = vmatpush1.bf16.msra.mxu0 %v9551_v61  ;;  %v9562_v61 = vld [vmem:[#allocation44_spill] sm:$0xff] }
 0x64c   : > { %5664 = vmatpush1.bf16.msra.mxu1 %v9552_v52  ;;  %5602 = vmatprep.subr.bf16.mxu0 %v9553_v29  ;;  %v9563_v52 = vld [vmem:[#allocation45_spill] sm:$0xff] }
 0x64d   : > { %5666 = vmatprep.subr.bf16.mxu1 %v9554_v53  ;;  %v9564_v53 = vld [vmem:[#allocation47_spill] sm:$0xff] }
 0x64f   : > { %5604 = vmatpush1.bf16.msra.mxu0 %v9555_v63  ;;  %v9565_v63 = vld [vmem:[#allocation48_spill] sm:$0xff] }
 0x650   : > { %5668 = vmatpush1.bf16.msra.mxu1 %v9556_v26  ;;  %5606 = vmatprep.subr.bf16.mxu0 %v9557_v47  ;;  %v9566_v26 = vld [vmem:[#allocation49_spill] sm:$0xff]  ;;  %v9567_v47 = vld [vmem:[#allocation50_spill] sm:$0xff] }
 0x651   : > { %5670 = vmatprep.subr.bf16.mxu1 %v9558_v7  ;;  %v9568_v7 = vld [vmem:[#allocation51_spill] sm:$0xff] }
 0x653   : > { %5608 = vmatpush1.bf16.msra.mxu0 %v9559_v50  ;;  %v9569_v50 = vld [vmem:[#allocation52_spill] sm:$0xff] }
 0x654   : > { %5672 = vmatpush1.bf16.msra.mxu1 %v9560_v31  ;;  %5610 = vmatprep.subr.bf16.mxu0 %v9561_v14  ;;  %v9570_v31 = vld [vmem:[#allocation53_spill] sm:$0xff]  ;;  %v9571_v14 = vld [vmem:[#allocation54_spill] sm:$0xff] }
 0x655   : > { %5674 = vmatprep.subr.bf16.mxu1 %v9562_v61  ;;  %v9572_v61 = vld [vmem:[#allocation55_spill] sm:$0xff] }
 0x657   : > { %5612 = vmatpush1.bf16.msra.mxu0 %v9563_v52  ;;  %v9573_v52 = vld [vmem:[#allocation56_spill] sm:$0xff] }
 0x658   : > { %5676 = vmatpush1.bf16.msra.mxu1 %v9485_v19  ;;  %5614 = vmatprep.subr.bf16.mxu0 %v9564_v53  ;;  %v9574_v19 = vld [vmem:[#allocation57_spill] sm:$0xff]  ;;  %v9575_v53 = vld [vmem:[#allocation58_spill] sm:$0xff] }
 0x659   : > { %5678 = vmatprep.subr.bf16.mxu1 %v9565_v63 }
 0x65b   : > { %5616 = vmatpush1.bf16.msra.mxu0 %v9566_v26  ;;  %v9576_v26 = vld [vmem:[#allocation60_spill] sm:$0xff] }
 0x65c   : > { %5680 = vmatpush1.bf16.msra.mxu1 %v9567_v47  ;;  %5618 = vmatprep.subr.bf16.mxu0 %v9568_v7  ;;  %v9577_v47 = vld [vmem:[#allocation61_spill] sm:$0xff]  ;;  %v9578_v7 = vld [vmem:[#allocation62_spill] sm:$0xff] }
 0x65d   : > { %5682 = vmatprep.subr.bf16.mxu1 %v9569_v50  ;;  %v9579_v50 = vld [vmem:[#allocation63_spill] sm:$0xff] }
 0x65f   : > { %5620 = vmatpush1.bf16.msra.mxu0 %v9570_v31  ;;  %v9580_v31 = vld [vmem:[#allocation64_spill] sm:$0xff] }
 0x660   : > { %5684 = vmatpush1.bf16.msra.mxu1 %v9571_v14  ;;  %5622 = vmatprep.subr.bf16.mxu0 %v9572_v61  ;;  %v9581_v14 = vld [vmem:[#allocation65_spill] sm:$0xff]  ;;  %v9582_v61 = vld [vmem:[#allocation66_spill] sm:$0xff] }
 0x661   : > { %5686 = vmatprep.subr.bf16.mxu1 %v9573_v52  ;;  %v9583_v52 = vld [vmem:[#allocation67_spill] sm:$0xff] }
 0x663   : > { %5624 = vmatpush1.bf16.msra.mxu0 %v9574_v19  ;;  %v9584_v19 = vld [vmem:[#allocation68_spill] sm:$0xff] }
 0x664   : > { %5688 = vmatpush1.bf16.msra.mxu1 %v9575_v53  ;;  %5626 = vmatprep.subr.bf16.mxu0 %v9498_v0  ;;  %v9585_v53 = vld [vmem:[#allocation76_spill] sm:$0xff] }
 0x665   : > { %5690 = vmatprep.subr.bf16.mxu1 %v9576_v26  ;;  %v9586_v26 = vld [vmem:[#allocation69_spill] sm:$0xff]  ;;  %6149 = vtanh.f32 %v9585_v53 }
 0x667   : > { %5628 = vmatpush1.bf16.msra.mxu0 %v9577_v47  ;;  %v9596_v47 = vld [vmem:[#allocation87_spill] sm:$0xff] }
 0x668   : > { %5692 = vmatpush1.bf16.msra.mxu1 %v9578_v7  ;;  %5630 = vmatprep.subr.bf16.mxu0 %v9579_v50  ;;  %v9587_v7 = vld [vmem:[#allocation70_spill] sm:$0xff]  ;;  %v9594_v50 = vld [vmem:[#allocation85_spill] sm:$0xff] }
 0x669   : > { %5694 = vmatprep.subr.bf16.mxu1 %v9580_v31  ;;  %v9592_v31 = vld [vmem:[#allocation83_spill] sm:$0xff] }
 0x66b   : > { %5632 = vmatpush1.bf16.msra.mxu0 %v9581_v14  ;;  %v9588_v14 = vld [vmem:[#allocation78_spill] sm:$0xff] }
 0x66c   : > { %5696 = vmatpush1.bf16.msra.mxu1 %v9582_v61  ;;  %5698 = vmatprep.subr.bf16.mxu0 %v9583_v52  ;;  %v9589_v52 = vld [vmem:[#allocation80_spill] sm:$0xff]  ;;  %v9591_v61 = vld [vmem:[#allocation82_spill] sm:$0xff] }
 0x66d   : > { %5762 = vmatprep.subr.bf16.mxu1 %v9584_v19  ;;  %v9590_v19 = vld [vmem:[#allocation81_spill] sm:$0xff] }
 0x66e   : > { %3253 = vmatmul.mubr.f32.vlgmr.msra.gmra.mrb[28].mxu0 %v9585_v53 }
 0x66f   : > { %3324 = vmatmul.mubr.f32.vlgmr.msra.gmra.mrb[28].mxu1 %v9585_v53  ;;  %5700 = vmatpush1.bf16.msra.mxu0 %v9586_v26  ;;  %v9593_v26 = vld [vmem:[#allocation84_spill] sm:$0xff] }
 0x670   : > { %3394 = vmatprep.mubr.f32.mxu0 %v9533_v3  ;;  %5764 = vmatpush1.bf16.msra.mxu1 %v9587_v7  ;;  %v9595_v7 = vld [vmem:[#allocation86_spill] sm:$0xff] }
 0x671   : > { %3465 = vmatprep.mubr.f32.mxu1 %v9533_v3  ;;  %5702 = vmatprep.subr.bf16.mxu0 %v9432_v37  ;;  %v8588_v3 = vpop.eup %6147 }
 0x672   : > { %5766 = vmatprep.subr.bf16.mxu1 %v9588_v14  ;;  %v9597_v14 = vld [vmem:[#allocation89_spill] sm:$0xff] }
 0x673   : > { %5704 = vmatpush1.bf16.msra.mxu0 %v9511_v62 }
 0x674   : > { %5768 = vmatpush1.bf16.msra.mxu1 %v9589_v52  ;;  %5706 = vmatprep.subr.bf16.mxu0 %v9590_v19  ;;  %v9598_v19 = vld [vmem:[#allocation92_spill] sm:$0xff] }
 0x675   : > { %5770 = vmatprep.subr.bf16.mxu1 %v9591_v61  ;;  %v9599_v61 = vld [vmem:[#allocation93_spill] sm:$0xff] }
 0x677   : > { %5708 = vmatpush1.bf16.msra.mxu0 %v9592_v31 }
 0x678   : > { %5772 = vmatpush1.bf16.msra.mxu1 %v9593_v26  ;;  %5710 = vmatprep.subr.bf16.mxu0 %v9594_v50  ;;  %v9600_v26 = vld [vmem:[#allocation94_spill] sm:$0xff] }
 0x679   : > { %5774 = vmatprep.subr.bf16.mxu1 %v9595_v7 }
 0x67b   : > { %5712 = vmatpush1.bf16.msra.mxu0 %v9596_v47 }
 0x67c   : > { %5776 = vmatpush1.bf16.msra.mxu1 %v9363_v20  ;;  %5714 = vmatprep.subr.bf16.mxu0 %v9597_v14 }
 0x67d   : > { %5778 = vmatprep.subr.bf16.mxu1 %v9365_v46 }
 0x67f   : > { %5716 = vmatpush1.bf16.msra.mxu0 %v9444_v34 }
 0x680   : > { %5780 = vmatpush1.bf16.msra.mxu1 %v9598_v19  ;;  %5718 = vmatprep.subr.bf16.mxu0 %v9599_v61 }
 0x681   : > { %v2732_v31 = vpop.f32.mrb[22].mxu0  ;;  %5782 = vmatprep.subr.bf16.mxu1 %v9600_v26 }
 0x682   : > { %v2803_v50 = vpop.f32.mrb[22].mxu1  ;;  %v2734_v7 = vpop.f32.mrb[23].mxu0 }
 0x683   : > { %v3117_v47 = vcombine.low %v2732_v31, %v2734_v7  ;;  %v2805_v52 = vpop.f32.mrb[23].mxu1  ;;  %5720 = vmatpush1.bf16.msra.mxu0 %v9287_v15  ;;  %v9604_v31 = vld [vmem:[#allocation131_spill] sm:$0xff]  ;;  %v9608_v7 = vld [vmem:[#allocation8_spill] sm:$0xff] }
 0x684   : > { %v3118_v14 = vcombine.low %v2803_v50, %v2805_v52  ;;  %5784 = vmatpush1.bf16.msra.mxu1 %v9288_v18  ;;  %5722 = vmatprep.subr.bf16.mxu0 %v9289_v28  ;;  %v9603_v50 = vld [vmem:[#allocation130_spill] sm:$0xff]  ;;  %v9606_v52 = vld [vmem:[#allocation133_spill] sm:$0xff] }
 0x685   : > { %v3125_v19 = vrot.slane %v3117_v47, %v7861_v57  ;;  %5786 = vmatprep.subr.bf16.mxu1 %v9290_v23  ;;  %v9607_v47 = vld [vmem:[#allocation7_spill] sm:$0xff] }
 0x686   : > { %v3132_v61 = vrot.slane %v3118_v14, %v7861_v57  ;;  %v9609_v14 = vld [vmem:[#allocation9_spill] sm:$0xff] }
 0x687   : > { %5724 = vmatpush1.bf16.msra.mxu0 %v9291_v5 }
 0x688   : > { %v3133_v26 = vcombine.low %v3125_v19, %v3132_v61  ;;  %5788 = vmatpush1.bf16.msra.mxu1 %v9370_v9  ;;  %5726 = vmatprep.subr.bf16.mxu0 %v9371_v35  ;;  %v9601_v19 = vld [vmem:[#allocation128_spill] sm:$0xff] }
 0x689   : > { %5790 = vmatprep.subr.bf16.mxu1 %v9372_v56  ;;  %v9605_v61 = vld [vmem:[#allocation132_spill] sm:$0xff] }
 0x68a   : > { %3137 = vst [vmem:[%s7875_s27 + $0x48] sm:$0xff] %v3133_v26  ;;  %3185 = vst [vmem:[%s7875_s27 + $0x58] sm:$0xff] %v3133_v26  ;;  %v9602_v26 = vld [vmem:[#allocation129_spill] sm:$0xff] }
 0x68b   : > { %5728 = vmatpush1.bf16.msra.mxu0 %v9373_v27 }
 0x68c   : > { %5792 = vmatpush1.bf16.msra.mxu1 %v9374_v2  ;;  %5730 = vmatprep.subr.bf16.mxu0 %v9297_v55 }
 0x68d   : > { %5794 = vmatprep.subr.bf16.mxu1 %v9298_v30 }
 0x68f   : > { %5732 = vmatpush1.bf16.msra.mxu0 %v9299_v24 }
 0x690   : > { %5796 = vmatpush1.bf16.msra.mxu1 %v9300_v38  ;;  %5734 = vmatprep.subr.bf16.mxu0 %v9301_v51 }
 0x691   : > { %5798 = vmatprep.subr.bf16.mxu1 %v9302_v22 }
 0x693   : > { %5736 = vmatpush1.bf16.msra.mxu0 %v9303_v4 }
 0x694   : > { %5800 = vmatpush1.bf16.msra.mxu1 %v9304_v10  ;;  %5738 = vmatprep.subr.bf16.mxu0 %v9305_v59 }
 0x695   : > { %5802 = vmatprep.subr.bf16.mxu1 %v9306_v8 }
 0x697   : > { %5740 = vmatpush1.bf16.msra.mxu0 %v9307_v36 }
 0x698   : > { %5804 = vmatpush1.bf16.msra.mxu1 %v9229_v39  ;;  %5742 = vmatprep.subr.bf16.mxu0 %v9230_v49 }
 0x699   : > { %5806 = vmatprep.subr.bf16.mxu1 %v9231_v58 }
 0x69b   : > { %5744 = vmatpush1.bf16.msra.mxu0 %v9232_v12 }
 0x69c   : > { %5808 = vmatpush1.bf16.msra.mxu1 %v9233_v48  ;;  %5746 = vmatprep.subr.bf16.mxu0 %v9234_v25 }
 0x69d   : > { %5810 = vmatprep.subr.bf16.mxu1 %v9375_v17 }
 0x69f   : > { %5748 = vmatpush1.bf16.msra.mxu0 %v9236_v16 }
 0x6a0   : > { %5812 = vmatpush1.bf16.msra.mxu1 %v9237_v60  ;;  %5750 = vmatprep.subr.bf16.mxu0 %v9238_v45 }
 0x6a1   : > { %5814 = vmatprep.subr.bf16.mxu1 %v9239_v54 }
 0x6a3   : > { %5752 = vmatpush1.bf16.msra.mxu0 %v7621_v21 }
 0x6a4   : > { %5816 = vmatpush1.bf16.msra.mxu1 %v7623_v44  ;;  %5754 = vmatprep.subr.bf16.mxu0 %v7633_v32 }
 0x6a5   : > { %5818 = vmatprep.subr.bf16.mxu1 %v9448_v11 }
 0x6a7   : > { %5756 = vmatpush1.bf16.msra.mxu0 %v9601_v19  ;;  %v9619_v19 = vld [vmem:[#allocation21_spill] sm:$0xff] }
 0x6a8   : > { %5820 = vmatpush1.bf16.msra.mxu1 %v9602_v26  ;;  %5758 = vmatprep.subr.bf16.mxu0 %v9603_v50  ;;  %v9610_v50 = vld [vmem:[#allocation10_spill] sm:$0xff]  ;;  %v9617_v26 = vld [vmem:[#allocation19_spill] sm:$0xff] }
 0x6a9   : > { %5822 = vmatprep.subr.bf16.mxu1 %v9604_v31  ;;  %v9615_v31 = vld [vmem:[#allocation17_spill] sm:$0xff] }
 0x6ab   : > { %5760 = vmatpush1.bf16.msra.mxu0 %v9605_v61  ;;  %v9614_v61 = vld [vmem:[#allocation16_spill] sm:$0xff] }
 0x6ac   : > { %5824 = vmatpush1.bf16.msra.mxu1 %v9606_v52  ;;  %5826 = vmatprep.subr.bf16.mxu0 %v9607_v47  ;;  %v9611_v52 = vld [vmem:[#allocation12_spill] sm:$0xff]  ;;  %v9612_v47 = vld [vmem:[#allocation14_spill] sm:$0xff] }
 0x6ad   : > { %5890 = vmatprep.subr.bf16.mxu1 %v9608_v7  ;;  %v9613_v7 = vld [vmem:[#allocation15_spill] sm:$0xff] }
 0x6ae   : > { %3395 = vmatmul.mubr.f32.vlgmr.msra.gmra.mrb[30].mxu0 %v9585_v53 }
 0x6af   : > { %3466 = vmatmul.mubr.f32.vlgmr.msra.gmra.mrb[30].mxu1 %v9585_v53  ;;  %5828 = vmatpush1.bf16.msra.mxu0 %v9609_v14  ;;  %v9616_v14 = vld [vmem:[#allocation18_spill] sm:$0xff]  ;;  %v9660_v53 = vld [vmem:[#allocation67_spill] sm:$0xff] }
 0x6b0   : > { %3536 = vmatprep.mubr.f32.mxu0 %v8588_v3  ;;  %5892 = vmatpush1.bf16.msra.mxu1 %v9610_v50  ;;  %v9618_v50 = vld [vmem:[#allocation20_spill] sm:$0xff] }
 0x6b1   : > { %3607 = vmatprep.mubr.f32.mxu1 %v8588_v3  ;;  %5830 = vmatprep.subr.bf16.mxu0 %v9459_v40  ;;  %v9620_v40 = vld [vmem:[#allocation23_spill] sm:$0xff] }
 0x6b2   : > { %5894 = vmatprep.subr.bf16.mxu1 %v9611_v52  ;;  %v9622_v52 = vld [vmem:[#allocation26_spill] sm:$0xff] }
 0x6b3   : > { %5832 = vmatpush1.bf16.msra.mxu0 %v9383_v6  ;;  %v9621_v6 = vld [vmem:[#allocation25_spill] sm:$0xff] }
 0x6b4   : > { %5896 = vmatpush1.bf16.msra.mxu1 %v9612_v47  ;;  %5834 = vmatprep.subr.bf16.mxu0 %v9613_v7  ;;  %v9624_v47 = vld [vmem:[#allocation28_spill] sm:$0xff] }
 0x6b5   : > { %5898 = vmatprep.subr.bf16.mxu1 %v9614_v61  ;;  %v9623_v61 = vld [vmem:[#allocation27_spill] sm:$0xff] }
 0x6b7   : > { %5836 = vmatpush1.bf16.msra.mxu0 %v9615_v31 }
 0x6b8   : > { %5900 = vmatpush1.bf16.msra.mxu1 %v9616_v14  ;;  %5838 = vmatprep.subr.bf16.mxu0 %v9617_v26 }
 0x6b9   : > { %5902 = vmatprep.subr.bf16.mxu1 %v9618_v50  ;;  %v9625_v50 = vld [vmem:[#allocation29_spill] sm:$0xff] }
 0x6bb   : > { %5840 = vmatpush1.bf16.msra.mxu0 %v9619_v19 }
 0x6bc   : > { %5904 = vmatpush1.bf16.msra.mxu1 %v9392_v13  ;;  %5842 = vmatprep.subr.bf16.mxu0 %v9620_v40 }
 0x6bd   : > { %5906 = vmatprep.subr.bf16.mxu1 %v9315_v33 }
 0x6bf   : > { %5844 = vmatpush1.bf16.msra.mxu0 %v9621_v6  ;;  %v9626_v6 = vld [vmem:[#allocation30_spill] sm:$0xff] }
 0x6c0   : > { %5908 = vmatpush1.bf16.msra.mxu1 %v9622_v52  ;;  %5846 = vmatprep.subr.bf16.mxu0 %v9623_v61  ;;  %v9627_v61 = vld [vmem:[#allocation31_spill] sm:$0xff] }
 0x6c1   : > { %v2874_v31 = vpop.f32.mrb[24].mxu0  ;;  %5910 = vmatprep.subr.bf16.mxu1 %v9624_v47  ;;  %v9632_v47 = vld [vmem:[#allocation37_spill] sm:$0xff] }
 0x6c2   : > { %v2945_v26 = vpop.f32.mrb[24].mxu1  ;;  %v2876_v7 = vpop.f32.mrb[25].mxu0 }
 0x6c3   : > { %v3146_v19 = vcombine.low %v2874_v31, %v2876_v7  ;;  %v2947_v14 = vpop.f32.mrb[25].mxu1  ;;  %5848 = vmatpush1.bf16.msra.mxu0 %v6722_v41  ;;  %v9628_v31 = vld [vmem:[#allocation32_spill] sm:$0xff]  ;;  %v9629_v41 = vld [vmem:[#allocation33_spill] sm:$0xff]  ;;  %v9634_v7 = vld [vmem:[#allocation39_spill] sm:$0xff] }
 0x6c4   : > { %v3147_v13 = vcombine.low %v2945_v26, %v2947_v14  ;;  %5912 = vmatpush1.bf16.msra.mxu1 %v6726_v42  ;;  %5850 = vmatprep.subr.bf16.mxu0 %v6728_v43  ;;  %v9630_v42 = vld [vmem:[#allocation34_spill] sm:$0xff]  ;;  %v9631_v43 = vld [vmem:[#allocation36_spill] sm:$0xff] }
 0x6c5   : > { %v3154_v33 = vrot.slane %v3146_v19, %v7861_v57  ;;  %5914 = vmatprep.subr.bf16.mxu1 %v9625_v50  ;;  %v9633_v26 = vld [vmem:[#allocation38_spill] sm:$0xff]  ;;  %v9636_v19 = vld [vmem:[#allocation41_spill] sm:$0xff] }
 0x6c6   : > { %v3161_v40 = vrot.slane %v3147_v13, %v7861_v57  ;;  %v9637_v14 = vld [vmem:[#allocation42_spill] sm:$0xff]  ;;  %v9638_v13 = vld [vmem:[#allocation43_spill] sm:$0xff]  ;;  %v9640_v50 = vld [vmem:[#allocation45_spill] sm:$0xff] }
 0x6c7   : > { %5852 = vmatpush1.bf16.msra.mxu0 %v9626_v6  ;;  %v9643_v6 = vld [vmem:[#allocation49_spill] sm:$0xff] }
 0x6c8   : > { %v3162_v52 = vcombine.low %v3154_v33, %v3161_v40  ;;  %5916 = vmatpush1.bf16.msra.mxu1 %v6762_v1  ;;  %5854 = vmatprep.subr.bf16.mxu0 %v9627_v61  ;;  %v9635_v1 = vld [vmem:[#allocation40_spill] sm:$0xff]  ;;  %v9642_v40 = vld [vmem:[#allocation47_spill] sm:$0xff] }
 0x6c9   : > { %5918 = vmatprep.subr.bf16.mxu1 %v9628_v31  ;;  %v9639_v33 = vld [vmem:[#allocation44_spill] sm:$0xff]  ;;  %v9645_v61 = vld [vmem:[#allocation51_spill] sm:$0xff] }
 0x6ca   : > { %3182 = vst [vmem:[%s8029_s7 + $0x40] sm:$0xff] %v3162_v52  ;;  %3186 = vst [vmem:[%s8029_s7 + $0x50] sm:$0xff] %v3162_v52  ;;  %v9644_v52 = vld [vmem:[#allocation50_spill] sm:$0xff]  ;;  %v9646_v31 = vld [vmem:[#allocation52_spill] sm:$0xff] }
 0x6cb   : > { %5856 = vmatpush1.bf16.msra.mxu0 %v9629_v41  ;;  %v9647_v41 = vld [vmem:[#allocation53_spill] sm:$0xff] }
 0x6cc   : > { %5920 = vmatpush1.bf16.msra.mxu1 %v9630_v42  ;;  %5858 = vmatprep.subr.bf16.mxu0 %v9553_v29  ;;  %v9641_v29 = vld [vmem:[#allocation46_spill] sm:$0xff] }
 0x6cd   : > { %5922 = vmatprep.subr.bf16.mxu1 %v9631_v43  ;;  %v9648_v42 = vld [vmem:[#allocation54_spill] sm:$0xff]  ;;  %v9649_v43 = vld [vmem:[#allocation55_spill] sm:$0xff] }
 0x6cf   : > { %5860 = vmatpush1.bf16.msra.mxu0 %v9632_v47  ;;  %v9650_v47 = vld [vmem:[#allocation56_spill] sm:$0xff] }
 0x6d0   : > { %5924 = vmatpush1.bf16.msra.mxu1 %v9633_v26  ;;  %5862 = vmatprep.subr.bf16.mxu0 %v9634_v7  ;;  %v9651_v26 = vld [vmem:[#allocation57_spill] sm:$0xff]  ;;  %v9653_v7 = vld [vmem:[#allocation60_spill] sm:$0xff] }
 0x6d1   : > { %5926 = vmatprep.subr.bf16.mxu1 %v9635_v1  ;;  %v9654_v1 = vld [vmem:[#allocation61_spill] sm:$0xff] }
 0x6d3   : > { %5864 = vmatpush1.bf16.msra.mxu0 %v9636_v19  ;;  %v9655_v19 = vld [vmem:[#allocation62_spill] sm:$0xff] }
 0x6d4   : > { %5928 = vmatpush1.bf16.msra.mxu1 %v9637_v14  ;;  %5866 = vmatprep.subr.bf16.mxu0 %v9638_v13  ;;  %v9656_v14 = vld [vmem:[#allocation63_spill] sm:$0xff]  ;;  %v9657_v13 = vld [vmem:[#allocation64_spill] sm:$0xff] }
 0x6d5   : > { %5930 = vmatprep.subr.bf16.mxu1 %v9639_v33  ;;  %v9658_v33 = vld [vmem:[#allocation65_spill] sm:$0xff] }
 0x6d7   : > { %5868 = vmatpush1.bf16.msra.mxu0 %v9640_v50  ;;  %v9659_v50 = vld [vmem:[#allocation66_spill] sm:$0xff] }
 0x6d8   : > { %5932 = vmatpush1.bf16.msra.mxu1 %v9641_v29  ;;  %5870 = vmatprep.subr.bf16.mxu0 %v9642_v40  ;;  %v8661_v29 = vpop.eup %6149  ;;  %v9661_v40 = vld [vmem:[#allocation68_spill] sm:$0xff] }
 0x6d9   : > { %5934 = vmatprep.subr.bf16.mxu1 %v9565_v63  ;;  %v9652_v63 = vld [vmem:[#allocation58_spill] sm:$0xff] }
 0x6db   : > { %5872 = vmatpush1.bf16.msra.mxu0 %v9643_v6  ;;  %v9663_v6 = vld [vmem:[#allocation70_spill] sm:$0xff] }
 0x6dc   : > { %5936 = vmatpush1.bf16.msra.mxu1 %v9644_v52  ;;  %5874 = vmatprep.subr.bf16.mxu0 %v9645_v61  ;;  %v9664_v52 = vld [vmem:[#allocation78_spill] sm:$0xff]  ;;  %v9665_v61 = vld [vmem:[#allocation80_spill] sm:$0xff] }
 0x6dd   : > { %5938 = vmatprep.subr.bf16.mxu1 %v9646_v31  ;;  %v9666_v31 = vld [vmem:[#allocation81_spill] sm:$0xff] }
 0x6df   : > { %5876 = vmatpush1.bf16.msra.mxu0 %v9647_v41  ;;  %v9667_v41 = vld [vmem:[#allocation82_spill] sm:$0xff] }
 0x6e0   : > { %5940 = vmatpush1.bf16.msra.mxu1 %v9648_v42  ;;  %5878 = vmatprep.subr.bf16.mxu0 %v9649_v43  ;;  %v9668_v42 = vld [vmem:[#allocation83_spill] sm:$0xff]  ;;  %v9669_v43 = vld [vmem:[#allocation84_spill] sm:$0xff] }
 0x6e1   : > { %5942 = vmatprep.subr.bf16.mxu1 %v9650_v47  ;;  %v9670_v47 = vld [vmem:[#allocation85_spill] sm:$0xff] }
 0x6e3   : > { %5880 = vmatpush1.bf16.msra.mxu0 %v9651_v26  ;;  %v9671_v26 = vld [vmem:[#allocation86_spill] sm:$0xff] }
 0x6e4   : > { %5944 = vmatpush1.bf16.msra.mxu1 %v9652_v63  ;;  %5882 = vmatprep.subr.bf16.mxu0 %v9498_v0  ;;  %v9662_v0 = vld [vmem:[#allocation69_spill] sm:$0xff] }
 0x6e5   : > { %5946 = vmatprep.subr.bf16.mxu1 %v9653_v7  ;;  %v9675_v63 = vld [vmem:[#allocation93_spill] sm:$0xff] }
 0x6e7   : > { %5884 = vmatpush1.bf16.msra.mxu0 %v9654_v1  ;;  %v9676_v1 = vld [vmem:[#allocation94_spill] sm:$0xff] }
 0x6e8   : > { %5948 = vmatpush1.bf16.msra.mxu1 %v9655_v19  ;;  %5886 = vmatprep.subr.bf16.mxu0 %v9656_v14 }
 0x6e9   : > { %5950 = vmatprep.subr.bf16.mxu1 %v9657_v13 }
 0x6eb   : > { %5888 = vmatpush1.bf16.msra.mxu0 %v9658_v33 }
 0x6ec   : > { %5952 = vmatpush1.bf16.msra.mxu1 %v9659_v50  ;;  %5954 = vmatprep.subr.bf16.mxu0 %v9660_v53 }
 0x6ed   : > { %6018 = vmatprep.subr.bf16.mxu1 %v9661_v40 }
 0x6ee   : > { %3537 = vmatmul.mubr.f32.vlgmr.msra.gmra.mrb[32].mxu0 %v8661_v29 }
 0x6ef   : > { %3608 = vmatmul.mubr.f32.vlgmr.msra.gmra.mrb[32].mxu1 %v8661_v29  ;;  %5956 = vmatpush1.bf16.msra.mxu0 %v9662_v0 }
 0x6f0   : > { %3678 = vmatprep.mubr.f32.mxu0 %v8588_v3  ;;  %6020 = vmatpush1.bf16.msra.mxu1 %v9663_v6 }
 0x6f1   : > { %3749 = vmatprep.mubr.f32.mxu1 %v8588_v3  ;;  %5958 = vmatprep.subr.bf16.mxu0 %v9432_v37  ;;  %v9672_v3 = vld [vmem:[#allocation87_spill] sm:$0xff]  ;;  %v9673_v37 = vld [vmem:[#allocation89_spill] sm:$0xff] }
 0x6f2   : > { %6022 = vmatprep.subr.bf16.mxu1 %v9664_v52 }
 0x6f3   : > { %5960 = vmatpush1.bf16.msra.mxu0 %v9511_v62  ;;  %v9674_v62 = vld [vmem:[#allocation92_spill] sm:$0xff] }
 0x6f4   : > { %6024 = vmatpush1.bf16.msra.mxu1 %v9665_v61  ;;  %5962 = vmatprep.subr.bf16.mxu0 %v9666_v31 }
 0x6f5   : > { %6026 = vmatprep.subr.bf16.mxu1 %v9667_v41 }
 0x6f7   : > { %5964 = vmatpush1.bf16.msra.mxu0 %v9668_v42 }
 0x6f8   : > { %6028 = vmatpush1.bf16.msra.mxu1 %v9669_v43  ;;  %5966 = vmatprep.subr.bf16.mxu0 %v9670_v47 }
 0x6f9   : > { %6030 = vmatprep.subr.bf16.mxu1 %v9671_v26 }
 0x6fb   : > { %5968 = vmatpush1.bf16.msra.mxu0 %v9672_v3 }
 0x6fc   : > { %6032 = vmatpush1.bf16.msra.mxu1 %v9363_v20  ;;  %5970 = vmatprep.subr.bf16.mxu0 %v9673_v37 }
 0x6fd   : > { %6034 = vmatprep.subr.bf16.mxu1 %v9365_v46 }
 0x6ff   : > { %5972 = vmatpush1.bf16.msra.mxu0 %v9444_v34 }
 0x700   : > { %6036 = vmatpush1.bf16.msra.mxu1 %v9674_v62  ;;  %5974 = vmatprep.subr.bf16.mxu0 %v9675_v63 }
 0x701   : > { %v3016_v7 = vpop.f32.mrb[26].mxu0  ;;  %6038 = vmatprep.subr.bf16.mxu1 %v9676_v1 }
 0x702   : > { %v3087_v19 = vpop.f32.mrb[26].mxu1  ;;  %v3018_v14 = vpop.f32.mrb[27].mxu0 }
 0x703   : > { %v3163_v13 = vcombine.low %v3016_v7, %v3018_v14  ;;  %v3089_v33 = vpop.f32.mrb[27].mxu1  ;;  %5976 = vmatpush1.bf16.msra.mxu0 %v9287_v15 }
 0x704   : > { %v3164_v20 = vcombine.low %v3087_v19, %v3089_v33  ;;  %6040 = vmatpush1.bf16.msra.mxu1 %v9288_v18  ;;  %5978 = vmatprep.subr.bf16.mxu0 %v9289_v28 }
 0x705   : > { %v3171_v46 = vrot.slane %v3163_v13, %v7861_v57  ;;  %6042 = vmatprep.subr.bf16.mxu1 %v9290_v23 }
 0x706   : > { %v3178_v34 = vrot.slane %v3164_v20, %v7861_v57 }
 0x707   : > { %5980 = vmatpush1.bf16.msra.mxu0 %v9291_v5 }
 0x708   : > { %v3179_v50 = vcombine.low %v3171_v46, %v3178_v34  ;;  %6044 = vmatpush1.bf16.msra.mxu1 %v9370_v9  ;;  %5982 = vmatprep.subr.bf16.mxu0 %v9371_v35 }
 0x709   : > { %6046 = vmatprep.subr.bf16.mxu1 %v9372_v56 }
 0x70a   : > { %3183 = vst [vmem:[%s8029_s7 + $0x48] sm:$0xff] %v3179_v50  ;;  %3187 = vst [vmem:[%s8029_s7 + $0x58] sm:$0xff] %v3179_v50 }
 0x70b   : > { %5984 = vmatpush1.bf16.msra.mxu0 %v9373_v27 }
 0x70c   : > { %6048 = vmatpush1.bf16.msra.mxu1 %v9374_v2  ;;  %5986 = vmatprep.subr.bf16.mxu0 %v9297_v55 }
 0x70d   : > { %6050 = vmatprep.subr.bf16.mxu1 %v9298_v30 }
 0x70f   : > { %5988 = vmatpush1.bf16.msra.mxu0 %v9299_v24 }
 0x710   : > { %6052 = vmatpush1.bf16.msra.mxu1 %v9300_v38  ;;  %5990 = vmatprep.subr.bf16.mxu0 %v9301_v51 }
 0x711   : > { %6054 = vmatprep.subr.bf16.mxu1 %v9302_v22 }
 0x713   : > { %5992 = vmatpush1.bf16.msra.mxu0 %v9303_v4 }
 0x714   : > { %6056 = vmatpush1.bf16.msra.mxu1 %v9304_v10  ;;  %5994 = vmatprep.subr.bf16.mxu0 %v9305_v59 }
 0x715   : > { %6058 = vmatprep.subr.bf16.mxu1 %v9306_v8 }
 0x717   : > { %5996 = vmatpush1.bf16.msra.mxu0 %v9307_v36 }
 0x718   : > { %6060 = vmatpush1.bf16.msra.mxu1 %v9229_v39  ;;  %5998 = vmatprep.subr.bf16.mxu0 %v9230_v49  ;;  %v9678_v49 = vld [vmem:[#allocation129_spill] sm:$0xff] }
 0x719   : > { %6062 = vmatprep.subr.bf16.mxu1 %v9231_v58 }
 0x71b   : > { %6000 = vmatpush1.bf16.msra.mxu0 %v9232_v12  ;;  %v9677_v12 = vld [vmem:[#allocation128_spill] sm:$0xff] }
 0x71c   : > { %6064 = vmatpush1.bf16.msra.mxu1 %v9233_v48  ;;  %6002 = vmatprep.subr.bf16.mxu0 %v9234_v25  ;;  %v9679_v25 = vld [vmem:[#allocation130_spill] sm:$0xff] }
 0x71d   : > { %6066 = vmatprep.subr.bf16.mxu1 %v9375_v17 }
 0x71f   : > { %6004 = vmatpush1.bf16.msra.mxu0 %v9236_v16  ;;  %v9680_v16 = vld [vmem:[#allocation131_spill] sm:$0xff] }
 0x720   : > { %6068 = vmatpush1.bf16.msra.mxu1 %v9237_v60  ;;  %6006 = vmatprep.subr.bf16.mxu0 %v9238_v45  ;;  %v9681_v60 = vld [vmem:[#allocation132_spill] sm:$0xff] }
 0x721   : > { %6070 = vmatprep.subr.bf16.mxu1 %v9239_v54  ;;  %v9682_v54 = vld [vmem:[#allocation133_spill] sm:$0xff] }
 0x723   : > { %6008 = vmatpush1.bf16.msra.mxu0 %v7621_v21 }
 0x724   : > { %6072 = vmatpush1.bf16.msra.mxu1 %v7623_v44  ;;  %6010 = vmatprep.subr.bf16.mxu0 %v7633_v32 }
 0x725   : > { %6074 = vmatprep.subr.bf16.mxu1 %v9448_v11 }
 0x727   : > { %6012 = vmatpush1.bf16.msra.mxu0 %v9677_v12 }
 0x728   : > { %6076 = vmatpush1.bf16.msra.mxu1 %v9678_v49  ;;  %6014 = vmatprep.subr.bf16.mxu0 %v9679_v25 }
 0x729   : > { %6078 = vmatprep.subr.bf16.mxu1 %v9680_v16 }
 0x72b   : > { %6016 = vmatpush1.bf16.msra.mxu0 %v9681_v60 }
 0x72c   : > { %6080 = vmatpush1.bf16.msra.mxu1 %v9682_v54 }
 0x72e   : > { %3679 = vmatmul.mubr.f32.vlgmr.msra.gmra.mrb[34].mxu0 %v8661_v29 }
 0x72f   : > { %3750 = vmatmul.mubr.f32.vlgmr.msra.gmra.mrb[34].mxu1 %v8661_v29 }
 0x741   : > { %v3254_v45 = vpop.f32.mrb[28].mxu0 }
 0x742   : > { %v3325_v32 = vpop.f32.mrb[28].mxu1  ;;  %v3256_v21 = vpop.f32.mrb[29].mxu0 }
 0x743   : > { %v3764_v44 = vcombine.low %v3254_v45, %v3256_v21  ;;  %v3327_v18 = vpop.f32.mrb[29].mxu1 }
 0x744   : > { %v3765_v58 = vcombine.low %v3325_v32, %v3327_v18 }
 0x745   : > { %v3772_v39 = vrot.slane %v3764_v44, %v7861_v57 }
 0x746   : > { %v3779_v48 = vrot.slane %v3765_v58, %v7861_v57 }
 0x748   : > { %v3780_v4 = vcombine.low %v3772_v39, %v3779_v48 }
 0x74a   : > { %3800 = vst [vmem:[%s7875_s27 + $0x60] sm:$0xff] %v3780_v4  ;;  %3848 = vst [vmem:[%s7875_s27 + $0x70] sm:$0xff] %v3780_v4 }
 0x781   : > { %v3396_v5 = vpop.f32.mrb[30].mxu0 }
 0x782   : > { %v3467_v15 = vpop.f32.mrb[30].mxu1  ;;  %v3398_v22 = vpop.f32.mrb[31].mxu0 }
 0x783   : > { %v3781_v28 = vcombine.low %v3396_v5, %v3398_v22  ;;  %v3469_v23 = vpop.f32.mrb[31].mxu1 }
 0x784   : > { %v3782_v59 = vcombine.low %v3467_v15, %v3469_v23 }
 0x785   : > { %v3789_v8 = vrot.slane %v3781_v28, %v7861_v57 }
 0x786   : > { %v3796_v36 = vrot.slane %v3782_v59, %v7861_v57 }
 0x788   : > { %v3797_v55 = vcombine.low %v3789_v8, %v3796_v36 }
 0x78a   : > { %3801 = vst [vmem:[%s7875_s27 + $0x68] sm:$0xff] %v3797_v55  ;;  %3849 = vst [vmem:[%s7875_s27 + $0x78] sm:$0xff] %v3797_v55 }
 0x7c1   : > { %v3538_v30 = vpop.f32.mrb[32].mxu0 }
 0x7c2   : > { %v3609_v24 = vpop.f32.mrb[32].mxu1  ;;  %v3540_v38 = vpop.f32.mrb[33].mxu0 }
 0x7c3   : > { %v3810_v51 = vcombine.low %v3538_v30, %v3540_v38  ;;  %v3611_v10 = vpop.f32.mrb[33].mxu1 }
 0x7c4   : > { %v3811_v9 = vcombine.low %v3609_v24, %v3611_v10 }
 0x7c5   : > { %v3818_v35 = vrot.slane %v3810_v51, %v7861_v57 }
 0x7c6   : > { %v3825_v56 = vrot.slane %v3811_v9, %v7861_v57 }
 0x7c8   : > { %v3826_v27 = vcombine.low %v3818_v35, %v3825_v56 }
 0x7ca   : > { %3846 = vst [vmem:[%s8029_s7 + $0x60] sm:$0xff] %v3826_v27  ;;  %3850 = vst [vmem:[%s8029_s7 + $0x70] sm:$0xff] %v3826_v27 }
 0x801   : > { %v3680_v2 = vpop.f32.mrb[34].mxu0 }
 0x802   : > { %v3751_v17 = vpop.f32.mrb[34].mxu1  ;;  %v3682_v11 = vpop.f32.mrb[35].mxu0 }
 0x803   : > { %v3827_v53 = vcombine.low %v3680_v2, %v3682_v11  ;;  %v3753_v29 = vpop.f32.mrb[35].mxu1 }
 0x804   : > { %v3828_v40 = vcombine.low %v3751_v17, %v3753_v29 }
 0x805   : > { %v3835_v0 = vrot.slane %v3827_v53, %v7861_v57 }
 0x806   : > { %v3842_v6 = vrot.slane %v3828_v40, %v7861_v57 }
 0x808   : > { %v3843_v52 = vcombine.low %v3835_v0, %v3842_v6 }
 0x80a   : > { %3847 = vst [vmem:[%s8029_s7 + $0x68] sm:$0xff] %v3843_v52  ;;  %3851 = vst [vmem:[%s8029_s7 + $0x78] sm:$0xff] %v3843_v52 }
 0x80b PF: > { %p15_p7 = scmp.ge.s32.totalorder %s6252_s25, 5   ;;  %s9683_s21 = smov %s6188_s22 }
 0x80c   : > { %s9684_s22 = smov %s6262_s28  ;;  %s9685_s23 = smov %s6252_s25 }
 0x80d   :  { %17 = sbr.rel (!%p15_p7) target bundleno = 2 (0x2), region = 118 }
 0x814   :  { %3891 = vsyncpa [#allocation4], 1 }
 0x815   :  { %3893 = vsyncpa [#allocation4 + $0x1], 1 }

</bundles_post_ra>
